<compile_context>
chip_gen: v7x
topology: tpu7x:2x2x1
jax: 0.10.0
libtpu: 0.0.40
codegen_flags: <defaults>
</compile_context>

<pallas_src>
import jax
import jax.numpy as jnp
from jax import lax
from jax.experimental import pallas as pl
from jax.experimental.pallas import tpu as pltpu


# ----------------------------------------------------------------------------
# Fused Inception kernel (one batch element per grid step)
# ----------------------------------------------------------------------------
def _inception_kernel(x_ref, wmid_ref, bmid_ref, wdir_ref, wpool_ref,
                      wtap_ref, bout_ref, o_ref, smid_ref, spool_ref):
    """All four Inception branches fused; output already channel-concatenated.

    x_ref:     (H, W, Cin)            one batch element, NHWC
    wmid_ref:  (Cin, c2a+c3a)         p2_1 | p3_1 1x1 weights, fused
    bmid_ref:  (1, c2a+c3a)
    wdir_ref:  (Cin, Ctot)            p1_1 weights zero-padded to cols [0,c1)
    wpool_ref: (Cin, Ctot)            p4_2 weights zero-padded to last c4 cols
    wtap_ref:  (5, 5, c2a+c3a, Ctot)  3x3 + 5x5 weights, zero-padded/combined
    bout_ref:  (1, Ctot)              output biases in concat order
    o_ref:     (H, W, Ctot)           lane-dense concatenated output
    smid_ref:  (H+4, W+4, c2a+c3a)    VMEM scratch, zero-padded intermediate
    spool_ref: (H+2, W+2, Cin)        VMEM scratch, -inf padded input (pool)
    """
    H, W, Cin = x_ref.shape
    Ctot = o_ref.shape[-1]
    Cmid = wmid_ref.shape[1]
    HW = H * W

    x = x_ref[...]                          # (H, W, Cin)
    x2 = x.reshape(HW, Cin)                 # channels on the lane axis

    # --- p2_1 and p3_1 (both 1x1 convs of x) fused into one MXU matmul ----
    ymid = jnp.dot(x2, wmid_ref[...], preferred_element_type=jnp.float32)
    ymid = jnp.maximum(ymid + bmid_ref[...], 0.0)          # (HW, Cmid)

    # Stage the relu'd intermediate into a zero-padded VMEM scratch.  Halo 2
    # serves both the 3x3 (branch 2) and 5x5 (branch 3) convs, whose taps
    # are merged into one 25-tap loop via zero-padded weight columns.
    smid_ref[...] = jnp.zeros(smid_ref.shape, smid_ref.dtype)
    smid_ref[2:H + 2, 2:W + 2, :] = ymid.reshape(H, W, Cmid)

    # --- accumulator for the concatenated output (bias folded into init) --
    # Branch 1 (p1_1): weights already zero-padded into output cols [0, c1).
    acc = jnp.dot(x2, wdir_ref[...],
                  preferred_element_type=jnp.float32) + bout_ref[...]

    # --- branch 4: 3x3/s1/p1 max pool (centre-tap init) + fused 1x1 conv --
    spool_ref[...] = jnp.full(spool_ref.shape, -jnp.inf, spool_ref.dtype)
    spool_ref[1:H + 1, 1:W + 1, :] = x
    m = x                                   # centre tap (kh = kw = 1)
    for kh in range(3):
        for kw in range(3):
            if kh == 1 and kw == 1:
                continue
            m = jnp.maximum(m, spool_ref[kh:kh + H, kw:kw + W, :])
    acc = acc + jnp.dot(m.reshape(HW, Cin), wpool_ref[...],
                        preferred_element_type=jnp.float32)

    # --- branches 2 + 3: one combined 25-tap conv over the staged ymid ----
    # wtap[kh, kw] carries the 3x3 weights in rows [:c2a] / its output cols
    # and the 5x5 weights in rows [c2a:] / its output cols; everything else
    # is zero, so a single accumulation is exact for both branches.
    # TODO(synk): at production sizes, cast patch/weight to bf16 here
    # (keep f32 accumulation) and tile H / Cout with extra grid axes.
    for kh in range(5):
        for kw in range(5):
            patch = smid_ref[kh:kh + H, kw:kw + W, :].reshape(HW, Cmid)
            acc = acc + jnp.dot(patch, wtap_ref[kh, kw],
                                preferred_element_type=jnp.float32)

    # Single lane-dense store of the already-concatenated NHWC tile.
    o_ref[...] = jnp.maximum(acc, 0.0).reshape(H, W, Ctot)


# ----------------------------------------------------------------------------
# Parameter fusion (tiny tensors; done under jit, would be offline in prod)
# ----------------------------------------------------------------------------
def _fuse_params(params):
    w_p1, b_p1 = params["p1_1"]      # (1, 1, Cin, c1)
    w_p21, b_p21 = params["p2_1"]    # (1, 1, Cin, c2a)
    w_p22, b_p22 = params["p2_2"]    # (3, 3, c2a, c2b)
    w_p31, b_p31 = params["p3_1"]    # (1, 1, Cin, c3a)
    w_p32, b_p32 = params["p3_2"]    # (5, 5, c3a, c3b)
    w_p4, b_p4 = params["p4_2"]      # (1, 1, Cin, c4)

    Cin = w_p1.shape[2]
    c1 = w_p1.shape[3]
    c2a, c2b = w_p22.shape[2], w_p22.shape[3]
    c3a, c3b = w_p32.shape[2], w_p32.shape[3]
    c4 = w_p4.shape[3]
    Cmid = c2a + c3a
    Ctot = c1 + c2b + c3b + c4

    # p2_1 | p3_1 fused 1x1.
    w_mid = jnp.concatenate(
        [w_p21.reshape(Cin, c2a), w_p31.reshape(Cin, c3a)], axis=1)
    b_mid = jnp.concatenate([b_p21, b_p31]).reshape(1, Cmid)

    # p1_1 zero-padded into output columns [0, c1).
    w_dir = jnp.zeros((Cin, Ctot), jnp.float32)
    w_dir = w_dir.at[:, :c1].set(w_p1.reshape(Cin, c1))

    # p4_2 (applied to the pooled input) zero-padded into the last c4 cols.
    w_pool = jnp.zeros((Cin, Ctot), jnp.float32)
    w_pool = w_pool.at[:, c1 + c2b + c3b:].set(w_p4.reshape(Cin, c4))

    # Combined tap weights: 3x3 conv embedded in the centre of a 5x5 grid.
    w_tap = jnp.zeros((5, 5, Cmid, Ctot), jnp.float32)
    w_tap = w_tap.at[1:4, 1:4, :c2a, c1:c1 + c2b].set(w_p22)
    w_tap = w_tap.at[:, :, c2a:, c1 + c2b:c1 + c2b + c3b].set(w_p32)

    # Output-channel biases in concat order [p1 | p2 | p3 | p4].
    b_out = jnp.concatenate([b_p1, b_p22, b_p32, b_p4]).reshape(1, Ctot)

    return w_mid, b_mid, w_dir, w_pool, w_tap, b_out


# ----------------------------------------------------------------------------
# Forward wrapper
# ----------------------------------------------------------------------------
@jax.jit
def inception_forward(params, x_nchw):
    """Inception block forward.  Input/output are NCHW like PyTorch."""
    x = jnp.transpose(x_nchw, (0, 2, 3, 1)).astype(jnp.float32)  # NCHW->NHWC
    N, H, W, Cin = x.shape

    w_mid, b_mid, w_dir, w_pool, w_tap, b_out = _fuse_params(params)
    Cmid = w_mid.shape[1]
    Ctot = w_dir.shape[1]

    out_nhwc = pl.pallas_call(
        _inception_kernel,
        out_shape=jax.ShapeDtypeStruct((N, H, W, Ctot), jnp.float32),
        grid=(N,),
        in_specs=[
            pl.BlockSpec((None, H, W, Cin), lambda n: (n, 0, 0, 0)),
            pl.BlockSpec((Cin, Cmid), lambda n: (0, 0)),
            pl.BlockSpec((1, Cmid), lambda n: (0, 0)),
            pl.BlockSpec((Cin, Ctot), lambda n: (0, 0)),
            pl.BlockSpec((Cin, Ctot), lambda n: (0, 0)),
            pl.BlockSpec((5, 5, Cmid, Ctot), lambda n: (0, 0, 0, 0)),
            pl.BlockSpec((1, Ctot), lambda n: (0, 0)),
        ],
        out_specs=pl.BlockSpec((None, H, W, Ctot), lambda n: (n, 0, 0, 0)),
        scratch_shapes=[
            pltpu.VMEM((H + 4, W + 4, Cmid), jnp.float32),  # padded ymid
            pltpu.VMEM((H + 2, W + 2, Cin), jnp.float32),   # -inf padded x
        ],
        compiler_params=pltpu.CompilerParams(
            dimension_semantics=("parallel",)),
    )(x, w_mid, b_mid, w_dir, w_pool, w_tap, b_out)

    return jnp.transpose(out_nhwc, (0, 3, 1, 2))            # NHWC -> NCHW


# ----------------------------------------------------------------------------
# Parameter init (HWIO weights, float32)
# ----------------------------------------------------------------------------
def init_inception_params(key, in_channels, c1, c2, c3, c4):
    ks = jax.random.split(key, 12)

    def conv_params(kw, kb, kh_, kw_, cin, cout):
        fan_in = cin * kh_ * kw_
        bound = 1.0 / jnp.sqrt(fan_in)
        w = jax.random.uniform(kw, (kh_, kw_, cin, cout), jnp.float32,
                               -bound, bound)
        b = jax.random.uniform(kb, (cout,), jnp.float32, -bound, bound)
        return w, b

    return {
        "p1_1": conv_params(ks[0], ks[1], 1, 1, in_channels, c1),
        "p2_1": conv_params(ks[2], ks[3], 1, 1, in_channels, c2[0]),
        "p2_2": conv_params(ks[4], ks[5], 3, 3, c2[0], c2[1]),
        "p3_1": conv_params(ks[6], ks[7], 1, 1, in_channels, c3[0]),
        "p3_2": conv_params(ks[8], ks[9], 5, 5, c3[0], c3[1]),
        "p4_2": conv_params(ks[10], ks[11], 1, 1, in_channels, c4),
    }


# ----------------------------------------------------------------------------
# Pure-JAX reference (for correctness check)
# ----------------------------------------------------------------------------
def _conv_relu_ref(x_nchw, w_hwio, b, padding):
    w_oihw = jnp.transpose(w_hwio, (3, 2, 0, 1))
    y = lax.conv_general_dilated(
        x_nchw, w_oihw, window_strides=(1, 1),
        padding=[(padding, padding), (padding, padding)],
        dimension_numbers=("NCHW", "OIHW", "NCHW"))
    return jax.nn.relu(y + b[None, :, None, None])


def inception_ref(params, x_nchw):
    p1 = _conv_relu_ref(x_nchw, *params["p1_1"], 0)
    p2 = _conv_relu_ref(x_nchw, *params["p2_1"], 0)
    p2 = _conv_relu_ref(p2, *params["p2_2"], 1)
    p3 = _conv_relu_ref(x_nchw, *params["p3_1"], 0)
    p3 = _conv_relu_ref(p3, *params["p3_2"], 2)
    p4 = lax.reduce_window(x_nchw, -jnp.inf, lax.max,
                           (1, 1, 3, 3), (1, 1, 1, 1),
                           [(0, 0), (0, 0), (1, 1), (1, 1)])
    p4 = _conv_relu_ref(p4, *params["p4_2"], 0)
    return jnp.concatenate([p1, p2, p3, p4], axis=1)


# ----------------------------------------------------------------------------
if __name__ == "__main__":
    key = jax.random.PRNGKey(0)
    k_param, k_x = jax.random.split(key)

    N, Cin, H, W = 2, 4, 16, 16
    c1, c2, c3, c4 = 8, (4, 8), (4, 8), 8

    params = init_inception_params(k_param, Cin, c1, c2, c3, c4)
    x = jax.random.normal(k_x, (N, Cin, H, W), jnp.float32)

    out = inception_forward(params, x)
    out = jax.block_until_ready(out)

    expected_channels = c1 + c2[1] + c3[1] + c4
    assert out.shape == (N, expected_channels, H, W), out.shape

    ref = jax.block_until_ready(inception_ref(params, x))
    assert jnp.allclose(out, ref, atol=1e-4, rtol=1e-4), (
        float(jnp.max(jnp.abs(out - ref))))

    print("KERNEL_OK")
</pallas_src>

<mosaic_0001>
module attributes {stable_mosaic.version = 11 : i64} {
  func.func @_inception_kernel(%arg0: i32, %arg1: memref<1x16x16x4xf32, #tpu.memory_space<vmem>>, %arg2: memref<4x8xf32, #tpu.memory_space<vmem>>, %arg3: memref<1x8xf32, #tpu.memory_space<vmem>>, %arg4: memref<4x32xf32, #tpu.memory_space<vmem>>, %arg5: memref<4x32xf32, #tpu.memory_space<vmem>>, %arg6: memref<5x5x8x32xf32, #tpu.memory_space<vmem>>, %arg7: memref<1x32xf32, #tpu.memory_space<vmem>>, %arg8: memref<1x16x16x32xf32, #tpu.memory_space<vmem>>, %arg9: memref<20x20x8xf32, #tpu.memory_space<vmem>>, %arg10: memref<18x18x4xf32, #tpu.memory_space<vmem>>) attributes {dimension_semantics = [#tpu.dimension_semantics<parallel>], iteration_bounds = array<i64: 2>, scalar_prefetch = 0 : i64, scratch_operands = 2 : i64, tpu.core_type = #tpu.core_type<tc>, window_params = [{transform_indices = @transform_0, window_bounds = array<i64: 1, 16, 16, 4>}, {pipeline_mode = #tpu.pipeline_mode<synchronous>, transform_indices = @transform_1, window_bounds = array<i64: 4, 8>}, {pipeline_mode = #tpu.pipeline_mode<synchronous>, transform_indices = @transform_2, window_bounds = array<i64: 1, 8>}, {pipeline_mode = #tpu.pipeline_mode<synchronous>, transform_indices = @transform_3, window_bounds = array<i64: 4, 32>}, {pipeline_mode = #tpu.pipeline_mode<synchronous>, transform_indices = @transform_4, window_bounds = array<i64: 4, 32>}, {pipeline_mode = #tpu.pipeline_mode<synchronous>, transform_indices = @transform_5, window_bounds = array<i64: 5, 5, 8, 32>}, {pipeline_mode = #tpu.pipeline_mode<synchronous>, transform_indices = @transform_6, window_bounds = array<i64: 1, 32>}, {transform_indices = @transform_7, window_bounds = array<i64: 1, 16, 16, 32>}]} {
    %c0 = arith.constant 0 : index
    %c0_0 = arith.constant 0 : index
    %c0_1 = arith.constant 0 : index
    %c0_2 = arith.constant 0 : index
    %0 = vector.load %arg1[%c0, %c0_0, %c0_1, %c0_2] : memref<1x16x16x4xf32, #tpu.memory_space<vmem>>, vector<1x16x16x4xf32>
    %1 = vector.shape_cast %0 : vector<1x16x16x4xf32> to vector<16x16x4xf32>
    %2 = vector.shape_cast %1 : vector<16x16x4xf32> to vector<256x4xf32>
    %c0_3 = arith.constant 0 : index
    %c0_4 = arith.constant 0 : index
    %3 = vector.load %arg2[%c0_3, %c0_4] : memref<4x8xf32, #tpu.memory_space<vmem>>, vector<4x8xf32>
    %cst = arith.constant dense<0.000000e+00> : vector<256x8xf32>
    %4 = tpu.matmul %2, %3, %cst {dimension_numbers = #tpu.dot_dimension_numbers<[1], [0], [0], [1], [0, 0, 1, 1], [], []>} : vector<256x4xf32>, vector<4x8xf32>, vector<256x8xf32> -> vector<256x8xf32>
    %c0_5 = arith.constant 0 : index
    %c0_6 = arith.constant 0 : index
    %5 = vector.load %arg3[%c0_5, %c0_6] : memref<1x8xf32, #tpu.memory_space<vmem>>, vector<1x8xf32>
    %6 = vector.broadcast %5 : vector<1x8xf32> to vector<256x8xf32>
    %7 = arith.addf %4, %6 : vector<256x8xf32>
    %cst_7 = arith.constant 0.000000e+00 : f32
    %8 = vector.broadcast %cst_7 : f32 to vector<256x8xf32>
    %9 = arith.maximumf %7, %8 : vector<256x8xf32>
    %cst_8 = arith.constant 0.000000e+00 : f32
    %10 = vector.broadcast %cst_8 : f32 to vector<20x20x8xf32>
    %c0_9 = arith.constant 0 : index
    %c0_10 = arith.constant 0 : index
    %c0_11 = arith.constant 0 : index
    %11 = vector.load %arg9[%c0_9, %c0_10, %c0_11] : memref<20x20x8xf32, #tpu.memory_space<vmem>>, vector<20x20x8xf32>
    tpu.vector_store %arg9[%c0_9, %c0_10, %c0_11], %10 {strides = array<i32>} : memref<20x20x8xf32, #tpu.memory_space<vmem>>, vector<20x20x8xf32>,
    %12 = vector.shape_cast %9 : vector<256x8xf32> to vector<16x16x8xf32>
    %c2 = arith.constant 2 : index
    %c2_12 = arith.constant 2 : index
    %c0_13 = arith.constant 0 : index
    %13 = vector.load %arg9[%c2, %c2_12, %c0_13] : memref<20x20x8xf32, #tpu.memory_space<vmem>>, vector<16x16x8xf32>
    tpu.vector_store %arg9[%c2, %c2_12, %c0_13], %12 {strides = array<i32>} : memref<20x20x8xf32, #tpu.memory_space<vmem>>, vector<16x16x8xf32>,
    %c0_14 = arith.constant 0 : index
    %c0_15 = arith.constant 0 : index
    %14 = vector.load %arg4[%c0_14, %c0_15] : memref<4x32xf32, #tpu.memory_space<vmem>>, vector<4x32xf32>
    %cst_16 = arith.constant dense<0.000000e+00> : vector<256x32xf32>
    %15 = tpu.matmul %2, %14, %cst_16 {dimension_numbers = #tpu.dot_dimension_numbers<[1], [0], [0], [1], [0, 0, 1, 1], [], []>} : vector<256x4xf32>, vector<4x32xf32>, vector<256x32xf32> -> vector<256x32xf32>
    %c0_17 = arith.constant 0 : index
    %c0_18 = arith.constant 0 : index
    %16 = vector.load %arg7[%c0_17, %c0_18] : memref<1x32xf32, #tpu.memory_space<vmem>>, vector<1x32xf32>
    %17 = vector.broadcast %16 : vector<1x32xf32> to vector<256x32xf32>
    %18 = arith.addf %15, %17 : vector<256x32xf32>
    %cst_19 = arith.constant 0xFF800000 : f32
    %19 = vector.broadcast %cst_19 : f32 to vector<18x18x4xf32>
    %c0_20 = arith.constant 0 : index
    %c0_21 = arith.constant 0 : index
    %c0_22 = arith.constant 0 : index
    %20 = vector.load %arg10[%c0_20, %c0_21, %c0_22] : memref<18x18x4xf32, #tpu.memory_space<vmem>>, vector<18x18x4xf32>
    tpu.vector_store %arg10[%c0_20, %c0_21, %c0_22], %19 {strides = array<i32>} : memref<18x18x4xf32, #tpu.memory_space<vmem>>, vector<18x18x4xf32>,
    %c1 = arith.constant 1 : index
    %c1_23 = arith.constant 1 : index
    %c0_24 = arith.constant 0 : index
    %21 = vector.load %arg10[%c1, %c1_23, %c0_24] : memref<18x18x4xf32, #tpu.memory_space<vmem>>, vector<16x16x4xf32>
    tpu.vector_store %arg10[%c1, %c1_23, %c0_24], %1 {strides = array<i32>} : memref<18x18x4xf32, #tpu.memory_space<vmem>>, vector<16x16x4xf32>,
    %c0_25 = arith.constant 0 : index
    %c0_26 = arith.constant 0 : index
    %c0_27 = arith.constant 0 : index
    %22 = vector.load %arg10[%c0_25, %c0_26, %c0_27] : memref<18x18x4xf32, #tpu.memory_space<vmem>>, vector<16x16x4xf32>
    %23 = arith.maximumf %1, %22 : vector<16x16x4xf32>
    %c0_28 = arith.constant 0 : index
    %c1_29 = arith.constant 1 : index
    %c0_30 = arith.constant 0 : index
    %24 = vector.load %arg10[%c0_28, %c1_29, %c0_30] : memref<18x18x4xf32, #tpu.memory_space<vmem>>, vector<16x16x4xf32>
    %25 = arith.maximumf %23, %24 : vector<16x16x4xf32>
    %c0_31 = arith.constant 0 : index
    %c2_32 = arith.constant 2 : index
    %c0_33 = arith.constant 0 : index
    %26 = vector.load %arg10[%c0_31, %c2_32, %c0_33] : memref<18x18x4xf32, #tpu.memory_space<vmem>>, vector<16x16x4xf32>
    %27 = arith.maximumf %25, %26 : vector<16x16x4xf32>
    %c1_34 = arith.constant 1 : index
    %c0_35 = arith.constant 0 : index
    %c0_36 = arith.constant 0 : index
    %28 = vector.load %arg10[%c1_34, %c0_35, %c0_36] : memref<18x18x4xf32, #tpu.memory_space<vmem>>, vector<16x16x4xf32>
    %29 = arith.maximumf %27, %28 : vector<16x16x4xf32>
    %c1_37 = arith.constant 1 : index
    %c2_38 = arith.constant 2 : index
    %c0_39 = arith.constant 0 : index
    %30 = vector.load %arg10[%c1_37, %c2_38, %c0_39] : memref<18x18x4xf32, #tpu.memory_space<vmem>>, vector<16x16x4xf32>
    %31 = arith.maximumf %29, %30 : vector<16x16x4xf32>
    %c2_40 = arith.constant 2 : index
    %c0_41 = arith.constant 0 : index
    %c0_42 = arith.constant 0 : index
    %32 = vector.load %arg10[%c2_40, %c0_41, %c0_42] : memref<18x18x4xf32, #tpu.memory_space<vmem>>, vector<16x16x4xf32>
    %33 = arith.maximumf %31, %32 : vector<16x16x4xf32>
    %c2_43 = arith.constant 2 : index
    %c1_44 = arith.constant 1 : index
    %c0_45 = arith.constant 0 : index
    %34 = vector.load %arg10[%c2_43, %c1_44, %c0_45] : memref<18x18x4xf32, #tpu.memory_space<vmem>>, vector<16x16x4xf32>
    %35 = arith.maximumf %33, %34 : vector<16x16x4xf32>
    %c2_46 = arith.constant 2 : index
    %c2_47 = arith.constant 2 : index
    %c0_48 = arith.constant 0 : index
    %36 = vector.load %arg10[%c2_46, %c2_47, %c0_48] : memref<18x18x4xf32, #tpu.memory_space<vmem>>, vector<16x16x4xf32>
    %37 = arith.maximumf %35, %36 : vector<16x16x4xf32>
    %38 = vector.shape_cast %37 : vector<16x16x4xf32> to vector<256x4xf32>
    %c0_49 = arith.constant 0 : index
    %c0_50 = arith.constant 0 : index
    %39 = vector.load %arg5[%c0_49, %c0_50] : memref<4x32xf32, #tpu.memory_space<vmem>>, vector<4x32xf32>
    %cst_51 = arith.constant dense<0.000000e+00> : vector<256x32xf32>
    %40 = tpu.matmul %38, %39, %cst_51 {dimension_numbers = #tpu.dot_dimension_numbers<[1], [0], [0], [1], [0, 0, 1, 1], [], []>} : vector<256x4xf32>, vector<4x32xf32>, vector<256x32xf32> -> vector<256x32xf32>
    %41 = arith.addf %18, %40 : vector<256x32xf32>
    %c0_52 = arith.constant 0 : index
    %c0_53 = arith.constant 0 : index
    %c0_54 = arith.constant 0 : index
    %42 = vector.load %arg9[%c0_52, %c0_53, %c0_54] : memref<20x20x8xf32, #tpu.memory_space<vmem>>, vector<16x16x8xf32>
    %43 = vector.shape_cast %42 : vector<16x16x8xf32> to vector<256x8xf32>
    %c0_55 = arith.constant 0 : index
    %c0_56 = arith.constant 0 : index
    %c0_57 = arith.constant 0 : index
    %c0_58 = arith.constant 0 : index
    %44 = vector.load %arg6[%c0_55, %c0_56, %c0_57, %c0_58] : memref<5x5x8x32xf32, #tpu.memory_space<vmem>>, vector<1x1x8x32xf32>
    %45 = vector.shape_cast %44 : vector<1x1x8x32xf32> to vector<8x32xf32>
    %cst_59 = arith.constant dense<0.000000e+00> : vector<256x32xf32>
    %46 = tpu.matmul %43, %45, %cst_59 {dimension_numbers = #tpu.dot_dimension_numbers<[1], [0], [0], [1], [0, 0, 1, 1], [], []>} : vector<256x8xf32>, vector<8x32xf32>, vector<256x32xf32> -> vector<256x32xf32>
    %47 = arith.addf %41, %46 : vector<256x32xf32>
    %c0_60 = arith.constant 0 : index
    %c1_61 = arith.constant 1 : index
    %c0_62 = arith.constant 0 : index
    %48 = vector.load %arg9[%c0_60, %c1_61, %c0_62] : memref<20x20x8xf32, #tpu.memory_space<vmem>>, vector<16x16x8xf32>
    %49 = vector.shape_cast %48 : vector<16x16x8xf32> to vector<256x8xf32>
    %c0_63 = arith.constant 0 : index
    %c1_64 = arith.constant 1 : index
    %c0_65 = arith.constant 0 : index
    %c0_66 = arith.constant 0 : index
    %50 = vector.load %arg6[%c0_63, %c1_64, %c0_65, %c0_66] : memref<5x5x8x32xf32, #tpu.memory_space<vmem>>, vector<1x1x8x32xf32>
    %51 = vector.shape_cast %50 : vector<1x1x8x32xf32> to vector<8x32xf32>
    %cst_67 = arith.constant dense<0.000000e+00> : vector<256x32xf32>
    %52 = tpu.matmul %49, %51, %cst_67 {dimension_numbers = #tpu.dot_dimension_numbers<[1], [0], [0], [1], [0, 0, 1, 1], [], []>} : vector<256x8xf32>, vector<8x32xf32>, vector<256x32xf32> -> vector<256x32xf32>
    %53 = arith.addf %47, %52 : vector<256x32xf32>
    %c0_68 = arith.constant 0 : index
    %c2_69 = arith.constant 2 : index
    %c0_70 = arith.constant 0 : index
    %54 = vector.load %arg9[%c0_68, %c2_69, %c0_70] : memref<20x20x8xf32, #tpu.memory_space<vmem>>, vector<16x16x8xf32>
    %55 = vector.shape_cast %54 : vector<16x16x8xf32> to vector<256x8xf32>
    %c0_71 = arith.constant 0 : index
    %c2_72 = arith.constant 2 : index
    %c0_73 = arith.constant 0 : index
    %c0_74 = arith.constant 0 : index
    %56 = vector.load %arg6[%c0_71, %c2_72, %c0_73, %c0_74] : memref<5x5x8x32xf32, #tpu.memory_space<vmem>>, vector<1x1x8x32xf32>
    %57 = vector.shape_cast %56 : vector<1x1x8x32xf32> to vector<8x32xf32>
    %cst_75 = arith.constant dense<0.000000e+00> : vector<256x32xf32>
    %58 = tpu.matmul %55, %57, %cst_75 {dimension_numbers = #tpu.dot_dimension_numbers<[1], [0], [0], [1], [0, 0, 1, 1], [], []>} : vector<256x8xf32>, vector<8x32xf32>, vector<256x32xf32> -> vector<256x32xf32>
    %59 = arith.addf %53, %58 : vector<256x32xf32>
    %c0_76 = arith.constant 0 : index
    %c3 = arith.constant 3 : index
    %c0_77 = arith.constant 0 : index
    %60 = vector.load %arg9[%c0_76, %c3, %c0_77] : memref<20x20x8xf32, #tpu.memory_space<vmem>>, vector<16x16x8xf32>
    %61 = vector.shape_cast %60 : vector<16x16x8xf32> to vector<256x8xf32>
    %c0_78 = arith.constant 0 : index
    %c3_79 = arith.constant 3 : index
    %c0_80 = arith.constant 0 : index
    %c0_81 = arith.constant 0 : index
    %62 = vector.load %arg6[%c0_78, %c3_79, %c0_80, %c0_81] : memref<5x5x8x32xf32, #tpu.memory_space<vmem>>, vector<1x1x8x32xf32>
    %63 = vector.shape_cast %62 : vector<1x1x8x32xf32> to vector<8x32xf32>
    %cst_82 = arith.constant dense<0.000000e+00> : vector<256x32xf32>
    %64 = tpu.matmul %61, %63, %cst_82 {dimension_numbers = #tpu.dot_dimension_numbers<[1], [0], [0], [1], [0, 0, 1, 1], [], []>} : vector<256x8xf32>, vector<8x32xf32>, vector<256x32xf32> -> vector<256x32xf32>
    %65 = arith.addf %59, %64 : vector<256x32xf32>
    %c0_83 = arith.constant 0 : index
    %c4 = arith.constant 4 : index
    %c0_84 = arith.constant 0 : index
    %66 = vector.load %arg9[%c0_83, %c4, %c0_84] : memref<20x20x8xf32, #tpu.memory_space<vmem>>, vector<16x16x8xf32>
    %67 = vector.shape_cast %66 : vector<16x16x8xf32> to vector<256x8xf32>
    %c0_85 = arith.constant 0 : index
    %c4_86 = arith.constant 4 : index
    %c0_87 = arith.constant 0 : index
    %c0_88 = arith.constant 0 : index
    %68 = vector.load %arg6[%c0_85, %c4_86, %c0_87, %c0_88] : memref<5x5x8x32xf32, #tpu.memory_space<vmem>>, vector<1x1x8x32xf32>
    %69 = vector.shape_cast %68 : vector<1x1x8x32xf32> to vector<8x32xf32>
    %cst_89 = arith.constant dense<0.000000e+00> : vector<256x32xf32>
    %70 = tpu.matmul %67, %69, %cst_89 {dimension_numbers = #tpu.dot_dimension_numbers<[1], [0], [0], [1], [0, 0, 1, 1], [], []>} : vector<256x8xf32>, vector<8x32xf32>, vector<256x32xf32> -> vector<256x32xf32>
    %71 = arith.addf %65, %70 : vector<256x32xf32>
    %c1_90 = arith.constant 1 : index
    %c0_91 = arith.constant 0 : index
    %c0_92 = arith.constant 0 : index
    %72 = vector.load %arg9[%c1_90, %c0_91, %c0_92] : memref<20x20x8xf32, #tpu.memory_space<vmem>>, vector<16x16x8xf32>
    %73 = vector.shape_cast %72 : vector<16x16x8xf32> to vector<256x8xf32>
    %c1_93 = arith.constant 1 : index
    %c0_94 = arith.constant 0 : index
    %c0_95 = arith.constant 0 : index
    %c0_96 = arith.constant 0 : index
    %74 = vector.load %arg6[%c1_93, %c0_94, %c0_95, %c0_96] : memref<5x5x8x32xf32, #tpu.memory_space<vmem>>, vector<1x1x8x32xf32>
    %75 = vector.shape_cast %74 : vector<1x1x8x32xf32> to vector<8x32xf32>
    %cst_97 = arith.constant dense<0.000000e+00> : vector<256x32xf32>
    %76 = tpu.matmul %73, %75, %cst_97 {dimension_numbers = #tpu.dot_dimension_numbers<[1], [0], [0], [1], [0, 0, 1, 1], [], []>} : vector<256x8xf32>, vector<8x32xf32>, vector<256x32xf32> -> vector<256x32xf32>
    %77 = arith.addf %71, %76 : vector<256x32xf32>
    %c1_98 = arith.constant 1 : index
    %c1_99 = arith.constant 1 : index
    %c0_100 = arith.constant 0 : index
    %78 = vector.load %arg9[%c1_98, %c1_99, %c0_100] : memref<20x20x8xf32, #tpu.memory_space<vmem>>, vector<16x16x8xf32>
    %79 = vector.shape_cast %78 : vector<16x16x8xf32> to vector<256x8xf32>
    %c1_101 = arith.constant 1 : index
    %c1_102 = arith.constant 1 : index
    %c0_103 = arith.constant 0 : index
    %c0_104 = arith.constant 0 : index
    %80 = vector.load %arg6[%c1_101, %c1_102, %c0_103, %c0_104] : memref<5x5x8x32xf32, #tpu.memory_space<vmem>>, vector<1x1x8x32xf32>
    %81 = vector.shape_cast %80 : vector<1x1x8x32xf32> to vector<8x32xf32>
    %cst_105 = arith.constant dense<0.000000e+00> : vector<256x32xf32>
    %82 = tpu.matmul %79, %81, %cst_105 {dimension_numbers = #tpu.dot_dimension_numbers<[1], [0], [0], [1], [0, 0, 1, 1], [], []>} : vector<256x8xf32>, vector<8x32xf32>, vector<256x32xf32> -> vector<256x32xf32>
    %83 = arith.addf %77, %82 : vector<256x32xf32>
    %c1_106 = arith.constant 1 : index
    %c2_107 = arith.constant 2 : index
    %c0_108 = arith.constant 0 : index
    %84 = vector.load %arg9[%c1_106, %c2_107, %c0_108] : memref<20x20x8xf32, #tpu.memory_space<vmem>>, vector<16x16x8xf32>
    %85 = vector.shape_cast %84 : vector<16x16x8xf32> to vector<256x8xf32>
    %c1_109 = arith.constant 1 : index
    %c2_110 = arith.constant 2 : index
    %c0_111 = arith.constant 0 : index
    %c0_112 = arith.constant 0 : index
    %86 = vector.load %arg6[%c1_109, %c2_110, %c0_111, %c0_112] : memref<5x5x8x32xf32, #tpu.memory_space<vmem>>, vector<1x1x8x32xf32>
    %87 = vector.shape_cast %86 : vector<1x1x8x32xf32> to vector<8x32xf32>
    %cst_113 = arith.constant dense<0.000000e+00> : vector<256x32xf32>
    %88 = tpu.matmul %85, %87, %cst_113 {dimension_numbers = #tpu.dot_dimension_numbers<[1], [0], [0], [1], [0, 0, 1, 1], [], []>} : vector<256x8xf32>, vector<8x32xf32>, vector<256x32xf32> -> vector<256x32xf32>
    %89 = arith.addf %83, %88 : vector<256x32xf32>
    %c1_114 = arith.constant 1 : index
    %c3_115 = arith.constant 3 : index
    %c0_116 = arith.constant 0 : index
    %90 = vector.load %arg9[%c1_114, %c3_115, %c0_116] : memref<20x20x8xf32, #tpu.memory_space<vmem>>, vector<16x16x8xf32>
    %91 = vector.shape_cast %90 : vector<16x16x8xf32> to vector<256x8xf32>
    %c1_117 = arith.constant 1 : index
    %c3_118 = arith.constant 3 : index
    %c0_119 = arith.constant 0 : index
    %c0_120 = arith.constant 0 : index
    %92 = vector.load %arg6[%c1_117, %c3_118, %c0_119, %c0_120] : memref<5x5x8x32xf32, #tpu.memory_space<vmem>>, vector<1x1x8x32xf32>
    %93 = vector.shape_cast %92 : vector<1x1x8x32xf32> to vector<8x32xf32>
    %cst_121 = arith.constant dense<0.000000e+00> : vector<256x32xf32>
    %94 = tpu.matmul %91, %93, %cst_121 {dimension_numbers = #tpu.dot_dimension_numbers<[1], [0], [0], [1], [0, 0, 1, 1], [], []>} : vector<256x8xf32>, vector<8x32xf32>, vector<256x32xf32> -> vector<256x32xf32>
    %95 = arith.addf %89, %94 : vector<256x32xf32>
    %c1_122 = arith.constant 1 : index
    %c4_123 = arith.constant 4 : index
    %c0_124 = arith.constant 0 : index
    %96 = vector.load %arg9[%c1_122, %c4_123, %c0_124] : memref<20x20x8xf32, #tpu.memory_space<vmem>>, vector<16x16x8xf32>
    %97 = vector.shape_cast %96 : vector<16x16x8xf32> to vector<256x8xf32>
    %c1_125 = arith.constant 1 : index
    %c4_126 = arith.constant 4 : index
    %c0_127 = arith.constant 0 : index
    %c0_128 = arith.constant 0 : index
    %98 = vector.load %arg6[%c1_125, %c4_126, %c0_127, %c0_128] : memref<5x5x8x32xf32, #tpu.memory_space<vmem>>, vector<1x1x8x32xf32>
    %99 = vector.shape_cast %98 : vector<1x1x8x32xf32> to vector<8x32xf32>
    %cst_129 = arith.constant dense<0.000000e+00> : vector<256x32xf32>
    %100 = tpu.matmul %97, %99, %cst_129 {dimension_numbers = #tpu.dot_dimension_numbers<[1], [0], [0], [1], [0, 0, 1, 1], [], []>} : vector<256x8xf32>, vector<8x32xf32>, vector<256x32xf32> -> vector<256x32xf32>
    %101 = arith.addf %95, %100 : vector<256x32xf32>
    %c2_130 = arith.constant 2 : index
    %c0_131 = arith.constant 0 : index
    %c0_132 = arith.constant 0 : index
    %102 = vector.load %arg9[%c2_130, %c0_131, %c0_132] : memref<20x20x8xf32, #tpu.memory_space<vmem>>, vector<16x16x8xf32>
    %103 = vector.shape_cast %102 : vector<16x16x8xf32> to vector<256x8xf32>
    %c2_133 = arith.constant 2 : index
    %c0_134 = arith.constant 0 : index
    %c0_135 = arith.constant 0 : index
    %c0_136 = arith.constant 0 : index
    %104 = vector.load %arg6[%c2_133, %c0_134, %c0_135, %c0_136] : memref<5x5x8x32xf32, #tpu.memory_space<vmem>>, vector<1x1x8x32xf32>
    %105 = vector.shape_cast %104 : vector<1x1x8x32xf32> to vector<8x32xf32>
    %cst_137 = arith.constant dense<0.000000e+00> : vector<256x32xf32>
    %106 = tpu.matmul %103, %105, %cst_137 {dimension_numbers = #tpu.dot_dimension_numbers<[1], [0], [0], [1], [0, 0, 1, 1], [], []>} : vector<256x8xf32>, vector<8x32xf32>, vector<256x32xf32> -> vector<256x32xf32>
    %107 = arith.addf %101, %106 : vector<256x32xf32>
    %c2_138 = arith.constant 2 : index
    %c1_139 = arith.constant 1 : index
    %c0_140 = arith.constant 0 : index
    %108 = vector.load %arg9[%c2_138, %c1_139, %c0_140] : memref<20x20x8xf32, #tpu.memory_space<vmem>>, vector<16x16x8xf32>
    %109 = vector.shape_cast %108 : vector<16x16x8xf32> to vector<256x8xf32>
    %c2_141 = arith.constant 2 : index
    %c1_142 = arith.constant 1 : index
    %c0_143 = arith.constant 0 : index
    %c0_144 = arith.constant 0 : index
    %110 = vector.load %arg6[%c2_141, %c1_142, %c0_143, %c0_144] : memref<5x5x8x32xf32, #tpu.memory_space<vmem>>, vector<1x1x8x32xf32>
    %111 = vector.shape_cast %110 : vector<1x1x8x32xf32> to vector<8x32xf32>
    %cst_145 = arith.constant dense<0.000000e+00> : vector<256x32xf32>
    %112 = tpu.matmul %109, %111, %cst_145 {dimension_numbers = #tpu.dot_dimension_numbers<[1], [0], [0], [1], [0, 0, 1, 1], [], []>} : vector<256x8xf32>, vector<8x32xf32>, vector<256x32xf32> -> vector<256x32xf32>
    %113 = arith.addf %107, %112 : vector<256x32xf32>
    %c2_146 = arith.constant 2 : index
    %c2_147 = arith.constant 2 : index
    %c0_148 = arith.constant 0 : index
    %114 = vector.load %arg9[%c2_146, %c2_147, %c0_148] : memref<20x20x8xf32, #tpu.memory_space<vmem>>, vector<16x16x8xf32>
    %115 = vector.shape_cast %114 : vector<16x16x8xf32> to vector<256x8xf32>
    %c2_149 = arith.constant 2 : index
    %c2_150 = arith.constant 2 : index
    %c0_151 = arith.constant 0 : index
    %c0_152 = arith.constant 0 : index
    %116 = vector.load %arg6[%c2_149, %c2_150, %c0_151, %c0_152] : memref<5x5x8x32xf32, #tpu.memory_space<vmem>>, vector<1x1x8x32xf32>
    %117 = vector.shape_cast %116 : vector<1x1x8x32xf32> to vector<8x32xf32>
    %cst_153 = arith.constant dense<0.000000e+00> : vector<256x32xf32>
    %118 = tpu.matmul %115, %117, %cst_153 {dimension_numbers = #tpu.dot_dimension_numbers<[1], [0], [0], [1], [0, 0, 1, 1], [], []>} : vector<256x8xf32>, vector<8x32xf32>, vector<256x32xf32> -> vector<256x32xf32>
    %119 = arith.addf %113, %118 : vector<256x32xf32>
    %c2_154 = arith.constant 2 : index
    %c3_155 = arith.constant 3 : index
    %c0_156 = arith.constant 0 : index
    %120 = vector.load %arg9[%c2_154, %c3_155, %c0_156] : memref<20x20x8xf32, #tpu.memory_space<vmem>>, vector<16x16x8xf32>
    %121 = vector.shape_cast %120 : vector<16x16x8xf32> to vector<256x8xf32>
    %c2_157 = arith.constant 2 : index
    %c3_158 = arith.constant 3 : index
    %c0_159 = arith.constant 0 : index
    %c0_160 = arith.constant 0 : index
    %122 = vector.load %arg6[%c2_157, %c3_158, %c0_159, %c0_160] : memref<5x5x8x32xf32, #tpu.memory_space<vmem>>, vector<1x1x8x32xf32>
    %123 = vector.shape_cast %122 : vector<1x1x8x32xf32> to vector<8x32xf32>
    %cst_161 = arith.constant dense<0.000000e+00> : vector<256x32xf32>
    %124 = tpu.matmul %121, %123, %cst_161 {dimension_numbers = #tpu.dot_dimension_numbers<[1], [0], [0], [1], [0, 0, 1, 1], [], []>} : vector<256x8xf32>, vector<8x32xf32>, vector<256x32xf32> -> vector<256x32xf32>
    %125 = arith.addf %119, %124 : vector<256x32xf32>
    %c2_162 = arith.constant 2 : index
    %c4_163 = arith.constant 4 : index
    %c0_164 = arith.constant 0 : index
    %126 = vector.load %arg9[%c2_162, %c4_163, %c0_164] : memref<20x20x8xf32, #tpu.memory_space<vmem>>, vector<16x16x8xf32>
    %127 = vector.shape_cast %126 : vector<16x16x8xf32> to vector<256x8xf32>
    %c2_165 = arith.constant 2 : index
    %c4_166 = arith.constant 4 : index
    %c0_167 = arith.constant 0 : index
    %c0_168 = arith.constant 0 : index
    %128 = vector.load %arg6[%c2_165, %c4_166, %c0_167, %c0_168] : memref<5x5x8x32xf32, #tpu.memory_space<vmem>>, vector<1x1x8x32xf32>
    %129 = vector.shape_cast %128 : vector<1x1x8x32xf32> to vector<8x32xf32>
    %cst_169 = arith.constant dense<0.000000e+00> : vector<256x32xf32>
    %130 = tpu.matmul %127, %129, %cst_169 {dimension_numbers = #tpu.dot_dimension_numbers<[1], [0], [0], [1], [0, 0, 1, 1], [], []>} : vector<256x8xf32>, vector<8x32xf32>, vector<256x32xf32> -> vector<256x32xf32>
    %131 = arith.addf %125, %130 : vector<256x32xf32>
    %c3_170 = arith.constant 3 : index
    %c0_171 = arith.constant 0 : index
    %c0_172 = arith.constant 0 : index
    %132 = vector.load %arg9[%c3_170, %c0_171, %c0_172] : memref<20x20x8xf32, #tpu.memory_space<vmem>>, vector<16x16x8xf32>
    %133 = vector.shape_cast %132 : vector<16x16x8xf32> to vector<256x8xf32>
    %c3_173 = arith.constant 3 : index
    %c0_174 = arith.constant 0 : index
    %c0_175 = arith.constant 0 : index
    %c0_176 = arith.constant 0 : index
    %134 = vector.load %arg6[%c3_173, %c0_174, %c0_175, %c0_176] : memref<5x5x8x32xf32, #tpu.memory_space<vmem>>, vector<1x1x8x32xf32>
    %135 = vector.shape_cast %134 : vector<1x1x8x32xf32> to vector<8x32xf32>
    %cst_177 = arith.constant dense<0.000000e+00> : vector<256x32xf32>
    %136 = tpu.matmul %133, %135, %cst_177 {dimension_numbers = #tpu.dot_dimension_numbers<[1], [0], [0], [1], [0, 0, 1, 1], [], []>} : vector<256x8xf32>, vector<8x32xf32>, vector<256x32xf32> -> vector<256x32xf32>
    %137 = arith.addf %131, %136 : vector<256x32xf32>
    %c3_178 = arith.constant 3 : index
    %c1_179 = arith.constant 1 : index
    %c0_180 = arith.constant 0 : index
    %138 = vector.load %arg9[%c3_178, %c1_179, %c0_180] : memref<20x20x8xf32, #tpu.memory_space<vmem>>, vector<16x16x8xf32>
    %139 = vector.shape_cast %138 : vector<16x16x8xf32> to vector<256x8xf32>
    %c3_181 = arith.constant 3 : index
    %c1_182 = arith.constant 1 : index
    %c0_183 = arith.constant 0 : index
    %c0_184 = arith.constant 0 : index
    %140 = vector.load %arg6[%c3_181, %c1_182, %c0_183, %c0_184] : memref<5x5x8x32xf32, #tpu.memory_space<vmem>>, vector<1x1x8x32xf32>
    %141 = vector.shape_cast %140 : vector<1x1x8x32xf32> to vector<8x32xf32>
    %cst_185 = arith.constant dense<0.000000e+00> : vector<256x32xf32>
    %142 = tpu.matmul %139, %141, %cst_185 {dimension_numbers = #tpu.dot_dimension_numbers<[1], [0], [0], [1], [0, 0, 1, 1], [], []>} : vector<256x8xf32>, vector<8x32xf32>, vector<256x32xf32> -> vector<256x32xf32>
    %143 = arith.addf %137, %142 : vector<256x32xf32>
    %c3_186 = arith.constant 3 : index
    %c2_187 = arith.constant 2 : index
    %c0_188 = arith.constant 0 : index
    %144 = vector.load %arg9[%c3_186, %c2_187, %c0_188] : memref<20x20x8xf32, #tpu.memory_space<vmem>>, vector<16x16x8xf32>
    %145 = vector.shape_cast %144 : vector<16x16x8xf32> to vector<256x8xf32>
    %c3_189 = arith.constant 3 : index
    %c2_190 = arith.constant 2 : index
    %c0_191 = arith.constant 0 : index
    %c0_192 = arith.constant 0 : index
    %146 = vector.load %arg6[%c3_189, %c2_190, %c0_191, %c0_192] : memref<5x5x8x32xf32, #tpu.memory_space<vmem>>, vector<1x1x8x32xf32>
    %147 = vector.shape_cast %146 : vector<1x1x8x32xf32> to vector<8x32xf32>
    %cst_193 = arith.constant dense<0.000000e+00> : vector<256x32xf32>
    %148 = tpu.matmul %145, %147, %cst_193 {dimension_numbers = #tpu.dot_dimension_numbers<[1], [0], [0], [1], [0, 0, 1, 1], [], []>} : vector<256x8xf32>, vector<8x32xf32>, vector<256x32xf32> -> vector<256x32xf32>
    %149 = arith.addf %143, %148 : vector<256x32xf32>
    %c3_194 = arith.constant 3 : index
    %c3_195 = arith.constant 3 : index
    %c0_196 = arith.constant 0 : index
    %150 = vector.load %arg9[%c3_194, %c3_195, %c0_196] : memref<20x20x8xf32, #tpu.memory_space<vmem>>, vector<16x16x8xf32>
    %151 = vector.shape_cast %150 : vector<16x16x8xf32> to vector<256x8xf32>
    %c3_197 = arith.constant 3 : index
    %c3_198 = arith.constant 3 : index
    %c0_199 = arith.constant 0 : index
    %c0_200 = arith.constant 0 : index
    %152 = vector.load %arg6[%c3_197, %c3_198, %c0_199, %c0_200] : memref<5x5x8x32xf32, #tpu.memory_space<vmem>>, vector<1x1x8x32xf32>
    %153 = vector.shape_cast %152 : vector<1x1x8x32xf32> to vector<8x32xf32>
    %cst_201 = arith.constant dense<0.000000e+00> : vector<256x32xf32>
    %154 = tpu.matmul %151, %153, %cst_201 {dimension_numbers = #tpu.dot_dimension_numbers<[1], [0], [0], [1], [0, 0, 1, 1], [], []>} : vector<256x8xf32>, vector<8x32xf32>, vector<256x32xf32> -> vector<256x32xf32>
    %155 = arith.addf %149, %154 : vector<256x32xf32>
    %c3_202 = arith.constant 3 : index
    %c4_203 = arith.constant 4 : index
    %c0_204 = arith.constant 0 : index
    %156 = vector.load %arg9[%c3_202, %c4_203, %c0_204] : memref<20x20x8xf32, #tpu.memory_space<vmem>>, vector<16x16x8xf32>
    %157 = vector.shape_cast %156 : vector<16x16x8xf32> to vector<256x8xf32>
    %c3_205 = arith.constant 3 : index
    %c4_206 = arith.constant 4 : index
    %c0_207 = arith.constant 0 : index
    %c0_208 = arith.constant 0 : index
    %158 = vector.load %arg6[%c3_205, %c4_206, %c0_207, %c0_208] : memref<5x5x8x32xf32, #tpu.memory_space<vmem>>, vector<1x1x8x32xf32>
    %159 = vector.shape_cast %158 : vector<1x1x8x32xf32> to vector<8x32xf32>
    %cst_209 = arith.constant dense<0.000000e+00> : vector<256x32xf32>
    %160 = tpu.matmul %157, %159, %cst_209 {dimension_numbers = #tpu.dot_dimension_numbers<[1], [0], [0], [1], [0, 0, 1, 1], [], []>} : vector<256x8xf32>, vector<8x32xf32>, vector<256x32xf32> -> vector<256x32xf32>
    %161 = arith.addf %155, %160 : vector<256x32xf32>
    %c4_210 = arith.constant 4 : index
    %c0_211 = arith.constant 0 : index
    %c0_212 = arith.constant 0 : index
    %162 = vector.load %arg9[%c4_210, %c0_211, %c0_212] : memref<20x20x8xf32, #tpu.memory_space<vmem>>, vector<16x16x8xf32>
    %163 = vector.shape_cast %162 : vector<16x16x8xf32> to vector<256x8xf32>
    %c4_213 = arith.constant 4 : index
    %c0_214 = arith.constant 0 : index
    %c0_215 = arith.constant 0 : index
    %c0_216 = arith.constant 0 : index
    %164 = vector.load %arg6[%c4_213, %c0_214, %c0_215, %c0_216] : memref<5x5x8x32xf32, #tpu.memory_space<vmem>>, vector<1x1x8x32xf32>
    %165 = vector.shape_cast %164 : vector<1x1x8x32xf32> to vector<8x32xf32>
    %cst_217 = arith.constant dense<0.000000e+00> : vector<256x32xf32>
    %166 = tpu.matmul %163, %165, %cst_217 {dimension_numbers = #tpu.dot_dimension_numbers<[1], [0], [0], [1], [0, 0, 1, 1], [], []>} : vector<256x8xf32>, vector<8x32xf32>, vector<256x32xf32> -> vector<256x32xf32>
    %167 = arith.addf %161, %166 : vector<256x32xf32>
    %c4_218 = arith.constant 4 : index
    %c1_219 = arith.constant 1 : index
    %c0_220 = arith.constant 0 : index
    %168 = vector.load %arg9[%c4_218, %c1_219, %c0_220] : memref<20x20x8xf32, #tpu.memory_space<vmem>>, vector<16x16x8xf32>
    %169 = vector.shape_cast %168 : vector<16x16x8xf32> to vector<256x8xf32>
    %c4_221 = arith.constant 4 : index
    %c1_222 = arith.constant 1 : index
    %c0_223 = arith.constant 0 : index
    %c0_224 = arith.constant 0 : index
    %170 = vector.load %arg6[%c4_221, %c1_222, %c0_223, %c0_224] : memref<5x5x8x32xf32, #tpu.memory_space<vmem>>, vector<1x1x8x32xf32>
    %171 = vector.shape_cast %170 : vector<1x1x8x32xf32> to vector<8x32xf32>
    %cst_225 = arith.constant dense<0.000000e+00> : vector<256x32xf32>
    %172 = tpu.matmul %169, %171, %cst_225 {dimension_numbers = #tpu.dot_dimension_numbers<[1], [0], [0], [1], [0, 0, 1, 1], [], []>} : vector<256x8xf32>, vector<8x32xf32>, vector<256x32xf32> -> vector<256x32xf32>
    %173 = arith.addf %167, %172 : vector<256x32xf32>
    %c4_226 = arith.constant 4 : index
    %c2_227 = arith.constant 2 : index
    %c0_228 = arith.constant 0 : index
    %174 = vector.load %arg9[%c4_226, %c2_227, %c0_228] : memref<20x20x8xf32, #tpu.memory_space<vmem>>, vector<16x16x8xf32>
    %175 = vector.shape_cast %174 : vector<16x16x8xf32> to vector<256x8xf32>
    %c4_229 = arith.constant 4 : index
    %c2_230 = arith.constant 2 : index
    %c0_231 = arith.constant 0 : index
    %c0_232 = arith.constant 0 : index
    %176 = vector.load %arg6[%c4_229, %c2_230, %c0_231, %c0_232] : memref<5x5x8x32xf32, #tpu.memory_space<vmem>>, vector<1x1x8x32xf32>
    %177 = vector.shape_cast %176 : vector<1x1x8x32xf32> to vector<8x32xf32>
    %cst_233 = arith.constant dense<0.000000e+00> : vector<256x32xf32>
    %178 = tpu.matmul %175, %177, %cst_233 {dimension_numbers = #tpu.dot_dimension_numbers<[1], [0], [0], [1], [0, 0, 1, 1], [], []>} : vector<256x8xf32>, vector<8x32xf32>, vector<256x32xf32> -> vector<256x32xf32>
    %179 = arith.addf %173, %178 : vector<256x32xf32>
    %c4_234 = arith.constant 4 : index
    %c3_235 = arith.constant 3 : index
    %c0_236 = arith.constant 0 : index
    %180 = vector.load %arg9[%c4_234, %c3_235, %c0_236] : memref<20x20x8xf32, #tpu.memory_space<vmem>>, vector<16x16x8xf32>
    %181 = vector.shape_cast %180 : vector<16x16x8xf32> to vector<256x8xf32>
    %c4_237 = arith.constant 4 : index
    %c3_238 = arith.constant 3 : index
    %c0_239 = arith.constant 0 : index
    %c0_240 = arith.constant 0 : index
    %182 = vector.load %arg6[%c4_237, %c3_238, %c0_239, %c0_240] : memref<5x5x8x32xf32, #tpu.memory_space<vmem>>, vector<1x1x8x32xf32>
    %183 = vector.shape_cast %182 : vector<1x1x8x32xf32> to vector<8x32xf32>
    %cst_241 = arith.constant dense<0.000000e+00> : vector<256x32xf32>
    %184 = tpu.matmul %181, %183, %cst_241 {dimension_numbers = #tpu.dot_dimension_numbers<[1], [0], [0], [1], [0, 0, 1, 1], [], []>} : vector<256x8xf32>, vector<8x32xf32>, vector<256x32xf32> -> vector<256x32xf32>
    %185 = arith.addf %179, %184 : vector<256x32xf32>
    %c4_242 = arith.constant 4 : index
    %c4_243 = arith.constant 4 : index
    %c0_244 = arith.constant 0 : index
    %186 = vector.load %arg9[%c4_242, %c4_243, %c0_244] : memref<20x20x8xf32, #tpu.memory_space<vmem>>, vector<16x16x8xf32>
    %187 = vector.shape_cast %186 : vector<16x16x8xf32> to vector<256x8xf32>
    %c4_245 = arith.constant 4 : index
    %c4_246 = arith.constant 4 : index
    %c0_247 = arith.constant 0 : index
    %c0_248 = arith.constant 0 : index
    %188 = vector.load %arg6[%c4_245, %c4_246, %c0_247, %c0_248] : memref<5x5x8x32xf32, #tpu.memory_space<vmem>>, vector<1x1x8x32xf32>
    %189 = vector.shape_cast %188 : vector<1x1x8x32xf32> to vector<8x32xf32>
    %cst_249 = arith.constant dense<0.000000e+00> : vector<256x32xf32>
    %190 = tpu.matmul %187, %189, %cst_249 {dimension_numbers = #tpu.dot_dimension_numbers<[1], [0], [0], [1], [0, 0, 1, 1], [], []>} : vector<256x8xf32>, vector<8x32xf32>, vector<256x32xf32> -> vector<256x32xf32>
    %191 = arith.addf %185, %190 : vector<256x32xf32>
    %cst_250 = arith.constant 0.000000e+00 : f32
    %192 = vector.broadcast %cst_250 : f32 to vector<256x32xf32>
    %193 = arith.maximumf %191, %192 : vector<256x32xf32>
    %194 = vector.shape_cast %193 : vector<256x32xf32> to vector<16x16x32xf32>
    %c0_251 = arith.constant 0 : index
    %c0_252 = arith.constant 0 : index
    %c0_253 = arith.constant 0 : index
    %c0_254 = arith.constant 0 : index
    %195 = vector.load %arg8[%c0_251, %c0_252, %c0_253, %c0_254] : memref<1x16x16x32xf32, #tpu.memory_space<vmem>>, vector<1x16x16x32xf32>
    %196 = vector.shape_cast %195 : vector<1x16x16x32xf32> to vector<16x16x32xf32>
    %197 = vector.shape_cast %194 : vector<16x16x32xf32> to vector<1x16x16x32xf32>
    tpu.vector_store %arg8[%c0_251, %c0_252, %c0_253, %c0_254], %197 {strides = array<i32>} : memref<1x16x16x32xf32, #tpu.memory_space<vmem>>, vector<1x16x16x32xf32>,
    return
  }
  func.func @transform_0(%arg0: i32) -> (i32, i32, i32, i32) {
    %c0_i32 = arith.constant 0 : i32
    %c0_i32_0 = arith.constant 0 : i32
    %c0_i32_1 = arith.constant 0 : i32
    %c0_i32_2 = arith.constant 0 : i32
    return %arg0, %c0_i32, %c0_i32_0, %c0_i32_1 : i32, i32, i32, i32
  }
  func.func @transform_1(%arg0: i32) -> (i32, i32) {
    %c0_i32 = arith.constant 0 : i32
    %c0_i32_0 = arith.constant 0 : i32
    %c0_i32_1 = arith.constant 0 : i32
    return %c0_i32, %c0_i32_0 : i32, i32
  }
  func.func @transform_2(%arg0: i32) -> (i32, i32) {
    %c0_i32 = arith.constant 0 : i32
    %c0_i32_0 = arith.constant 0 : i32
    %c0_i32_1 = arith.constant 0 : i32
    return %c0_i32, %c0_i32_0 : i32, i32
  }
  func.func @transform_3(%arg0: i32) -> (i32, i32) {
    %c0_i32 = arith.constant 0 : i32
    %c0_i32_0 = arith.constant 0 : i32
    %c0_i32_1 = arith.constant 0 : i32
    return %c0_i32, %c0_i32_0 : i32, i32
  }
  func.func @transform_4(%arg0: i32) -> (i32, i32) {
    %c0_i32 = arith.constant 0 : i32
    %c0_i32_0 = arith.constant 0 : i32
    %c0_i32_1 = arith.constant 0 : i32
    return %c0_i32, %c0_i32_0 : i32, i32
  }
  func.func @transform_5(%arg0: i32) -> (i32, i32, i32, i32) {
    %c0_i32 = arith.constant 0 : i32
    %c0_i32_0 = arith.constant 0 : i32
    %c0_i32_1 = arith.constant 0 : i32
    %c0_i32_2 = arith.constant 0 : i32
    %c0_i32_3 = arith.constant 0 : i32
    return %c0_i32, %c0_i32_0, %c0_i32_1, %c0_i32_2 : i32, i32, i32, i32
  }
  func.func @transform_6(%arg0: i32) -> (i32, i32) {
    %c0_i32 = arith.constant 0 : i32
    %c0_i32_0 = arith.constant 0 : i32
    %c0_i32_1 = arith.constant 0 : i32
    return %c0_i32, %c0_i32_0 : i32, i32
  }
  func.func @transform_7(%arg0: i32) -> (i32, i32, i32, i32) {
    %c0_i32 = arith.constant 0 : i32
    %c0_i32_0 = arith.constant 0 : i32
    %c0_i32_1 = arith.constant 0 : i32
    %c0_i32_2 = arith.constant 0 : i32
    return %arg0, %c0_i32, %c0_i32_0, %c0_i32_1 : i32, i32, i32, i32
  }
}

</mosaic_0001>

<bundles_post_ra>
// kernel: inception_forward.1
= control target key start
LH: loop header
LB: loop body
LE: loop exit
PB: predicated region body
PF: predicated region fallthrough
CT: control target
= control target key end

     0   :  { %12 = vsyncpa [#allocation5], 0  ;;  %s19531_s0 = inlined_call_operand.vmem [shape: f32[2,16,16,4], index: 0, kind: input, shape index: {}]   ;;  %s19532_s1 = inlined_call_operand.vmem [shape: f32[4,8], index: 1, kind: input, shape index: {}]   ;;  %s19533_s2 = inlined_call_operand.vmem [shape: f32[1,8], index: 2, kind: input, shape index: {}]   ;;  %s19534_s3 = inlined_call_operand.vmem [shape: f32[4,32], index: 3, kind: input, shape index: {}]   ;;  %s19535_s4 = inlined_call_operand.vmem [shape: f32[4,32], index: 4, kind: input, shape index: {}]   ;;  %s19536_s5 = inlined_call_operand.vmem [shape: f32[5,5,8,32], index: 5, kind: input, shape index: {}]   ;;  %s19537_s6 = inlined_call_operand.vmem [shape: f32[1,32], index: 6, kind: input, shape index: {}]   ;;  %s19538_s7 = inlined_call_operand.hbm [shape: f32[2,16,16,32], index: 7, kind: output, shape index: {}]  }
   0x1   :  { %14 = vsyncpa [#allocation5 + $0x1], 0  ;;  %s16061_s24 = smov 0   ;;  %s16063_s25 = smov 0  }
   0x2   :  { %s16065_s26 = smov 0   ;;  %s16067_s27 = smov 0  }
   0x3 LB: > { %s16082_s28 = sadd.s32 4294967295, %s16014_s27   ;;  %s11782_s29 = sadd.s32 4294967294, %s16014_s27   ;;  %s16014_s27 = sphi %s16067_s27, %s19577_s27   ;;  %s16010_s26 = sphi %s16065_s26, %s19576_s26   ;;  %s16006_s25 = sphi %s16063_s25, %s19575_s25   ;;  %s16002_s24 = sphi %s16061_s24, %s19574_s24  }
   0x4   : > { %s16086_s30 = sadd.s32 1, %s16014_s27   ;;  %s179_s8 = sadd.s32 1, %s16010_s26 }
   0x5   : > { %s176_s9 = ssub.s32 %s16014_s27, %s16086_s30  ;;  %p189_p0 = scmp.ne.s32.totalorder %s16010_s26, %s16006_s25 }
   0x6   : > { %p177_p1 = scmp.eq.s32.totalorder %s176_s9, 0  ;;  %p190_p2 = scmp.eq.s32.totalorder %s16082_s28, 1 }
   0x7   : > { %p195_p3 = scmp.ne.s32.totalorder %s16006_s25, %s16002_s24  ;;  %p196_p4 = scmp.eq.s32.totalorder %s11782_s29, 1 }
   0x8   : > { %s16097_s10 = scalar_select %p177_p1, %s16010_s26, %s179_s8  }
   0x9   : > { %p16099_p5 = por %p190_p2, %p189_p0  ;;  %p16103_p6 = por %p196_p4, %p195_p3 }
   0xa   : > { %p11785_p7 = scmp.ge.s32.totalorder %s16014_s27, 1  ;;  %p240_p8 = scmp.lt.s32.totalorder %s16014_s27, 3 }
   0xc   : > { %p241_p9 = pnand %p11785_p7, %p240_p8 }
   0xe   : > { %244 = sbr.rel (%p241_p9) target bundleno = 1380 (0x564), region = 48 }
  0x15   : > { %v309_v0 = vld [vmem:[%s19532_s1] sm:$0xf]  ;;  %vm414_vm0 = vcmask 1043456   ;;  %p272_p10 = scmp.lt.s32.totalorder %s16082_s28, 1  ;;  %vm317_vm1 = vcmask 31744   ;;  %v16016_v1 = vmov -inf  }
  0x16   : > { %13645 = vmatprep.subr.msk.mxu0 %vm414_vm0, %v309_v0  ;;  %1006 = vst.msk [vmem:[#allocation3] sm:$0xff] %vm317_vm1, %v16016_v1  ;;  %1007 = vst.msk [vmem:[#allocation3 + $0x8] sm:$0xff] %vm317_vm1, %v16016_v1  ;;  %vm1008_vm2 = vcmask 25600   ;;  %v770_v2 = vld [vmem:[%s19534_s3] sm:$0xf]  ;;  %vm675_vm3 = vcmask 64512  }
  0x17   : > { %1010 = vst.msk [vmem:[#allocation3 + $0x18] sm:$0xff] %vm317_vm1, %v16016_v1  ;;  %1011 = vst.msk [vmem:[#allocation3 + $0x20] sm:$0xff] %vm317_vm1, %v16016_v1  ;;  %13646 = vmatpush3.msk.msra.mxu0 %vm414_vm0, %v309_v0  ;;  %s273_s17 = scalar_select %p272_p10, %s16082_s28, 1  ;;  %v16184_v3 = vld [vmem:[%s19535_s4] sm:$0xf]  ;;  %v16017_v36 = vmov 0.0  }
  0x18   : > { %1013 = vst.msk [vmem:[#allocation3 + $0x30] sm:$0xff] %vm317_vm1, %v16016_v1  ;;  %1014 = vst.msk [vmem:[#allocation3 + $0x38] sm:$0xff] %vm317_vm1, %v16016_v1  ;;  %13695 = vmatprep.subr.msk.mxu0 %vm414_vm0, %v770_v2  ;;  %vm678_vm4 = vcmask 60416   ;;  %v16564_v37 = vld [vmem:[%s19536_s5] sm:$0xff]  ;;  %v12252_v43 = vld [vmem:[%s19536_s5 + $0x58] sm:$0xff]  ;;  %s269_s22 = sand.u32 1, %s16006_s25  }
  0x19   : > { %1016 = vst.msk [vmem:[#allocation3 + $0x48] sm:$0xff] %vm317_vm1, %v16016_v1  ;;  %1017 = vst.msk [vmem:[#allocation3 + $0x50] sm:$0xff] %vm317_vm1, %v16016_v1  ;;  %s12719_s18 = sshll.u32 %s273_s17, 8  ;;  %14345 = vmatprep.subr.mxu1 %v12252_v43  ;;  %v16601_v61 = vld [vmem:[%s19536_s5 + $0x60] sm:$0xff]  ;;  %s11786_s23 = sshll.u32 %s269_s22, 8  ;;  %vm11673_vm5 = vcmask 261120  }
  0x1a   : > { %1019 = vst.msk [vmem:[#allocation3 + $0x60] sm:$0xff] %vm317_vm1, %v16016_v1  ;;  %1020 = vst.msk [vmem:[#allocation3 + $0x68] sm:$0xff] %vm317_vm1, %v16016_v1  ;;  %s16179_s21 = scalar_lea.vmem %s19531_s0, %s12719_s18  ;;  %14346 = vmatpush3.msra.mxu1 %v12252_v43  ;;  %s19357_s29 = scalar_lea.vmem [#allocation4], %s11786_s23 }
  0x1b   : > { %1022 = vst.msk [vmem:[#allocation3 + $0x78] sm:$0xff] %vm317_vm1, %v16016_v1  ;;  %1023 = vst.msk [vmem:[#allocation3 + $0x80] sm:$0xff] %vm317_vm1, %v16016_v1  ;;  %v16187_v4 = vld [vmem:[%s16179_s21] sm:$0xff]  ;;  %v16190_v5 = vld [vmem:[%s16179_s21 + $0x8] sm:$0xff]  ;;  %14395 = vmatprep.subr.mxu1 %v16601_v61  ;;  %s12720_s8 = sshll.u32 %s16082_s28, 12  ;;  %s11720_s9 = sshll.u32 %s19357_s29, 4  ;;  %s19482_s9 = int_to_ptr.vmem [resolvable:$true] %s11720_s9 }
  0x1c   : > { %1025 = vst.msk [vmem:[#allocation3 + $0x90] sm:$0xff] %vm317_vm1, %v16016_v1  ;;  %1026 = vst.msk [vmem:[#allocation3 + $0x98] sm:$0xff] %vm317_vm1, %v16016_v1  ;;  %v16193_v6 = vld [vmem:[%s16179_s21 + $0x10] sm:$0xff]  ;;  %13647 = vmatprep.mubr.msk.f32.mxu0 %vm317_vm1, %v16187_v4  ;;  %v16204_v7 = vld [vmem:[%s16179_s21 + $0x18] sm:$0xff]  ;;  %s19480_s15 = scalar_lea.hbm %s19538_s7, %s12720_s8  ;;  %s19490_s28 = scalar_lea.sflag [#allocation5], %s269_s22 }
  0x1d   : > { %1028 = vst.msk [vmem:[#allocation3 + $0xa8] sm:$0xff] %vm317_vm1, %v16016_v1  ;;  %1029 = vst.msk [vmem:[#allocation3 + $0xb0] sm:$0xff] %vm317_vm1, %v16016_v1  ;;  %v16207_v8 = vld [vmem:[%s16179_s21 + $0x20] sm:$0xff]  ;;  %v16210_v9 = vld [vmem:[%s16179_s21 + $0x28] sm:$0xff]  ;;  %13648 = vmatmul.mubr.msk.f32.vlgmr.msra.gmra.mrb[0].mxu0 %vm317_vm1, %v16190_v5  ;;  %s15952_s16 = scalar_lea.vmem %s19482_s9, 4096  ;;  %s16018_s17 = smov [#allocation4]  }
  0x1e   : > { %1031 = vst.msk [vmem:[#allocation3 + $0xc0] sm:$0xff] %vm317_vm1, %v16016_v1  ;;  %1032 = vst.msk [vmem:[#allocation3 + $0xc8] sm:$0xff] %vm317_vm1, %v16016_v1  ;;  %13650 = vmatprep.mubr.msk.f32.mxu0 %vm317_vm1, %v16193_v6  ;;  %13696 = vmatpush3.msk.msra.mxu0 %vm414_vm0, %v770_v2  ;;  %v16224_v10 = vld [vmem:[%s16179_s21 + $0x30] sm:$0xff]  ;;  %v16227_v11 = vld [vmem:[%s16179_s21 + $0x38] sm:$0xff]  ;;  %p15953_p11 = scmp.ne.s32.totalorder %s19482_s9, %s15952_s16  ;;  %s15956_s18 = sshll.u32 %s16018_s17, 4  ;;  %s15957_s18 = int_to_ptr.vmem [resolvable:$false] %s15956_s18 }
  0x1f   : > { %1034 = vst.msk [vmem:[#allocation3 + $0xd8] sm:$0xff] %vm317_vm1, %v16016_v1  ;;  %1035 = vst.msk [vmem:[#allocation3 + $0xe0] sm:$0xff] %vm317_vm1, %v16016_v1  ;;  %v16230_v12 = vld [vmem:[%s16179_s21 + $0x40] sm:$0xff]  ;;  %13745 = vmatprep.subr.msk.mxu0 %vm414_vm0, %v16184_v3  ;;  %v16241_v13 = vld [vmem:[%s16179_s21 + $0x48] sm:$0xff]  ;;  %s15958_s19 = scalar_lea.vmem %s15957_s18, 8192  ;;  %p15959_p0 = scmp.lt.s32.totalorder %s19482_s9, %s15957_s18 }
  0x20   : > { %1037 = vst.msk [vmem:[#allocation3 + $0xf0] sm:$0xff] %vm317_vm1, %v16016_v1  ;;  %1038 = vst.msk [vmem:[#allocation3 + $0xf8] sm:$0xff] %vm317_vm1, %v16016_v1  ;;  %v16244_v14 = vld [vmem:[%s16179_s21 + $0x50] sm:$0xff]  ;;  %v16247_v15 = vld [vmem:[%s16179_s21 + $0x58] sm:$0xff]  ;;  %p15954_p12 = pnand %p15953_p11, %p16099_p5  ;;  %p15960_p1 = scmp.lt.s32.totalorder %s15958_s19, %s15952_s16 }
  0x21   : > { %1040 = vst.msk [vmem:[#allocation3 + $0x108] sm:$0xff] %vm317_vm1, %v16016_v1  ;;  %1041 = vst.msk [vmem:[#allocation3 + $0x110] sm:$0xff] %vm317_vm1, %v16016_v1  ;;  %13651 = vmatmul.mubr.msk.f32.gmra.mrb[2].mxu0 %vm317_vm1, %v16204_v7  ;;  %v16258_v16 = vld [vmem:[%s16179_s21 + $0x60] sm:$0xff]  ;;  %v16261_v17 = vld [vmem:[%s16179_s21 + $0x68] sm:$0xff] }
  0x22   : > { %1043 = vst.msk [vmem:[#allocation3 + $0x120] sm:$0xff] %vm317_vm1, %v16016_v1  ;;  %1044 = vst.msk [vmem:[#allocation3 + $0x128] sm:$0xff] %vm317_vm1, %v16016_v1  ;;  %v16264_v18 = vld [vmem:[%s16179_s21 + $0x70] sm:$0xff]  ;;  %13653 = vmatprep.mubr.msk.f32.mxu0 %vm317_vm1, %v16207_v8  ;;  %v16275_v19 = vld [vmem:[%s16179_s21 + $0x78] sm:$0xff]  ;;  %p15955_p13 = pneg %p15954_p12  ;;  %p15961_p2 = por %p15960_p1, %p15959_p0 }
  0x23   : > { %1046 = vst.msk [vmem:[#allocation3 + $0x138] sm:$0xff] %vm317_vm1, %v16016_v1  ;;  %1047 = vst.msk [vmem:[#allocation3 + $0x140] sm:$0xff] %vm317_vm1, %v16016_v1  ;;  %v16278_v20 = vld [vmem:[%s16179_s21 + $0x80] sm:$0xff]  ;;  %v16281_v21 = vld [vmem:[%s16179_s21 + $0x88] sm:$0xff] }
  0x24   : > { %1049 = vst.msk [vmem:[#allocation3 + $0x150] sm:$0xff] %vm317_vm1, %v16016_v1  ;;  %1050 = vst.msk [vmem:[#allocation3 + $0x158] sm:$0xff] %vm317_vm1, %v16016_v1  ;;  %v16306_v22 = vld [vmem:[%s16179_s21 + $0x90] sm:$0xff]  ;;  %v16311_v23 = vld [vmem:[%s16179_s21 + $0x98] sm:$0xff]  ;;  %p15962_p3 = pnand %p15961_p2, %p15955_p13 }
  0x25   : > { %1052 = vst.msk [vmem:[#allocation3 + $0x168] sm:$0xff] %vm317_vm1, %v16016_v1  ;;  %1053 = vst.msk [vmem:[#allocation3 + $0x170] sm:$0xff] %vm317_vm1, %v16016_v1  ;;  %13654 = vmatmul.mubr.msk.f32.gmra.mrb[4].mxu0 %vm317_vm1, %v16210_v9  ;;  %v16318_v24 = vld [vmem:[%s16179_s21 + $0xa0] sm:$0xff]  ;;  %v16325_v25 = vld [vmem:[%s16179_s21 + $0xa8] sm:$0xff] }
  0x26   : > { %1055 = vst.msk [vmem:[#allocation3 + $0x180] sm:$0xff] %vm317_vm1, %v16016_v1  ;;  %1056 = vst.msk [vmem:[#allocation3 + $0x188] sm:$0xff] %vm317_vm1, %v16016_v1  ;;  %13656 = vmatprep.mubr.msk.f32.mxu0 %vm317_vm1, %v16224_v10  ;;  %v16328_v26 = vld [vmem:[%s16179_s21 + $0xb0] sm:$0xff]  ;;  %v16331_v27 = vld [vmem:[%s16179_s21 + $0xb8] sm:$0xff] }
  0x27   : > { %1058 = vst.msk [vmem:[#allocation3 + $0x198] sm:$0xff] %vm317_vm1, %v16016_v1  ;;  %1059 = vst.msk [vmem:[#allocation3 + $0x1a0] sm:$0xff] %vm317_vm1, %v16016_v1  ;;  %v16340_v28 = vld [vmem:[%s16179_s21 + $0xc0] sm:$0xff]  ;;  %v16343_v29 = vld [vmem:[%s16179_s21 + $0xc8] sm:$0xff] }
  0x28   : > { %1009 = vst.msk [vmem:[#allocation3 + $0x10] sm:$0x3] %vm1008_vm2, %v16016_v1  ;;  %1012 = vst.msk [vmem:[#allocation3 + $0x28] sm:$0x3] %vm1008_vm2, %v16016_v1  ;;  %v16346_v30 = vld [vmem:[%s16179_s21 + $0xd0] sm:$0xff]  ;;  %v16355_v31 = vld [vmem:[%s16179_s21 + $0xd8] sm:$0xff] }
  0x29   : > { %1015 = vst.msk [vmem:[#allocation3 + $0x40] sm:$0x3] %vm1008_vm2, %v16016_v1  ;;  %1018 = vst.msk [vmem:[#allocation3 + $0x58] sm:$0x3] %vm1008_vm2, %v16016_v1  ;;  %13657 = vmatmul.mubr.msk.f32.gmra.mrb[6].mxu0 %vm317_vm1, %v16227_v11  ;;  %v16358_v32 = vld [vmem:[%s16179_s21 + $0xe0] sm:$0xff]  ;;  %v16361_v33 = vld [vmem:[%s16179_s21 + $0xe8] sm:$0xff] }
  0x2a   : > { %1021 = vst.msk [vmem:[#allocation3 + $0x70] sm:$0x3] %vm1008_vm2, %v16016_v1  ;;  %1024 = vst.msk [vmem:[#allocation3 + $0x88] sm:$0x3] %vm1008_vm2, %v16016_v1  ;;  %13659 = vmatprep.mubr.msk.f32.mxu0 %vm317_vm1, %v16230_v12  ;;  %v16372_v34 = vld [vmem:[%s16179_s21 + $0xf0] sm:$0xff]  ;;  %v16375_v35 = vld [vmem:[%s16179_s21 + $0xf8] sm:$0xff] }
  0x2b   : > { %1027 = vst.msk [vmem:[#allocation3 + $0xa0] sm:$0x3] %vm1008_vm2, %v16016_v1  ;;  %1030 = vst.msk [vmem:[#allocation3 + $0xb8] sm:$0x3] %vm1008_vm2, %v16016_v1  ;;  %v1094_v38 = vld [vmem:[#allocation3] sm:$0xff]  ;;  %v1095_v40 = vld [vmem:[#allocation3 + $0x8] sm:$0xff] }
  0x2c   : > { %1033 = vst.msk [vmem:[#allocation3 + $0xd0] sm:$0x3] %vm1008_vm2, %v16016_v1  ;;  %1036 = vst.msk [vmem:[#allocation3 + $0xe8] sm:$0x3] %vm1008_vm2, %v16016_v1  ;;  %v1126_v39 = vmax.f32 %v16187_v4, %v1094_v38  ;;  %v1158_v41 = vld [vmem:[#allocation3 + $0x1] sm:$0xff]  ;;  %v1127_v44 = vmax.f32 %v16190_v5, %v1095_v40 }
  0x2d   : > { %1039 = vst.msk [vmem:[#allocation3 + $0x100] sm:$0x3] %vm1008_vm2, %v16016_v1  ;;  %1042 = vst.msk [vmem:[#allocation3 + $0x118] sm:$0x3] %vm1008_vm2, %v16016_v1  ;;  %13660 = vmatmul.mubr.msk.f32.gmra.mrb[8].mxu0 %vm317_vm1, %v16241_v13  ;;  %v1222_v50 = vld [vmem:[#allocation3 + $0x2] sm:$0xff] }
  0x2e   : > { %1045 = vst.msk [vmem:[#allocation3 + $0x130] sm:$0x3] %vm1008_vm2, %v16016_v1  ;;  %1048 = vst.msk [vmem:[#allocation3 + $0x148] sm:$0x3] %vm1008_vm2, %v16016_v1  ;;  %13662 = vmatprep.mubr.msk.f32.mxu0 %vm317_vm1, %v16244_v14  ;;  %v1190_v45 = vmax.f32 %v1126_v39, %v1158_v41 }
  0x2f   : > { %1051 = vst.msk [vmem:[#allocation3 + $0x160] sm:$0x3] %vm1008_vm2, %v16016_v1  ;;  %1054 = vst.msk [vmem:[#allocation3 + $0x178] sm:$0x3] %vm1008_vm2, %v16016_v1  ;;  %v1159_v46 = vld [vmem:[#allocation3 + $0x9] sm:$0xff] }
  0x30   : > { %1057 = vst.msk [vmem:[#allocation3 + $0x190] sm:$0x3] %vm1008_vm2, %v16016_v1  ;;  %1060 = vst.msk [vmem:[#allocation3 + $0x1a8] sm:$0x3] %vm1008_vm2, %v16016_v1  ;;  %v1191_v52 = vmax.f32 %v1127_v44, %v1159_v46  ;;  %v1223_v53 = vld [vmem:[#allocation3 + $0xa] sm:$0xff]  ;;  %v1254_v57 = vmax.f32 %v1190_v45, %v1222_v50 }
  0x31   : > { %1062 = vst.msk [vmem:[#allocation3 + $0x19] sm:$0xff] %vm317_vm1, %v16187_v4  ;;  %1063 = vst.msk [vmem:[#allocation3 + $0x21] sm:$0xff] %vm317_vm1, %v16190_v5  ;;  %13663 = vmatmul.mubr.msk.f32.gmra.mrb[10].mxu0 %vm317_vm1, %v16247_v15 }
  0x32   : > { %1064 = vst.msk [vmem:[#allocation3 + $0x31] sm:$0xff] %vm317_vm1, %v16193_v6  ;;  %1065 = vst.msk [vmem:[#allocation3 + $0x39] sm:$0xff] %vm317_vm1, %v16204_v7  ;;  %13665 = vmatprep.mubr.msk.f32.mxu0 %vm317_vm1, %v16258_v16  ;;  %v1255_v1 = vmax.f32 %v1191_v52, %v1223_v53 }
  0x33   : > { %1066 = vst.msk [vmem:[#allocation3 + $0x49] sm:$0xff] %vm317_vm1, %v16207_v8  ;;  %1067 = vst.msk [vmem:[#allocation3 + $0x51] sm:$0xff] %vm317_vm1, %v16210_v9 }
  0x34   : > { %1068 = vst.msk [vmem:[#allocation3 + $0x61] sm:$0xff] %vm317_vm1, %v16224_v10  ;;  %1069 = vst.msk [vmem:[#allocation3 + $0x69] sm:$0xff] %vm317_vm1, %v16227_v11 }
  0x35   : > { %1070 = vst.msk [vmem:[#allocation3 + $0x79] sm:$0xff] %vm317_vm1, %v16230_v12  ;;  %1071 = vst.msk [vmem:[#allocation3 + $0x81] sm:$0xff] %vm317_vm1, %v16241_v13  ;;  %13666 = vmatmul.mubr.msk.f32.gmra.mrb[12].mxu0 %vm317_vm1, %v16261_v17 }
  0x36   : > { %1072 = vst.msk [vmem:[#allocation3 + $0x91] sm:$0xff] %vm317_vm1, %v16244_v14  ;;  %1073 = vst.msk [vmem:[#allocation3 + $0x99] sm:$0xff] %vm317_vm1, %v16247_v15  ;;  %13668 = vmatprep.mubr.msk.f32.mxu0 %vm317_vm1, %v16264_v18 }
  0x37   : > { %1074 = vst.msk [vmem:[#allocation3 + $0xa9] sm:$0xff] %vm317_vm1, %v16258_v16  ;;  %1075 = vst.msk [vmem:[#allocation3 + $0xb1] sm:$0xff] %vm317_vm1, %v16261_v17 }
  0x38   : > { %1076 = vst.msk [vmem:[#allocation3 + $0xc1] sm:$0xff] %vm317_vm1, %v16264_v18  ;;  %1077 = vst.msk [vmem:[#allocation3 + $0xc9] sm:$0xff] %vm317_vm1, %v16275_v19  ;;  %v1286_v42 = vld [vmem:[#allocation3 + $0x18] sm:$0xff]  ;;  %v1287_v47 = vld [vmem:[#allocation3 + $0x20] sm:$0xff] }
  0x39   : > { %1078 = vst.msk [vmem:[#allocation3 + $0xd9] sm:$0xff] %vm317_vm1, %v16278_v20  ;;  %1079 = vst.msk [vmem:[#allocation3 + $0xe1] sm:$0xff] %vm317_vm1, %v16281_v21  ;;  %13669 = vmatmul.mubr.msk.f32.gmra.mrb[14].mxu0 %vm317_vm1, %v16275_v19  ;;  %v1128_v48 = vmax.f32 %v16193_v6, %v1286_v42  ;;  %v16583_v49 = vld [vmem:[#allocation3 + $0x30] sm:$0xff]  ;;  %v1160_v51 = vld [vmem:[#allocation3 + $0x19] sm:$0xff]  ;;  %v1129_v54 = vmax.f32 %v16204_v7, %v1287_v47  ;;  %v1319_v43 = vmax.f32 %v1255_v1, %v1287_v47 }
  0x3a   : > { %1080 = vst.msk [vmem:[#allocation3 + $0xf1] sm:$0xff] %vm317_vm1, %v16306_v22  ;;  %1081 = vst.msk [vmem:[#allocation3 + $0xf9] sm:$0xff] %vm317_vm1, %v16311_v23  ;;  %13671 = vmatprep.mubr.msk.f32.mxu0 %vm317_vm1, %v16278_v20  ;;  %v16588_v55 = vld [vmem:[#allocation3 + $0x38] sm:$0xff]  ;;  %v1130_v56 = vmax.f32 %v16207_v8, %v16583_v49  ;;  %v1161_v59 = vld [vmem:[#allocation3 + $0x21] sm:$0xff] }
  0x3b   : > { %1082 = vst.msk [vmem:[#allocation3 + $0x109] sm:$0xff] %vm317_vm1, %v16318_v24  ;;  %19552 = vst [vmem:[#allocation7_spill] sm:$0xff] %v16331_v27  ;;  %v1192_v58 = vmax.f32 %v1128_v48, %v1160_v51  ;;  %v16594_v60 = vld [vmem:[#allocation3 + $0x31] sm:$0xff]  ;;  %v1224_v62 = vld [vmem:[#allocation3 + $0x1a] sm:$0xff]  ;;  %v1131_v0 = vmax.f32 %v16210_v9, %v16588_v55  ;;  %v1193_v2 = vmax.f32 %v1129_v54, %v1161_v59 }
  0x3c   : > { %1083 = vst.msk [vmem:[#allocation3 + $0x111] sm:$0xff] %vm317_vm1, %v16325_v25  ;;  %1084 = vst.msk [vmem:[#allocation3 + $0x121] sm:$0xff] %vm317_vm1, %v16328_v26  ;;  %v16603_v63 = vld [vmem:[#allocation3 + $0x48] sm:$0xff]  ;;  %v16631_v46 = vld [vmem:[#allocation3 + $0x3a] sm:$0xff] }
  0x3d   : > { %1085 = vst.msk [vmem:[#allocation3 + $0x129] sm:$0xff] %vm317_vm1, %v16331_v27  ;;  %19553 = vst [vmem:[#allocation8_spill] sm:$0xff] %v16340_v28  ;;  %13672 = vmatmul.mubr.msk.f32.gmra.mrb[16].mxu0 %vm317_vm1, %v16281_v21  ;;  %v1132_v38 = vmax.f32 %v16224_v10, %v16603_v63  ;;  %v16623_v39 = vld [vmem:[#allocation3 + $0x49] sm:$0xff]  ;;  %v16637_v50 = vld [vmem:[#allocation3 + $0x78] sm:$0xff] }
  0x3e   : > { %19554 = vst [vmem:[#allocation9_spill] sm:$0xff] %v16343_v29  ;;  %19555 = vst [vmem:[#allocation10_spill] sm:$0xff] %v16346_v30  ;;  %13674 = vmatprep.mubr.msk.f32.mxu0 %vm317_vm1, %v16306_v22  ;;  %v16643_v47 = vld [vmem:[#allocation3 + $0x61] sm:$0xff]  ;;  %v16647_v53 = vld [vmem:[#allocation3 + $0x4a] sm:$0xff]  ;;  %v1136_v59 = vmax.f32 %v16244_v14, %v16637_v50 }
  0x3f   : > { %1086 = vst.msk [vmem:[#allocation3 + $0x139] sm:$0xff] %vm317_vm1, %v16340_v28  ;;  %1087 = vst.msk [vmem:[#allocation3 + $0x141] sm:$0xff] %vm317_vm1, %v16343_v29  ;;  %v1196_v51 = vmax.f32 %v1132_v38, %v16623_v39  ;;  %v16651_v54 = vld [vmem:[#allocation3 + $0x80] sm:$0xff] }
  0x40   : > { %1088 = vst.msk [vmem:[#allocation3 + $0x151] sm:$0xff] %vm317_vm1, %v16346_v30  ;;  %19556 = vst [vmem:[#allocation11_spill] sm:$0xff] %v16355_v31  ;;  %v16671_v38 = vld [vmem:[#allocation3 + $0x62] sm:$0xff] }
  0x41   : > { %19557 = vst [vmem:[#allocation12_spill] sm:$0xff] %v16358_v32  ;;  %1089 = vst.msk [vmem:[#allocation3 + $0x159] sm:$0xff] %vm317_vm1, %v16355_v31  ;;  %13675 = vmatmul.mubr.msk.f32.gmra.mrb[18].mxu0 %vm317_vm1, %v16311_v23 }
  0x42   : > { %1090 = vst.msk [vmem:[#allocation3 + $0x169] sm:$0xff] %vm317_vm1, %v16358_v32  ;;  %1091 = vst.msk [vmem:[#allocation3 + $0x171] sm:$0xff] %vm317_vm1, %v16361_v33  ;;  %13677 = vmatprep.mubr.msk.f32.mxu0 %vm317_vm1, %v16318_v24 }
  0x43   : > { %19558 = vst [vmem:[#allocation13_spill] sm:$0xff] %v16375_v35  ;;  %1092 = vst.msk [vmem:[#allocation3 + $0x181] sm:$0xff] %vm317_vm1, %v16372_v34 }
  0x44   : > { %1093 = vst.msk [vmem:[#allocation3 + $0x189] sm:$0xff] %vm317_vm1, %v16375_v35  ;;  %19559 = vst [vmem:[#allocation14_spill] sm:$0xff] %v16601_v61  ;;  %v16689_v61 = vld [vmem:[#allocation3 + $0x98] sm:$0xff] }
  0x45   : > { %13678 = vmatmul.mubr.msk.f32.gmra.mrb[20].mxu0 %vm317_vm1, %v16325_v25  ;;  %684 = vst.msk [vmem:[#allocation2 + $0x38] sm:$0xff] %vm675_vm3, %v16017_v36  ;;  %676 = vst.msk [vmem:[#allocation2] sm:$0xff] %vm675_vm3, %v16017_v36 }
  0x46   : > { %13680 = vmatprep.mubr.msk.f32.mxu0 %vm317_vm1, %v16328_v26  ;;  %677 = vst.msk [vmem:[#allocation2 + $0x8] sm:$0xff] %vm675_vm3, %v16017_v36  ;;  %680 = vst.msk [vmem:[#allocation2 + $0x18] sm:$0xff] %vm675_vm3, %v16017_v36 }
  0x47   : > { %681 = vst.msk [vmem:[#allocation2 + $0x20] sm:$0xff] %vm675_vm3, %v16017_v36  ;;  %683 = vst.msk [vmem:[#allocation2 + $0x30] sm:$0xff] %vm675_vm3, %v16017_v36 }
  0x48   : > { %686 = vst.msk [vmem:[#allocation2 + $0x48] sm:$0xff] %vm675_vm3, %v16017_v36  ;;  %687 = vst.msk [vmem:[#allocation2 + $0x50] sm:$0xff] %vm675_vm3, %v16017_v36 }
  0x49   : > { %13681 = vmatmul.mubr.msk.f32.gmra.mrb[22].mxu0 %vm317_vm1, %v16331_v27  ;;  %689 = vst.msk [vmem:[#allocation2 + $0x60] sm:$0xff] %vm675_vm3, %v16017_v36  ;;  %690 = vst.msk [vmem:[#allocation2 + $0x68] sm:$0xff] %vm675_vm3, %v16017_v36 }
  0x4a   : > { %13683 = vmatprep.mubr.msk.f32.mxu0 %vm317_vm1, %v16340_v28  ;;  %692 = vst.msk [vmem:[#allocation2 + $0x78] sm:$0xff] %vm675_vm3, %v16017_v36  ;;  %693 = vst.msk [vmem:[#allocation2 + $0x80] sm:$0xff] %vm675_vm3, %v16017_v36 }
  0x4b   : > { %695 = vst.msk [vmem:[#allocation2 + $0x90] sm:$0xff] %vm675_vm3, %v16017_v36  ;;  %696 = vst.msk [vmem:[#allocation2 + $0x98] sm:$0xff] %vm675_vm3, %v16017_v36 }
  0x4c   : > { %698 = vst.msk [vmem:[#allocation2 + $0xa8] sm:$0xff] %vm675_vm3, %v16017_v36  ;;  %699 = vst.msk [vmem:[#allocation2 + $0xb0] sm:$0xff] %vm675_vm3, %v16017_v36 }
  0x4d   : > { %13684 = vmatmul.mubr.msk.f32.gmra.mrb[24].mxu0 %vm317_vm1, %v16343_v29  ;;  %701 = vst.msk [vmem:[#allocation2 + $0xc0] sm:$0xff] %vm675_vm3, %v16017_v36  ;;  %702 = vst.msk [vmem:[#allocation2 + $0xc8] sm:$0xff] %vm675_vm3, %v16017_v36 }
  0x4e   : > { %13686 = vmatprep.mubr.msk.f32.mxu0 %vm317_vm1, %v16346_v30  ;;  %704 = vst.msk [vmem:[#allocation2 + $0xd8] sm:$0xff] %vm675_vm3, %v16017_v36  ;;  %705 = vst.msk [vmem:[#allocation2 + $0xe0] sm:$0xff] %vm675_vm3, %v16017_v36 }
  0x4f   : > { %707 = vst.msk [vmem:[#allocation2 + $0xf0] sm:$0xff] %vm675_vm3, %v16017_v36  ;;  %708 = vst.msk [vmem:[#allocation2 + $0xf8] sm:$0xff] %vm675_vm3, %v16017_v36 }
  0x50   : > { %710 = vst.msk [vmem:[#allocation2 + $0x108] sm:$0xff] %vm675_vm3, %v16017_v36  ;;  %711 = vst.msk [vmem:[#allocation2 + $0x110] sm:$0xff] %vm675_vm3, %v16017_v36 }
  0x51   : > { %13687 = vmatmul.mubr.msk.f32.gmra.mrb[26].mxu0 %vm317_vm1, %v16355_v31  ;;  %713 = vst.msk [vmem:[#allocation2 + $0x120] sm:$0xff] %vm675_vm3, %v16017_v36  ;;  %714 = vst.msk [vmem:[#allocation2 + $0x128] sm:$0xff] %vm675_vm3, %v16017_v36 }
  0x52   : > { %13689 = vmatprep.mubr.msk.f32.mxu0 %vm317_vm1, %v16358_v32  ;;  %716 = vst.msk [vmem:[#allocation2 + $0x138] sm:$0xff] %vm675_vm3, %v16017_v36  ;;  %717 = vst.msk [vmem:[#allocation2 + $0x140] sm:$0xff] %vm675_vm3, %v16017_v36 }
  0x53   : > { %719 = vst.msk [vmem:[#allocation2 + $0x150] sm:$0xff] %vm675_vm3, %v16017_v36  ;;  %720 = vst.msk [vmem:[#allocation2 + $0x158] sm:$0xff] %vm675_vm3, %v16017_v36 }
  0x54   : > { %722 = vst.msk [vmem:[#allocation2 + $0x168] sm:$0xff] %vm675_vm3, %v16017_v36  ;;  %723 = vst.msk [vmem:[#allocation2 + $0x170] sm:$0xff] %vm675_vm3, %v16017_v36 }
  0x55   : > { %13690 = vmatmul.mubr.msk.f32.gmra.mrb[28].mxu0 %vm317_vm1, %v16361_v33  ;;  %725 = vst.msk [vmem:[#allocation2 + $0x180] sm:$0xff] %vm675_vm3, %v16017_v36  ;;  %726 = vst.msk [vmem:[#allocation2 + $0x188] sm:$0xff] %vm675_vm3, %v16017_v36 }
  0x56   : > { %13692 = vmatprep.mubr.msk.f32.mxu0 %vm317_vm1, %v16372_v34  ;;  %728 = vst.msk [vmem:[#allocation2 + $0x198] sm:$0xff] %vm675_vm3, %v16017_v36  ;;  %729 = vst.msk [vmem:[#allocation2 + $0x1a0] sm:$0xff] %vm675_vm3, %v16017_v36 }
  0x57   : > { %731 = vst.msk [vmem:[#allocation2 + $0x1b0] sm:$0xff] %vm675_vm3, %v16017_v36  ;;  %732 = vst.msk [vmem:[#allocation2 + $0x1b8] sm:$0xff] %vm675_vm3, %v16017_v36 }
  0x58   : > { %734 = vst.msk [vmem:[#allocation2 + $0x1c8] sm:$0xff] %vm675_vm3, %v16017_v36  ;;  %735 = vst.msk [vmem:[#allocation2 + $0x1d0] sm:$0xff] %vm675_vm3, %v16017_v36 }
  0x59   : > { %13693 = vmatmul.mubr.msk.f32.gmra.mrb[30].mxu0 %vm317_vm1, %v16375_v35  ;;  %685 = vst.msk [vmem:[#allocation2 + $0x40] sm:$0xf] %vm678_vm4, %v16017_v36  ;;  %679 = vst.msk [vmem:[#allocation2 + $0x10] sm:$0xf] %vm678_vm4, %v16017_v36 }
  0x5a   : > { %13697 = vmatprep.mubr.msk.f32.mxu0 %vm317_vm1, %v16187_v4  ;;  %682 = vst.msk [vmem:[#allocation2 + $0x28] sm:$0xf] %vm678_vm4, %v16017_v36  ;;  %688 = vst.msk [vmem:[#allocation2 + $0x58] sm:$0xf] %vm678_vm4, %v16017_v36  ;;  %v16609_v4 = vld [vmem:[#allocation3 + $0x39] sm:$0xff] }
  0x5b   : > { %691 = vst.msk [vmem:[#allocation2 + $0x70] sm:$0xf] %vm678_vm4, %v16017_v36  ;;  %694 = vst.msk [vmem:[#allocation2 + $0x88] sm:$0xf] %vm678_vm4, %v16017_v36  ;;  %v1195_v40 = vmax.f32 %v1131_v0, %v16609_v4  ;;  %v16659_v0 = vld [vmem:[#allocation3 + $0x90] sm:$0xff] }
  0x5c   : > { %697 = vst.msk [vmem:[#allocation2 + $0xa0] sm:$0xf] %vm678_vm4, %v16017_v36  ;;  %700 = vst.msk [vmem:[#allocation2 + $0xb8] sm:$0xf] %vm678_vm4, %v16017_v36 }
  0x5d   : > { %13698 = vmatmul.mubr.msk.f32.vlgmr.msra.gmra.mrb[32].mxu0 %vm317_vm1, %v16190_v5  ;;  %703 = vst.msk [vmem:[#allocation2 + $0xd0] sm:$0xf] %vm678_vm4, %v16017_v36  ;;  %706 = vst.msk [vmem:[#allocation2 + $0xe8] sm:$0xf] %vm678_vm4, %v16017_v36  ;;  %v16611_v5 = vld [vmem:[#allocation3 + $0x50] sm:$0xff] }
  0x5e   : > { %13700 = vmatprep.mubr.msk.f32.mxu0 %vm317_vm1, %v16193_v6  ;;  %13746 = vmatpush3.msk.msra.mxu0 %vm414_vm0, %v16184_v3  ;;  %709 = vst.msk [vmem:[#allocation2 + $0x100] sm:$0xf] %vm678_vm4, %v16017_v36  ;;  %712 = vst.msk [vmem:[#allocation2 + $0x118] sm:$0xf] %vm678_vm4, %v16017_v36  ;;  %v1194_v3 = vmax.f32 %v1130_v56, %v16594_v60  ;;  %v1318_v6 = vmax.f32 %v1254_v57, %v1286_v42  ;;  %v16628_v42 = vld [vmem:[#allocation3 + $0x68] sm:$0xff] }
  0x5f   : > { %715 = vst.msk [vmem:[#allocation2 + $0x130] sm:$0xf] %vm678_vm4, %v16017_v36  ;;  %718 = vst.msk [vmem:[#allocation2 + $0x148] sm:$0xf] %vm678_vm4, %v16017_v36  ;;  %13795 = vmatprep.subr.mxu0 %v16564_v37  ;;  %v1133_v41 = vmax.f32 %v16227_v11, %v16611_v5  ;;  %v1259_v56 = vmax.f32 %v1195_v40, %v16631_v46 }
  0x60   : > { %721 = vst.msk [vmem:[#allocation2 + $0x160] sm:$0xf] %vm678_vm4, %v16017_v36  ;;  %724 = vst.msk [vmem:[#allocation2 + $0x178] sm:$0xf] %vm678_vm4, %v16017_v36  ;;  %v1382_v52 = vmax.f32 %v1318_v6, %v1224_v62  ;;  %v16666_v6 = vld [vmem:[#allocation3 + $0x79] sm:$0xff] }
  0x61   : > { %13701 = vmatmul.mubr.msk.f32.gmra.mrb[34].mxu0 %vm317_vm1, %v16204_v7  ;;  %727 = vst.msk [vmem:[#allocation2 + $0x190] sm:$0xf] %vm678_vm4, %v16017_v36  ;;  %730 = vst.msk [vmem:[#allocation2 + $0x1a8] sm:$0xf] %vm678_vm4, %v16017_v36  ;;  %v1351_v7 = vld [vmem:[#allocation3 + $0x22] sm:$0xff] }
  0x62   : > { %13703 = vmatprep.mubr.msk.f32.mxu0 %vm317_vm1, %v16207_v8  ;;  %733 = vst.msk [vmem:[#allocation2 + $0x1c0] sm:$0xf] %vm678_vm4, %v16017_v36  ;;  %736 = vst.msk [vmem:[#allocation2 + $0x1d8] sm:$0xf] %vm678_vm4, %v16017_v36  ;;  %v1256_v8 = vmax.f32 %v1192_v58, %v1224_v62  ;;  %v16615_v36 = vld [vmem:[#allocation3 + $0x32] sm:$0xff]  ;;  %v1257_v44 = vmax.f32 %v1193_v2, %v1351_v7  ;;  %v16655_v58 = vld [vmem:[#allocation3 + $0x69] sm:$0xff]  ;;  %v1383_v1 = vmax.f32 %v1319_v43, %v1351_v7 }
  0x63   : > { %v1258_v45 = vmax.f32 %v1194_v3, %v16615_v36  ;;  %v16663_v3 = vld [vmem:[#allocation3 + $0x52] sm:$0xff]  ;;  %v1447_v7 = vmax.f32 %v1382_v52, %v16583_v49  ;;  %v16680_v43 = vld [vmem:[#allocation3 + $0x81] sm:$0xff] }
  0x64   : > { %v1321_v62 = vmax.f32 %v1257_v44, %v16588_v55  ;;  %v1138_v44 = vmax.f32 %v16258_v16, %v16659_v0  ;;  %v16694_v52 = vld [vmem:[#allocation3 + $0x7a] sm:$0xff] }
  0x65   : > { %13704 = vmatmul.mubr.msk.f32.gmra.mrb[36].mxu0 %vm317_vm1, %v16210_v9  ;;  %v16619_v9 = vld [vmem:[#allocation3 + $0x60] sm:$0xff]  ;;  %v1322_v2 = vmax.f32 %v1258_v45, %v16603_v63  ;;  %v1323_v45 = vmax.f32 %v1259_v56, %v16611_v5 }
  0x66   : > { %13706 = vmatprep.mubr.msk.f32.mxu0 %vm317_vm1, %v16224_v10  ;;  %v16633_v10 = vld [vmem:[#allocation3 + $0x51] sm:$0xff]  ;;  %v1134_v48 = vmax.f32 %v16230_v12, %v16619_v9  ;;  %v1385_v56 = vmax.f32 %v1321_v62, %v16631_v46 }
  0x67   : > { %v1197_v57 = vmax.f32 %v1133_v41, %v16633_v10 }
  0x69   : > { %13707 = vmatmul.mubr.msk.f32.gmra.mrb[38].mxu0 %vm317_vm1, %v16227_v11  ;;  %v1320_v11 = vmax.f32 %v1256_v8, %v16583_v49  ;;  %v1260_v8 = vmax.f32 %v1196_v51, %v16647_v53  ;;  %v16686_v51 = vld [vmem:[#allocation3 + $0x6a] sm:$0xff] }
  0x6a   : > { %13709 = vmatprep.mubr.msk.f32.mxu0 %vm317_vm1, %v16230_v12  ;;  %v1135_v12 = vmax.f32 %v16241_v13, %v16628_v42  ;;  %v16691_v49 = vld [vmem:[#allocation3 + $0x91] sm:$0xff] }
  0x6b   : > { %v1384_v40 = vmax.f32 %v1320_v11, %v16615_v36 }
  0x6c   : > { %v1199_v41 = vmax.f32 %v1135_v12, %v16655_v58  ;;  %v16696_v12 = vld [vmem:[#allocation3 + $0xa8] sm:$0xff] }
  0x6d   : > { %13710 = vmatmul.mubr.msk.f32.gmra.mrb[40].mxu0 %vm317_vm1, %v16241_v13  ;;  %v1198_v13 = vmax.f32 %v1134_v48, %v16643_v47  ;;  %v1261_v48 = vmax.f32 %v1197_v57, %v16663_v3  ;;  %v1386_v57 = vmax.f32 %v1322_v2, %v16647_v53 }
  0x6e   : > { %13712 = vmatprep.mubr.msk.f32.mxu0 %vm317_vm1, %v16244_v14  ;;  %v1137_v14 = vmax.f32 %v16247_v15, %v16651_v54 }
  0x6f   : > { %v1262_v11 = vmax.f32 %v1198_v13, %v16671_v38  ;;  %v1511_v13 = vmax.f32 %v1447_v7, %v16594_v60  ;;  %v1325_v62 = vmax.f32 %v1261_v48, %v16628_v42  ;;  %v16721_v60 = vld [vmem:[#allocation3 + $0xb0] sm:$0xff]  ;;  %v1387_v7 = vmax.f32 %v1323_v45, %v16663_v3 }
  0x70   : > { %v1450_v48 = vmax.f32 %v1385_v56, %v16611_v5  ;;  %v16761_v56 = vld [vmem:[#allocation3 + $0xd8] sm:$0xff] }
  0x71   : > { %13713 = vmatmul.mubr.msk.f32.gmra.mrb[42].mxu0 %vm317_vm1, %v16247_v15  ;;  %v1200_v15 = vmax.f32 %v1136_v59, %v16666_v6  ;;  %v1324_v59 = vmax.f32 %v1260_v8, %v16619_v9  ;;  %v16717_v8 = vld [vmem:[#allocation3 + $0x92] sm:$0xff] }
  0x72   : > { %13715 = vmatprep.mubr.msk.f32.mxu0 %vm317_vm1, %v16258_v16  ;;  %v1448_v16 = vmax.f32 %v1383_v1, %v16588_v55  ;;  %v1202_v55 = vmax.f32 %v1138_v44, %v16691_v49  ;;  %v1139_v1 = vmax.f32 %v16261_v17, %v16689_v61 }
  0x73   : > { %v1264_v2 = vmax.f32 %v1200_v15, %v16694_v52  ;;  %v1451_v15 = vmax.f32 %v1386_v57, %v16619_v9  ;;  %v1452_v57 = vmax.f32 %v1387_v7, %v16628_v42 }
  0x74   : > { %v1512_v44 = vmax.f32 %v1448_v16, %v16609_v4  ;;  %v1266_v4 = vmax.f32 %v1202_v55, %v16717_v8  ;;  %v16747_v16 = vld [vmem:[#allocation3 + $0x9a] sm:$0xff]  ;;  %v1514_v55 = vmax.f32 %v1450_v48, %v16633_v10  ;;  %v16783_v10 = vld [vmem:[#allocation3 + $0xb2] sm:$0xff] }
  0x75   : > { %13716 = vmatmul.mubr.msk.f32.gmra.mrb[44].mxu0 %vm317_vm1, %v16261_v17  ;;  %v16729_v17 = vld [vmem:[#allocation3 + $0xc0] sm:$0xff]  ;;  %v16752_v9 = vmax.f32 %v1264_v2, %v16659_v0  ;;  %v1389_v2 = vmax.f32 %v1325_v62, %v16686_v51 }
  0x76   : > { %13718 = vmatprep.mubr.msk.f32.mxu0 %vm317_vm1, %v16264_v18  ;;  %v16790_v62 = vmax.f32 %v1266_v4, %v16696_v12  ;;  %v16798_v48 = vld [vmem:[#allocation3 + $0xd9] sm:$0xff] }
  0x79   : > { %13719 = vmatmul.mubr.msk.f32.gmra.mrb[46].mxu0 %vm317_vm1, %v16275_v19 }
  0x7a   : > { %13721 = vmatprep.mubr.msk.f32.mxu0 %vm317_vm1, %v16278_v20 }
  0x7d   : > { %13722 = vmatmul.mubr.msk.f32.gmra.mrb[48].mxu0 %vm317_vm1, %v16281_v21 }
  0x7e   : > { %13724 = vmatprep.mubr.msk.f32.mxu0 %vm317_vm1, %v16306_v22 }
  0x81   : > { %13725 = vmatmul.mubr.msk.f32.gmra.mrb[50].mxu0 %vm317_vm1, %v16311_v23 }
  0x82   : > { %13727 = vmatprep.mubr.msk.f32.mxu0 %vm317_vm1, %v16318_v24 }
  0x85   : > { %13728 = vmatmul.mubr.msk.f32.gmra.mrb[52].mxu0 %vm317_vm1, %v16325_v25 }
  0x86   : > { %13730 = vmatprep.mubr.msk.f32.mxu0 %vm317_vm1, %v16328_v26 }
  0x89   : > { %13731 = vmatmul.mubr.msk.f32.gmra.mrb[54].mxu0 %vm317_vm1, %v16331_v27 }
  0x8a   : > { %13733 = vmatprep.mubr.msk.f32.mxu0 %vm317_vm1, %v16340_v28  ;;  %v1263_v28 = vmax.f32 %v1199_v41, %v16686_v51  ;;  %v16727_v41 = vld [vmem:[#allocation3 + $0xa9] sm:$0xff] }
  0x8c   : > { %v16743_v27 = vmax.f32 %v1263_v28, %v16651_v54  ;;  %v1142_v28 = vmax.f32 %v16278_v20, %v16729_v17 }
  0x8d   : > { %13734 = vmatmul.mubr.msk.f32.gmra.mrb[56].mxu0 %vm317_vm1, %v16343_v29  ;;  %v1449_v29 = vmax.f32 %v1384_v40, %v16603_v63  ;;  %v1140_v63 = vmax.f32 %v16264_v18, %v16696_v12  ;;  %v1326_v40 = vmax.f32 %v1262_v11, %v16637_v50  ;;  %v1575_v18 = vmax.f32 %v1511_v13, %v16615_v36  ;;  %v16766_v13 = vld [vmem:[#allocation3 + $0xc1] sm:$0xff] }
  0x8e   : > { %13736 = vmatprep.mubr.msk.f32.mxu0 %vm317_vm1, %v16346_v30  ;;  %v1201_v30 = vmax.f32 %v1137_v14, %v16680_v43  ;;  %v16719_v14 = vld [vmem:[#allocation3 + $0x99] sm:$0xff]  ;;  %v1388_v11 = vmax.f32 %v1324_v59, %v16671_v38  ;;  %v16764_v59 = vld [vmem:[#allocation3 + $0xaa] sm:$0xff] }
  0x8f   : > { %v1513_v45 = vmax.f32 %v1449_v29, %v16623_v39  ;;  %v1203_v5 = vmax.f32 %v1139_v1, %v16719_v14  ;;  %v1204_v36 = vmax.f32 %v1140_v63, %v16727_v41  ;;  %v16755_v29 = vld [vmem:[#allocation3 + $0xb1] sm:$0xff]  ;;  %v16757_v39 = vld [vmem:[#allocation3 + $0xc8] sm:$0xff]  ;;  %v1515_v1 = vmax.f32 %v1451_v15, %v16643_v47 }
  0x90   : > { %v1453_v63 = vmax.f32 %v1388_v11, %v16637_v50  ;;  %v1390_v7 = vmax.f32 %v1326_v40, %v16694_v52  ;;  %v1143_v47 = vmax.f32 %v16281_v21, %v16757_v39  ;;  %v1206_v50 = vmax.f32 %v1142_v28, %v16766_v13  ;;  %v16794_v40 = vld [vmem:[#allocation3 + $0xc9] sm:$0xff] }
  0x91   : > { %13737 = vmatmul.mubr.msk.f32.gmra.mrb[58].mxu0 %vm317_vm1, %v16355_v31  ;;  %v16710_v31 = vld [vmem:[#allocation3 + $0x82] sm:$0xff]  ;;  %v1577_v42 = vmax.f32 %v1513_v45, %v16647_v53  ;;  %v1268_v53 = vmax.f32 %v1204_v36, %v16764_v59  ;;  %v1516_v15 = vmax.f32 %v1452_v57, %v16655_v58  ;;  %v16803_v21 = vld [vmem:[#allocation3 + $0xf0] sm:$0xff]  ;;  %v1579_v45 = vmax.f32 %v1515_v1, %v16671_v38 }
  0x92   : > { %13739 = vmatprep.mubr.msk.f32.mxu0 %vm317_vm1, %v16358_v32  ;;  %v1265_v32 = vmax.f32 %v1201_v30, %v16710_v31  ;;  %v1141_v30 = vmax.f32 %v16275_v19, %v16721_v60  ;;  %v1576_v19 = vmax.f32 %v1512_v44, %v16631_v46  ;;  %v16796_v44 = vld [vmem:[#allocation3 + $0xe0] sm:$0xff]  ;;  %v1454_v11 = vmax.f32 %v1389_v2, %v16651_v54  ;;  %v16827_v28 = vld [vmem:[#allocation3 + $0xca] sm:$0xff] }
  0x93   : > { %v1391_v4 = vmax.f32 %v16743_v27, %v16710_v31  ;;  %v1455_v58 = vmax.f32 %v1390_v7, %v16659_v0  ;;  %v1207_v38 = vmax.f32 %v1143_v47, %v16794_v40  ;;  %v1145_v27 = vmax.f32 %v16311_v23, %v16796_v44  ;;  %v16839_v23 = vld [vmem:[#allocation3 + $0x108] sm:$0xff] }
  0x94   : > { %v16775_v20 = vmax.f32 %v1265_v32, %v16689_v61  ;;  %v1205_v46 = vmax.f32 %v1141_v30, %v16755_v29  ;;  %v1144_v32 = vmax.f32 %v16306_v22, %v16761_v56  ;;  %v1578_v22 = vmax.f32 %v1514_v55, %v16663_v3  ;;  %v16837_v55 = vld [vmem:[#allocation3 + $0xf1] sm:$0xff] }
  0x95   : > { %13740 = vmatmul.mubr.msk.f32.gmra.mrb[60].mxu0 %vm317_vm1, %v16361_v33  ;;  %v1392_v30 = vmax.f32 %v16752_v9, %v16717_v8  ;;  %v16829_v9 = vld [vmem:[#allocation3 + $0xda] sm:$0xff]  ;;  %v1146_v57 = vmax.f32 %v16318_v24, %v16803_v21  ;;  %v1518_v1 = vmax.f32 %v1454_v11, %v16680_v43  ;;  %v1456_v2 = vmax.f32 %v1391_v4, %v16689_v61 }
  0x96   : > { %13742 = vmatprep.mubr.msk.f32.mxu0 %vm317_vm1, %v16372_v34  ;;  %v1269_v3 = vmax.f32 %v1205_v46, %v16783_v10  ;;  %v1208_v54 = vmax.f32 %v1144_v32, %v16798_v48  ;;  %v1394_v46 = vmax.f32 %v16790_v62, %v16764_v59  ;;  %v1271_v43 = vmax.f32 %v1207_v38, %v16827_v28  ;;  %v16869_v62 = vld [vmem:[#allocation3 + $0x110] sm:$0xff] }
  0x97   : > { %v1457_v7 = vmax.f32 %v1392_v30, %v16696_v12  ;;  %v16865_v12 = vld [vmem:[#allocation3 + $0xf2] sm:$0xff]  ;;  %v1520_v11 = vmax.f32 %v1456_v2, %v16719_v14 }
  0x98   : > { %v1272_v61 = vmax.f32 %v1208_v54, %v16829_v9  ;;  %v16902_v54 = vld [vmem:[#allocation3 + $0x111] sm:$0xff] }
  0x99   : > { %13743 = vmatmul.mubr.msk.f32.gmra.mrb[62].mxu0 %vm317_vm1, %v16375_v35  ;;  %v1267_v35 = vmax.f32 %v1203_v5, %v16747_v16  ;;  %v1517_v5 = vmax.f32 %v1453_v63, %v16666_v6  ;;  %v16824_v6 = vmax.f32 %v1268_v53, %v16729_v17  ;;  %v1519_v63 = vmax.f32 %v1455_v58, %v16691_v49 }
  0x9a   : > { %13747 = vmatprep.mubr.msk.f32.mxu0 %vm317_vm1, %v1575_v18  ;;  %v16801_v18 = vld [vmem:[#allocation3 + $0xc2] sm:$0xff]  ;;  %v1210_v49 = vmax.f32 %v1146_v57, %v16837_v55  ;;  %v1148_v53 = vmax.f32 %v16328_v26, %v16839_v23  ;;  %v1459_v58 = vmax.f32 %v1394_v46, %v16729_v17  ;;  %v16910_v57 = vld [vmem:[#allocation3 + $0xfa] sm:$0xff]  ;;  %v1584_v2 = vmax.f32 %v1520_v11, %v16747_v16 }
  0x9b   : > { %v1331_v36 = vmax.f32 %v1267_v35, %v16721_v60  ;;  %v1270_v0 = vmax.f32 %v1206_v50, %v16801_v18  ;;  %v1580_v35 = vmax.f32 %v1516_v15, %v16686_v51  ;;  %v1581_v24 = vmax.f32 %v1517_v5, %v16694_v52  ;;  %v16862_v52 = vld [vmem:[#allocation3 + $0xe2] sm:$0xff]  ;;  %v16873_v50 = vld [vmem:[#allocation3 + $0xf9] sm:$0xff] }
  0x9c   : > { %v16854_v51 = vmax.f32 %v1269_v3, %v16757_v39  ;;  %v16875_v15 = vld [vmem:[#allocation3 + $0x109] sm:$0xff]  ;;  %v1583_v26 = vmax.f32 %v1519_v63, %v16717_v8  ;;  %v1521_v5 = vmax.f32 %v1457_v7, %v16727_v41  ;;  %v1396_v30 = vmax.f32 %v16824_v6, %v16801_v18  ;;  %v16948_v11 = vld [vmem:[#allocation3 + $0x139] sm:$0xff] }
  0x9d   : > { %13748 = vmatmul.mubr.msk.f32.vlgmr.msra.gmra.mrb[32].mxu0 %vm317_vm1, %v1576_v19  ;;  %v16835_v19 = vld [vmem:[#allocation3 + $0xf8] sm:$0xff]  ;;  %v16860_v47 = vmax.f32 %v1270_v0, %v16761_v56  ;;  %v16891_v3 = vmax.f32 %v1271_v43, %v16796_v44  ;;  %v1274_v8 = vmax.f32 %v1210_v49, %v16865_v12  ;;  %v1212_v17 = vmax.f32 %v1148_v53, %v16875_v15  ;;  %v19563_v49 = vld [vmem:[#allocation10_spill] sm:$0xff] }
  0x9e   : > { %13750 = vmatprep.mubr.msk.f32.mxu0 %vm317_vm1, %v1577_v42  ;;  %13796 = vmatpush3.msra.mxu0 %v16564_v37  ;;  %v16831_v37 = vld [vmem:[#allocation3 + $0xe1] sm:$0xff]  ;;  %v1393_v42 = vmax.f32 %v16775_v20, %v16747_v16  ;;  %v1147_v32 = vmax.f32 %v16325_v25, %v16835_v19  ;;  %v1395_v25 = vmax.f32 %v1331_v36, %v16783_v10  ;;  %v19561_v36 = vld [vmem:[#allocation8_spill] sm:$0xff]  ;;  %v16944_v53 = vld [vmem:[#allocation3 + $0x129] sm:$0xff] }
  0x9f   : > { %v1209_v20 = vmax.f32 %v1145_v27, %v16831_v37  ;;  %v16904_v27 = vld [vmem:[#allocation3 + $0x128] sm:$0xff]  ;;  %v16908_v0 = vld [vmem:[#allocation3 + $0x138] sm:$0xff]  ;;  %v1397_v63 = vmax.f32 %v16854_v51, %v16827_v28  ;;  %v1585_v7 = vmax.f32 %v1521_v5, %v16764_v59  ;;  %v1523_v46 = vmax.f32 %v1459_v58, %v16766_v13  ;;  %v19562_v51 = vld [vmem:[#allocation9_spill] sm:$0xff] }
  0xa0   : > { %v1458_v4 = vmax.f32 %v1393_v42, %v16721_v60  ;;  %v19560_v60 = vld [vmem:[#allocation7_spill] sm:$0xff]  ;;  %v1211_v41 = vmax.f32 %v1147_v32, %v16873_v50  ;;  %v1461_v43 = vmax.f32 %v1396_v30, %v16761_v56  ;;  %v1152_v59 = vmax.f32 %v19563_v49, %v16908_v0 }
  0xa1   : > { %13751 = vmatmul.mubr.msk.f32.gmra.mrb[34].mxu0 %vm317_vm1, %v1578_v22  ;;  %v16877_v22 = vld [vmem:[#allocation3 + $0x120] sm:$0xff]  ;;  %v1273_v14 = vmax.f32 %v1209_v20, %v16862_v52  ;;  %v1149_v38 = vmax.f32 %v19560_v60, %v16869_v62  ;;  %v1151_v20 = vmax.f32 %v19562_v51, %v16904_v27  ;;  %v16939_v13 = vmax.f32 %v1274_v8, %v16839_v23 }
  0xa2   : > { %13753 = vmatprep.mubr.msk.f32.mxu0 %vm317_vm1, %v1579_v45  ;;  %v1582_v45 = vmax.f32 %v1518_v1, %v16710_v31  ;;  %v16894_v31 = vmax.f32 %v1272_v61, %v16803_v21  ;;  %v1150_v6 = vmax.f32 %v19561_v36, %v16877_v22  ;;  %v16914_v1 = vld [vmem:[#allocation3 + $0x121] sm:$0xff]  ;;  %v1522_v42 = vmax.f32 %v1458_v4, %v16755_v29 }
  0xa3   : > { %v1398_v61 = vmax.f32 %v16860_v47, %v16829_v9  ;;  %v16929_v16 = vmax.f32 %v1273_v14, %v16835_v19  ;;  %v1213_v29 = vmax.f32 %v1149_v38, %v16902_v54  ;;  %v1275_v56 = vmax.f32 %v1211_v41, %v16910_v57  ;;  %v16950_v4 = vld [vmem:[#allocation3 + $0x122] sm:$0xff]  ;;  %v19564_v41 = vld [vmem:[#allocation11_spill] sm:$0xff]  ;;  %v16978_v36 = vld [vmem:[#allocation3 + $0x13a] sm:$0xff] }
  0xa4   : > { %v1214_v32 = vmax.f32 %v1150_v6, %v16914_v1  ;;  %v1462_v58 = vmax.f32 %v1397_v63, %v16796_v44  ;;  %v1399_v30 = vmax.f32 %v16891_v3, %v16862_v52  ;;  %v1587_v14 = vmax.f32 %v1523_v46, %v16801_v18  ;;  %v19565_v6 = vld [vmem:[#allocation12_spill] sm:$0xff]  ;;  %v16988_v63 = vld [vmem:[#allocation3 + $0x168] sm:$0xff] }
  0xa5   : > { %13754 = vmatmul.mubr.msk.f32.gmra.mrb[36].mxu0 %vm317_vm1, %v1580_v35  ;;  %v16912_v35 = vld [vmem:[#allocation3 + $0x10a] sm:$0xff]  ;;  %v1525_v60 = vmax.f32 %v1461_v43, %v16798_v48  ;;  %v1463_v38 = vmax.f32 %v1398_v61, %v16803_v21  ;;  %v1400_v8 = vmax.f32 %v16894_v31, %v16865_v12  ;;  %v1216_v44 = vmax.f32 %v1152_v59, %v16948_v11  ;;  %v16980_v31 = vld [vmem:[#allocation3 + $0x141] sm:$0xff] }
  0xa6   : > { %13756 = vmatprep.mubr.msk.f32.mxu0 %vm317_vm1, %v1581_v24  ;;  %v1460_v24 = vmax.f32 %v1395_v25, %v16757_v39  ;;  %v16932_v39 = vld [vmem:[#allocation3 + $0x112] sm:$0xff]  ;;  %v1276_v47 = vmax.f32 %v1212_v17, %v16912_v35  ;;  %v1339_v17 = vmax.f32 %v1275_v56, %v16869_v62  ;;  %v1278_v48 = vmax.f32 %v1214_v32, %v16950_v4  ;;  %v16976_v21 = vld [vmem:[#allocation3 + $0x12a] sm:$0xff] }
  0xa7   : > { %v16952_v25 = vld [vmem:[#allocation3 + $0x150] sm:$0xff]  ;;  %v1526_v46 = vmax.f32 %v1462_v58, %v16831_v37  ;;  %v1464_v43 = vmax.f32 %v1399_v30, %v16835_v19  ;;  %v1401_v61 = vmax.f32 %v16929_v16, %v16910_v57  ;;  %v1527_v51 = vmax.f32 %v1463_v38, %v16837_v55  ;;  %v17009_v16 = vld [vmem:[%s19536_s5 + $0x8] sm:$0xff]  ;;  %v17022_v32 = vld [vmem:[#allocation3 + $0x159] sm:$0xff] }
  0xa8   : > { %v1524_v5 = vmax.f32 %v1460_v24, %v16794_v40  ;;  %v1215_v40 = vmax.f32 %v1151_v20, %v16944_v53  ;;  %v16973_v18 = vmax.f32 %v1276_v47, %v16877_v22  ;;  %v16986_v24 = vld [vmem:[#allocation3 + $0x151] sm:$0xff]  ;;  %v1465_v20 = vmax.f32 %v1400_v8, %v16839_v23  ;;  %v17012_v55 = vld [vmem:[#allocation3 + $0x142] sm:$0xff]  ;;  %13845 = vmatprep.subr.mxu0 %v17009_v16 }
  0xa9   : > { %13757 = vmatmul.mubr.msk.f32.gmra.mrb[38].mxu0 %vm317_vm1, %v1582_v45  ;;  %v16946_v45 = vld [vmem:[#allocation3 + $0x140] sm:$0xff]  ;;  %v1402_v49 = vmax.f32 %v16939_v13, %v16912_v35  ;;  %v1280_v19 = vmax.f32 %v1216_v44, %v16978_v36  ;;  %v17015_v13 = vld [vmem:[#allocation3 + $0x152] sm:$0xff]  ;;  %v1156_v47 = vmax.f32 %v16372_v34, %v16988_v63  ;;  %v1590_v58 = vmax.f32 %v1526_v46, %v16862_v52 }
  0xaa   : > { %13759 = vmatprep.mubr.msk.f32.mxu0 %vm317_vm1, %v1583_v26  ;;  %v1586_v26 = vmax.f32 %v1522_v42, %v16783_v10  ;;  %v1277_v10 = vmax.f32 %v1213_v29, %v16932_v39  ;;  %v1153_v3 = vmax.f32 %v19564_v41, %v16946_v45  ;;  %v16984_v42 = vld [vmem:[#allocation3 + $0x158] sm:$0xff]  ;;  %v1589_v29 = vmax.f32 %v1525_v60, %v16829_v9 }
  0xab   : > { %v1279_v37 = vmax.f32 %v1215_v40, %v16976_v21  ;;  %v1342_v9 = vmax.f32 %v1278_v48, %v16908_v0  ;;  %v1155_v56 = vmax.f32 %v16361_v33, %v16984_v42  ;;  %v1528_v30 = vmax.f32 %v1464_v43, %v16873_v50  ;;  %v1251_v41 = vld [vmem:[#allocation3 + $0x15a] sm:$0xff] }
  0xac   : > { %v1217_v59 = vmax.f32 %v1153_v3, %v16980_v31  ;;  %v1403_v33 = vmax.f32 %v1339_v17, %v16932_v39  ;;  %v1591_v34 = vmax.f32 %v1527_v51, %v16865_v12  ;;  %v1529_v60 = vmax.f32 %v1465_v20, %v16875_v15  ;;  %v19566_v12 = vld [vmem:[#allocation13_spill] sm:$0xff]  ;;  %v17049_v3 = vld [vmem:[#allocation3 + $0x171] sm:$0xff] }
  0xad   : > { %13760 = vmatmul.mubr.msk.f32.gmra.mrb[40].mxu0 %vm317_vm1, %v1584_v2  ;;  %v1154_v2 = vmax.f32 %v19565_v6, %v16952_v25  ;;  %v1467_v38 = vmax.f32 %v1402_v49, %v16877_v22  ;;  %v1404_v8 = vmax.f32 %v16973_v18, %v16950_v4  ;;  %v1344_v52 = vmax.f32 %v1280_v19, %v16952_v25  ;;  %v17047_v22 = vld [vmem:[#allocation3 + $0x16a] sm:$0xff]  ;;  %v1316_v51 = vld [vmem:[#allocation3 + $0x180] sm:$0xff]  ;;  %v1253_v20 = vld [vmem:[#allocation3 + $0x172] sm:$0xff] }
  0xae   : > { %13762 = vmatprep.mubr.msk.f32.mxu0 %vm317_vm1, %v1585_v7  ;;  %v1588_v7 = vmax.f32 %v1524_v5, %v16827_v28  ;;  %v1341_v28 = vmax.f32 %v1277_v10, %v16904_v27  ;;  %v17026_v5 = vld [vmem:[#allocation3 + $0x169] sm:$0xff]  ;;  %v1343_v10 = vmax.f32 %v1279_v37, %v16946_v45  ;;  %v1281_v50 = vmax.f32 %v1217_v59, %v17012_v55 }
  0xaf   : > { %v1218_v23 = vmax.f32 %v1154_v2, %v16986_v24  ;;  %v1219_v40 = vmax.f32 %v1155_v56, %v17022_v32  ;;  %v1220_v44 = vmax.f32 %v1156_v47, %v17026_v5  ;;  %v1592_v17 = vmax.f32 %v1528_v30, %v16910_v57  ;;  %v1317_v56 = vld [vmem:[#allocation3 + $0x188] sm:$0xff] }
  0xb0   : > { %v1468_v48 = vmax.f32 %v1403_v33, %v16904_v27  ;;  %v1405_v6 = vmax.f32 %v1341_v28, %v16976_v21  ;;  %v1593_v2 = vmax.f32 %v1529_v60, %v16912_v35  ;;  %v1469_v46 = vmax.f32 %v1404_v8, %v16908_v0  ;;  %v1572_v60 = vld [vmem:[#allocation3 + $0x18a] sm:$0xff]  ;;  %v1507_v8 = vld [vmem:[#allocation3 + $0x181] sm:$0xff] }
  0xb1   : > { %13763 = vmatmul.mubr.msk.f32.gmra.mrb[42].mxu0 %vm317_vm1, %v1586_v26  ;;  %v17024_v26 = vld [vmem:[#allocation3 + $0x170] sm:$0xff]  ;;  %v1406_v43 = vmax.f32 %v1342_v9, %v16978_v36  ;;  %v1407_v49 = vmax.f32 %v1343_v10, %v17012_v55  ;;  %v1408_v59 = vmax.f32 %v1344_v52, %v17015_v13  ;;  %v1445_v10 = vld [vmem:[#allocation3 + $0x198] sm:$0xff] }
  0xb2   : > { %13765 = vmatprep.mubr.msk.f32.mxu0 %vm317_vm1, %v1587_v14  ;;  %v1466_v14 = vmax.f32 %v1401_v61, %v16869_v62  ;;  %v1282_v62 = vmax.f32 %v1218_v23, %v17015_v13  ;;  %v1157_v15 = vmax.f32 %v19566_v12, %v17024_v26  ;;  %v1345_v61 = vmax.f32 %v1281_v50, %v16984_v42 }
  0xb3   : > { %v1470_v0 = vmax.f32 %v1405_v6, %v16946_v45  ;;  %v1533_v37 = vmax.f32 %v1469_v46, %v16948_v11  ;;  %v1471_v19 = vmax.f32 %v1406_v43, %v16952_v25  ;;  %v1472_v47 = vmax.f32 %v1407_v49, %v16984_v42  ;;  %v1964_v43 = vld [vmem:[#allocation2] sm:$0xff] }
  0xb4   : > { %v1530_v18 = vmax.f32 %v1466_v14, %v16902_v54  ;;  %v1346_v57 = vmax.f32 %v1282_v62, %v16988_v63  ;;  %v1284_v54 = vmax.f32 %v1220_v44, %v17047_v22  ;;  %v1221_v27 = vmax.f32 %v1157_v15, %v17049_v3  ;;  %v1571_v14 = vld [vmem:[#allocation3 + $0x182] sm:$0xff]  ;;  %v1509_v44 = vld [vmem:[#allocation3 + $0x199] sm:$0xff] }
  0xb5   : > { %13766 = vmatmul.mubr.msk.f32.gmra.mrb[44].mxu0 %vm317_vm1, %v1588_v7  ;;  %v1531_v7 = vmax.f32 %v1467_v38, %v16914_v1  ;;  %v1532_v1 = vmax.f32 %v1468_v48, %v16944_v53  ;;  %v1534_v45 = vmax.f32 %v1470_v0, %v16980_v31  ;;  %v1597_v11 = vmax.f32 %v1533_v37, %v16978_v36  ;;  %v1573_v48 = vld [vmem:[#allocation3 + $0x19a] sm:$0xff] }
  0xb6   : > { %13768 = vmatprep.mubr.msk.f32.mxu0 %vm317_vm1, %v1589_v29  ;;  %v1283_v29 = vmax.f32 %v1219_v40, %v1251_v41  ;;  %v1594_v35 = vmax.f32 %v1530_v18, %v16932_v39  ;;  %v1348_v23 = vmax.f32 %v1284_v54, %v1316_v51  ;;  %v1285_v39 = vmax.f32 %v1221_v27, %v1253_v20  ;;  %v1510_v18 = vld [vmem:[#allocation3 + $0x1a1] sm:$0xff]  ;;  %v17111_v54 = vld [vmem:[%s19533_s2] ss:$0 sm:$0xff] }
  0xb7   : > { %v1595_v28 = vmax.f32 %v1531_v7, %v16950_v4  ;;  %v1596_v53 = vmax.f32 %v1532_v1, %v16976_v21  ;;  %v1409_v4 = vmax.f32 %v1345_v61, %v1251_v41  ;;  %v1535_v25 = vmax.f32 %v1471_v19, %v16986_v24  ;;  %v1574_v7 = vld [vmem:[#allocation3 + $0x1a2] sm:$0xff] }
  0xb8   : > { %v1347_v9 = vmax.f32 %v1283_v29, %v17024_v26  ;;  %v1410_v30 = vmax.f32 %v1346_v57, %v17047_v22  ;;  %v1349_v33 = vmax.f32 %v1285_v39, %v1317_v56  ;;  %v1598_v21 = vmax.f32 %v1534_v45, %v17012_v55  ;;  %v1965_v61 = vld [vmem:[#allocation2 + $0x8] sm:$0xff]  ;;  %v1966_v57 = vld [vmem:[#allocation2 + $0x18] sm:$0xff]  ;;  %v1967_v29 = vld [vmem:[#allocation2 + $0x20] sm:$0xff] }
  0xb9   : > { %13769 = vmatmul.mubr.msk.f32.gmra.mrb[46].mxu0 %vm317_vm1, %v1590_v58  ;;  %v1473_v58 = vmax.f32 %v1408_v59, %v16988_v63  ;;  %v1536_v31 = vmax.f32 %v1472_v47, %v17022_v32  ;;  %v1474_v42 = vmax.f32 %v1409_v4, %v17024_v26  ;;  %v1599_v36 = vmax.f32 %v1535_v25, %v17015_v13  ;;  %v1508_v13 = vld [vmem:[#allocation3 + $0x189] sm:$0xff] }
  0xba   : > { %13771 = vmatprep.mubr.msk.f32.mxu0 %vm317_vm1, %v1591_v34  ;;  %v1411_v34 = vmax.f32 %v1347_v9, %v1253_v20  ;;  %v1475_v63 = vmax.f32 %v1410_v30, %v1316_v51  ;;  %v1412_v38 = vmax.f32 %v1348_v23, %v1571_v14  ;;  %v1413_v50 = vmax.f32 %v1349_v33, %v1572_v60 }
  0xbb   : > { %v1537_v24 = vmax.f32 %v1473_v58, %v17026_v5  ;;  %v1600_v52 = vmax.f32 %v1536_v31, %v1251_v41  ;;  %v1538_v55 = vmax.f32 %v1474_v42, %v17049_v3  ;;  %v1446_v5 = vld [vmem:[#allocation3 + $0x1a0] sm:$0xff]  ;;  %v17143_v31 = vld [vmem:[%s19536_s5 + $0x68] sm:$0xff] }
  0xbc   : > { %v1476_v32 = vmax.f32 %v1411_v34, %v1317_v56  ;;  %v1539_v62 = vmax.f32 %v1475_v63, %v1507_v8  ;;  %v1477_v40 = vmax.f32 %v1412_v38, %v1445_v10 }
  0xbd   : > { %13772 = vmatmul.mubr.msk.f32.gmra.mrb[48].mxu0 %vm317_vm1, %v1592_v17  ;;  %v1601_v26 = vmax.f32 %v1537_v24, %v17047_v22  ;;  %v1602_v12 = vmax.f32 %v1538_v55, %v1253_v20  ;;  %v1478_v17 = vmax.f32 %v1413_v50, %v1446_v5 }
  0xbe   : > { %13774 = vmatprep.mubr.msk.f32.mxu0 %vm317_vm1, %v1593_v2  ;;  %v1540_v15 = vmax.f32 %v1476_v32, %v1508_v13  ;;  %v1603_v41 = vmax.f32 %v1539_v62, %v1571_v14  ;;  %v1541_v3 = vmax.f32 %v1477_v40, %v1509_v44 }
  0xbf   : > { %v1542_v22 = vmax.f32 %v1478_v17, %v1510_v18 }
  0xc0   : > { %v1604_v6 = vmax.f32 %v1540_v15, %v1572_v60  ;;  %v1605_v2 = vmax.f32 %v1541_v3, %v1573_v48 }
  0xc1   : > { %13775 = vmatmul.mubr.msk.f32.gmra.mrb[50].mxu0 %vm317_vm1, %v1594_v35  ;;  %v1606_v46 = vmax.f32 %v1542_v22, %v1574_v7 }
  0xc2   : > { %13777 = vmatprep.mubr.msk.f32.mxu0 %vm317_vm1, %v1595_v28 }
  0xc5   : > { %13778 = vmatmul.mubr.msk.f32.gmra.mrb[52].mxu0 %vm317_vm1, %v1596_v53 }
  0xc6   : > { %13780 = vmatprep.mubr.msk.f32.mxu0 %vm317_vm1, %v1597_v11 }
  0xc9   : > { %13781 = vmatmul.mubr.msk.f32.gmra.mrb[54].mxu0 %vm317_vm1, %v1598_v21 }
  0xca   : > { %13783 = vmatprep.mubr.msk.f32.mxu0 %vm317_vm1, %v1599_v36  ;;  %v19567_v36 = vld [vmem:[#allocation14_spill] sm:$0xff] }
  0xcd   : > { %13784 = vmatmul.mubr.msk.f32.gmra.mrb[56].mxu0 %vm317_vm1, %v1600_v52 }
  0xce   : > { %13786 = vmatprep.mubr.msk.f32.mxu0 %vm317_vm1, %v1601_v26 }
  0xd1   : > { %13787 = vmatmul.mubr.msk.f32.gmra.mrb[58].mxu0 %vm317_vm1, %v1602_v12 }
  0xd2   : > { %13789 = vmatprep.mubr.msk.f32.mxu0 %vm317_vm1, %v1603_v41 }
  0xd5   : > { %13790 = vmatmul.mubr.msk.f32.gmra.mrb[60].mxu0 %vm317_vm1, %v1604_v6 }
  0xd6   : > { %13792 = vmatprep.mubr.msk.f32.mxu0 %vm317_vm1, %v1605_v2 }
  0xd9   : > { %13793 = vmatmul.mubr.msk.f32.gmra.mrb[62].mxu0 %vm317_vm1, %v1606_v46 }
  0xda   : > { %13797 = vmatprep.mubr.msk.f32.mxu0 %vm675_vm3, %v1964_v43 }
  0xdd   : > { %13798 = vmatmul.mubr.msk.f32.vlgmr.msra.gmra.mrb[32].mxu0 %vm675_vm3, %v1965_v61 }
  0xde   : > { %13800 = vmatprep.mubr.msk.f32.mxu0 %vm675_vm3, %v1966_v57  ;;  %13846 = vmatpush3.msra.mxu0 %v17009_v16  ;;  %v17118_v16 = vld [vmem:[%s19536_s5 + $0x10] sm:$0xff] }
  0xdf   : > { %13895 = vmatprep.subr.mxu0 %v17118_v16 }
  0xe1   : > { %13801 = vmatmul.mubr.msk.f32.gmra.mrb[34].mxu0 %vm675_vm3, %v1967_v29 }
  0xf0   : > { %v13649_v27 = vpop.f32.mrb[0].mxu0 }
  0xf1   : > { %v490_v51 = vadd.f32 %v13649_v27, %v17111_v54  ;;  %v484_v20 = vpop.f32.mrb[1].mxu0 }
  0xf2   : > { %v485_v35 = vadd.f32 %v17111_v54, %v484_v20 }
  0xf3   : > { %v644_v1 = vmax.f32 %v490_v51, 0.0 }
  0xf4   : > { %v643_v0 = vmax.f32 %v485_v35, 0.0  ;;  %v13652_v49 = vpop.f32.mrb[2].mxu0 }
  0xf5   : > { %739 = vst.msk [vmem:[#allocation2 + $0x3a] sm:$0xff] %vm675_vm3, %v644_v1  ;;  %v500_v28 = vadd.f32 %v13652_v49, %v17111_v54  ;;  %v494_v37 = vpop.f32.mrb[3].mxu0 }
  0xf6   : > { %738 = vst.msk [vmem:[#allocation2 + $0x32] sm:$0xff] %vm675_vm3, %v643_v0  ;;  %v495_v19 = vadd.f32 %v17111_v54, %v494_v37 }
  0xf7   : > { %v646_v59 = vmax.f32 %v500_v28, 0.0 }
  0xf8   : > { %v645_v9 = vmax.f32 %v495_v19, 0.0  ;;  %v13655_v23 = vpop.f32.mrb[4].mxu0 }
  0xf9   : > { %741 = vst.msk [vmem:[#allocation2 + $0x52] sm:$0xff] %vm675_vm3, %v646_v59  ;;  %v510_v39 = vadd.f32 %v13655_v23, %v17111_v54  ;;  %v504_v56 = vpop.f32.mrb[5].mxu0 }
  0xfa   : > { %740 = vst.msk [vmem:[#allocation2 + $0x4a] sm:$0xff] %vm675_vm3, %v645_v9  ;;  %v505_v53 = vadd.f32 %v17111_v54, %v504_v56 }
  0xfb   : > { %v648_v45 = vmax.f32 %v510_v39, 0.0 }
  0xfc   : > { %v647_v47 = vmax.f32 %v505_v53, 0.0  ;;  %v13658_v4 = vpop.f32.mrb[6].mxu0 }
  0xfd   : > { %743 = vst.msk [vmem:[#allocation2 + $0x6a] sm:$0xff] %vm675_vm3, %v648_v45  ;;  %v520_v11 = vadd.f32 %v13658_v4, %v17111_v54  ;;  %v514_v25 = vpop.f32.mrb[7].mxu0  ;;  %v1968_v58 = vld [vmem:[#allocation2 + $0x30] sm:$0xff]  ;;  %v1969_v14 = vld [vmem:[#allocation2 + $0x38] sm:$0xff] }
  0xfe   : > { %v17131_v30 = vld [vmem:[#allocation2 + $0x31] sm:$0xff]  ;;  %742 = vst.msk [vmem:[#allocation2 + $0x62] sm:$0xff] %vm675_vm3, %v647_v47  ;;  %v515_v33 = vadd.f32 %v17111_v54, %v514_v25  ;;  %13803 = vmatprep.mubr.msk.f32.mxu0 %vm675_vm3, %v1968_v58  ;;  %v17138_v21 = vld [vmem:[#allocation2 + $0x39] sm:$0xff] }
  0xff   : > { %14347 = vmatprep.mubr.msk.f32.mxu1 %vm675_vm3, %v17131_v30  ;;  %v650_v42 = vmax.f32 %v520_v11, 0.0  ;;  %13804 = vmatmul.mubr.msk.f32.gmra.mrb[36].mxu0 %vm675_vm3, %v1969_v14 }
 0x100   : > { %14348 = vmatmul.mubr.msk.f32.vlgmr.msra.gmra.mrb[0].mxu1 %vm675_vm3, %v17138_v21  ;;  %v649_v34 = vmax.f32 %v515_v33, 0.0  ;;  %v13661_v24 = vpop.f32.mrb[8].mxu0 }
 0x101   : > { %14396 = vmatpush3.msra.mxu1 %v19567_v36  ;;  %745 = vst.msk [vmem:[#allocation2 + $0x82] sm:$0xff] %vm675_vm3, %v650_v42  ;;  %v530_v63 = vadd.f32 %v13661_v24, %v17111_v54  ;;  %v524_v60 = vpop.f32.mrb[9].mxu0  ;;  %v1970_v38 = vld [vmem:[#allocation2 + $0x48] sm:$0xff]  ;;  %v1971_v10 = vld [vmem:[#allocation2 + $0x50] sm:$0xff] }
 0x102   : > { %v17151_v8 = vld [vmem:[#allocation2 + $0x49] sm:$0xff]  ;;  %14445 = vmatprep.subr.mxu1 %v17143_v31  ;;  %744 = vst.msk [vmem:[#allocation2 + $0x7a] sm:$0xff] %vm675_vm3, %v649_v34  ;;  %v525_v52 = vadd.f32 %v17111_v54, %v524_v60  ;;  %13806 = vmatprep.mubr.msk.f32.mxu0 %vm675_vm3, %v1970_v38  ;;  %v17159_v55 = vld [vmem:[#allocation2 + $0x51] sm:$0xff] }
 0x103   : > { %14350 = vmatprep.mubr.msk.f32.mxu1 %vm675_vm3, %v17151_v8  ;;  %v652_v32 = vmax.f32 %v530_v63, 0.0  ;;  %13807 = vmatmul.mubr.msk.f32.gmra.mrb[38].mxu0 %vm675_vm3, %v1971_v10 }
 0x104   : > { %14351 = vmatmul.mubr.msk.f32.gmra.mrb[2].mxu1 %vm675_vm3, %v17159_v55  ;;  %v651_v50 = vmax.f32 %v525_v52, 0.0  ;;  %v13664_v26 = vpop.f32.mrb[10].mxu0 }
 0x105   : > { %747 = vst.msk [vmem:[#allocation2 + $0x9a] sm:$0xff] %vm675_vm3, %v652_v32  ;;  %v540_v62 = vadd.f32 %v13664_v26, %v17111_v54  ;;  %v534_v13 = vpop.f32.mrb[11].mxu0  ;;  %v1972_v40 = vld [vmem:[#allocation2 + $0x60] sm:$0xff]  ;;  %v1973_v44 = vld [vmem:[#allocation2 + $0x68] sm:$0xff] }
 0x106   : > { %v17166_v5 = vld [vmem:[#allocation2 + $0x61] sm:$0xff]  ;;  %746 = vst.msk [vmem:[#allocation2 + $0x92] sm:$0xff] %vm675_vm3, %v651_v50  ;;  %v535_v12 = vadd.f32 %v17111_v54, %v534_v13  ;;  %13809 = vmatprep.mubr.msk.f32.mxu0 %vm675_vm3, %v1972_v40  ;;  %v17173_v15 = vld [vmem:[#allocation2 + $0x69] sm:$0xff] }
 0x107   : > { %14353 = vmatprep.mubr.msk.f32.mxu1 %vm675_vm3, %v17166_v5  ;;  %v654_v17 = vmax.f32 %v540_v62, 0.0  ;;  %13810 = vmatmul.mubr.msk.f32.gmra.mrb[40].mxu0 %vm675_vm3, %v1973_v44 }
 0x108   : > { %14354 = vmatmul.mubr.msk.f32.gmra.mrb[4].mxu1 %vm675_vm3, %v17173_v15  ;;  %v653_v41 = vmax.f32 %v535_v12, 0.0  ;;  %v13667_v3 = vpop.f32.mrb[12].mxu0 }
 0x109   : > { %749 = vst.msk [vmem:[#allocation2 + $0xb2] sm:$0xff] %vm675_vm3, %v654_v17  ;;  %v550_v18 = vadd.f32 %v13667_v3, %v17111_v54  ;;  %v544_v48 = vpop.f32.mrb[13].mxu0  ;;  %v1974_v6 = vld [vmem:[#allocation2 + $0x78] sm:$0xff]  ;;  %v1975_v2 = vld [vmem:[#allocation2 + $0x80] sm:$0xff] }
 0x10a   : > { %v17180_v22 = vld [vmem:[#allocation2 + $0x79] sm:$0xff]  ;;  %748 = vst.msk [vmem:[#allocation2 + $0xaa] sm:$0xff] %vm675_vm3, %v653_v41  ;;  %v545_v7 = vadd.f32 %v17111_v54, %v544_v48  ;;  %13812 = vmatprep.mubr.msk.f32.mxu0 %vm675_vm3, %v1974_v6  ;;  %v17187_v46 = vld [vmem:[#allocation2 + $0x81] sm:$0xff] }
 0x10b   : > { %14356 = vmatprep.mubr.msk.f32.mxu1 %vm675_vm3, %v17180_v22  ;;  %v656_v43 = vmax.f32 %v550_v18, 0.0  ;;  %13813 = vmatmul.mubr.msk.f32.gmra.mrb[42].mxu0 %vm675_vm3, %v1975_v2 }
 0x10c   : > { %14357 = vmatmul.mubr.msk.f32.gmra.mrb[6].mxu1 %vm675_vm3, %v17187_v46  ;;  %v655_v61 = vmax.f32 %v545_v7, 0.0  ;;  %v13670_v57 = vpop.f32.mrb[14].mxu0 }
 0x10d   : > { %751 = vst.msk [vmem:[#allocation2 + $0xca] sm:$0xff] %vm675_vm3, %v656_v43  ;;  %v560_v29 = vadd.f32 %v13670_v57, %v17111_v54  ;;  %v554_v27 = vpop.f32.mrb[15].mxu0  ;;  %v1976_v51 = vld [vmem:[#allocation2 + $0x90] sm:$0xff]  ;;  %v1977_v35 = vld [vmem:[#allocation2 + $0x98] sm:$0xff] }
 0x10e   : > { %v17194_v20 = vld [vmem:[#allocation2 + $0x91] sm:$0xff]  ;;  %750 = vst.msk [vmem:[#allocation2 + $0xc2] sm:$0xff] %vm675_vm3, %v655_v61  ;;  %v555_v1 = vadd.f32 %v17111_v54, %v554_v27  ;;  %13815 = vmatprep.mubr.msk.f32.mxu0 %vm675_vm3, %v1976_v51  ;;  %v17201_v0 = vld [vmem:[#allocation2 + $0x99] sm:$0xff] }
 0x10f   : > { %14359 = vmatprep.mubr.msk.f32.mxu1 %vm675_vm3, %v17194_v20  ;;  %v658_v49 = vmax.f32 %v560_v29, 0.0  ;;  %13816 = vmatmul.mubr.msk.f32.gmra.mrb[44].mxu0 %vm675_vm3, %v1977_v35 }
 0x110   : > { %14360 = vmatmul.mubr.msk.f32.gmra.mrb[8].mxu1 %vm675_vm3, %v17201_v0  ;;  %v657_v28 = vmax.f32 %v555_v1, 0.0  ;;  %v13673_v37 = vpop.f32.mrb[16].mxu0 }
 0x111   : > { %753 = vst.msk [vmem:[#allocation2 + $0xe2] sm:$0xff] %vm675_vm3, %v658_v49  ;;  %v570_v19 = vadd.f32 %v13673_v37, %v17111_v54  ;;  %v564_v59 = vpop.f32.mrb[17].mxu0  ;;  %v1978_v9 = vld [vmem:[#allocation2 + $0xa8] sm:$0xff]  ;;  %v1979_v39 = vld [vmem:[#allocation2 + $0xb0] sm:$0xff] }
 0x112   : > { %v17208_v23 = vld [vmem:[#allocation2 + $0xa9] sm:$0xff]  ;;  %752 = vst.msk [vmem:[#allocation2 + $0xda] sm:$0xff] %vm675_vm3, %v657_v28  ;;  %v565_v56 = vadd.f32 %v17111_v54, %v564_v59  ;;  %13818 = vmatprep.mubr.msk.f32.mxu0 %vm675_vm3, %v1978_v9  ;;  %v17215_v53 = vld [vmem:[#allocation2 + $0xb1] sm:$0xff] }
 0x113   : > { %14362 = vmatprep.mubr.msk.f32.mxu1 %vm675_vm3, %v17208_v23  ;;  %v660_v45 = vmax.f32 %v570_v19, 0.0  ;;  %13819 = vmatmul.mubr.msk.f32.gmra.mrb[46].mxu0 %vm675_vm3, %v1979_v39 }
 0x114   : > { %14363 = vmatmul.mubr.msk.f32.gmra.mrb[10].mxu1 %vm675_vm3, %v17215_v53  ;;  %v659_v47 = vmax.f32 %v565_v56, 0.0  ;;  %v13676_v4 = vpop.f32.mrb[18].mxu0 }
 0x115   : > { %755 = vst.msk [vmem:[#allocation2 + $0xfa] sm:$0xff] %vm675_vm3, %v660_v45  ;;  %v580_v11 = vadd.f32 %v13676_v4, %v17111_v54  ;;  %v574_v25 = vpop.f32.mrb[19].mxu0  ;;  %v1980_v58 = vld [vmem:[#allocation2 + $0xc0] sm:$0xff]  ;;  %v1981_v33 = vld [vmem:[#allocation2 + $0xc8] sm:$0xff] }
 0x116   : > { %v17222_v14 = vld [vmem:[#allocation2 + $0xc1] sm:$0xff]  ;;  %754 = vst.msk [vmem:[#allocation2 + $0xf2] sm:$0xff] %vm675_vm3, %v659_v47  ;;  %v575_v42 = vadd.f32 %v17111_v54, %v574_v25  ;;  %13821 = vmatprep.mubr.msk.f32.mxu0 %vm675_vm3, %v1980_v58  ;;  %v17229_v34 = vld [vmem:[#allocation2 + $0xc9] sm:$0xff] }
 0x117   : > { %14365 = vmatprep.mubr.msk.f32.mxu1 %vm675_vm3, %v17222_v14  ;;  %v662_v36 = vmax.f32 %v580_v11, 0.0  ;;  %13822 = vmatmul.mubr.msk.f32.gmra.mrb[48].mxu0 %vm675_vm3, %v1981_v33 }
 0x118   : > { %14366 = vmatmul.mubr.msk.f32.gmra.mrb[12].mxu1 %vm675_vm3, %v17229_v34  ;;  %v661_v24 = vmax.f32 %v575_v42, 0.0  ;;  %v13679_v63 = vpop.f32.mrb[20].mxu0 }
 0x119   : > { %757 = vst.msk [vmem:[#allocation2 + $0x112] sm:$0xff] %vm675_vm3, %v662_v36  ;;  %v590_v60 = vadd.f32 %v13679_v63, %v17111_v54  ;;  %v584_v38 = vpop.f32.mrb[21].mxu0  ;;  %v1982_v10 = vld [vmem:[#allocation2 + $0xd8] sm:$0xff]  ;;  %v1983_v32 = vld [vmem:[#allocation2 + $0xe0] sm:$0xff] }
 0x11a   : > { %v17236_v52 = vld [vmem:[#allocation2 + $0xd9] sm:$0xff]  ;;  %756 = vst.msk [vmem:[#allocation2 + $0x10a] sm:$0xff] %vm675_vm3, %v661_v24  ;;  %v585_v50 = vadd.f32 %v17111_v54, %v584_v38  ;;  %13824 = vmatprep.mubr.msk.f32.mxu0 %vm675_vm3, %v1982_v10  ;;  %v17243_v26 = vld [vmem:[#allocation2 + $0xe1] sm:$0xff] }
 0x11b   : > { %14368 = vmatprep.mubr.msk.f32.mxu1 %vm675_vm3, %v17236_v52  ;;  %v664_v62 = vmax.f32 %v590_v60, 0.0  ;;  %13825 = vmatmul.mubr.msk.f32.gmra.mrb[50].mxu0 %vm675_vm3, %v1983_v32 }
 0x11c   : > { %14369 = vmatmul.mubr.msk.f32.gmra.mrb[14].mxu1 %vm675_vm3, %v17243_v26  ;;  %v663_v13 = vmax.f32 %v585_v50, 0.0  ;;  %v13682_v40 = vpop.f32.mrb[22].mxu0 }
 0x11d   : > { %759 = vst.msk [vmem:[#allocation2 + $0x12a] sm:$0xff] %vm675_vm3, %v664_v62  ;;  %v600_v44 = vadd.f32 %v13682_v40, %v17111_v54  ;;  %v594_v12 = vpop.f32.mrb[23].mxu0  ;;  %v1984_v17 = vld [vmem:[#allocation2 + $0xf0] sm:$0xff]  ;;  %v1985_v3 = vld [vmem:[#allocation2 + $0xf8] sm:$0xff] }
 0x11e   : > { %v17250_v41 = vld [vmem:[#allocation2 + $0xf1] sm:$0xff]  ;;  %758 = vst.msk [vmem:[#allocation2 + $0x122] sm:$0xff] %vm675_vm3, %v663_v13  ;;  %v595_v18 = vadd.f32 %v17111_v54, %v594_v12  ;;  %13827 = vmatprep.mubr.msk.f32.mxu0 %vm675_vm3, %v1984_v17  ;;  %v17257_v48 = vld [vmem:[#allocation2 + $0xf9] sm:$0xff] }
 0x11f   : > { %14371 = vmatprep.mubr.msk.f32.mxu1 %vm675_vm3, %v17250_v41  ;;  %v666_v6 = vmax.f32 %v600_v44, 0.0  ;;  %13828 = vmatmul.mubr.msk.f32.gmra.mrb[52].mxu0 %vm675_vm3, %v1985_v3 }
 0x120   : > { %14372 = vmatmul.mubr.msk.f32.gmra.mrb[16].mxu1 %vm675_vm3, %v17257_v48  ;;  %v665_v2 = vmax.f32 %v595_v18, 0.0  ;;  %v13685_v7 = vpop.f32.mrb[24].mxu0  ;;  %v2350_v18 = vld [vmem:[#allocation2 + $0x1] sm:$0xff] }
 0x121   : > { %761 = vst.msk [vmem:[#allocation2 + $0x142] sm:$0xff] %vm675_vm3, %v666_v6  ;;  %v610_v43 = vadd.f32 %v13685_v7, %v17111_v54  ;;  %v604_v61 = vpop.f32.mrb[25].mxu0  ;;  %v1986_v57 = vld [vmem:[#allocation2 + $0x108] sm:$0xff]  ;;  %v1987_v27 = vld [vmem:[#allocation2 + $0x110] sm:$0xff] }
 0x122   : > { %v17264_v29 = vld [vmem:[#allocation2 + $0x109] sm:$0xff]  ;;  %760 = vst.msk [vmem:[#allocation2 + $0x13a] sm:$0xff] %vm675_vm3, %v665_v2  ;;  %v605_v51 = vadd.f32 %v17111_v54, %v604_v61  ;;  %13830 = vmatprep.mubr.msk.f32.mxu0 %vm675_vm3, %v1986_v57  ;;  %v17271_v35 = vld [vmem:[#allocation2 + $0x111] sm:$0xff] }
 0x123   : > { %14374 = vmatprep.mubr.msk.f32.mxu1 %vm675_vm3, %v17264_v29  ;;  %v668_v1 = vmax.f32 %v610_v43, 0.0  ;;  %13831 = vmatmul.mubr.msk.f32.gmra.mrb[54].mxu0 %vm675_vm3, %v1987_v27  ;;  %v2351_v43 = vld [vmem:[#allocation2 + $0x9] sm:$0xff]  ;;  %v2352_v27 = vld [vmem:[#allocation2 + $0x19] sm:$0xff] }
 0x124   : > { %14375 = vmatmul.mubr.msk.f32.gmra.mrb[18].mxu1 %vm675_vm3, %v17271_v35  ;;  %v667_v49 = vmax.f32 %v605_v51, 0.0  ;;  %v13688_v28 = vpop.f32.mrb[26].mxu0  ;;  %v17335_v51 = vld [vmem:[%s19536_s5 + $0x18] sm:$0xff] }
 0x125   : > { %763 = vst.msk [vmem:[#allocation2 + $0x15a] sm:$0xff] %vm675_vm3, %v668_v1  ;;  %v620_v37 = vadd.f32 %v13688_v28, %v17111_v54  ;;  %v614_v19 = vpop.f32.mrb[27].mxu0  ;;  %v1988_v59 = vld [vmem:[#allocation2 + $0x120] sm:$0xff]  ;;  %v1989_v39 = vld [vmem:[#allocation2 + $0x128] sm:$0xff] }
 0x126   : > { %v17278_v9 = vld [vmem:[#allocation2 + $0x121] sm:$0xff]  ;;  %762 = vst.msk [vmem:[#allocation2 + $0x152] sm:$0xff] %vm675_vm3, %v667_v49  ;;  %v615_v56 = vadd.f32 %v17111_v54, %v614_v19  ;;  %13833 = vmatprep.mubr.msk.f32.mxu0 %vm675_vm3, %v1988_v59  ;;  %v17285_v45 = vld [vmem:[#allocation2 + $0x129] sm:$0xff]  ;;  %v17370_v59 = vld [vmem:[#allocation2 + $0x52] sm:$0xff] }
 0x127   : > { %14377 = vmatprep.mubr.msk.f32.mxu1 %vm675_vm3, %v17278_v9  ;;  %v670_v47 = vmax.f32 %v620_v37, 0.0  ;;  %13834 = vmatmul.mubr.msk.f32.gmra.mrb[56].mxu0 %vm675_vm3, %v1989_v39  ;;  %v2353_v1 = vld [vmem:[#allocation2 + $0x21] sm:$0xff]  ;;  %v17345_v37 = vld [vmem:[#allocation2 + $0x32] sm:$0xff] }
 0x128   : > { %14378 = vmatmul.mubr.msk.f32.gmra.mrb[20].mxu1 %vm675_vm3, %v17285_v45  ;;  %v669_v4 = vmax.f32 %v615_v56, 0.0  ;;  %v13691_v11 = vpop.f32.mrb[28].mxu0  ;;  %v17351_v19 = vld [vmem:[#allocation2 + $0x3a] sm:$0xff] }
 0x129   : > { %765 = vst.msk [vmem:[#allocation2 + $0x172] sm:$0xff] %vm675_vm3, %v670_v47  ;;  %v630_v25 = vadd.f32 %v13691_v11, %v17111_v54  ;;  %v624_v58 = vpop.f32.mrb[29].mxu0  ;;  %v1990_v33 = vld [vmem:[#allocation2 + $0x138] sm:$0xff]  ;;  %v1991_v36 = vld [vmem:[#allocation2 + $0x140] sm:$0xff]  ;;  %v2738_v11 = vld [vmem:[#allocation2 + $0xa] sm:$0xff] }
 0x12a   : > { %v17292_v42 = vld [vmem:[#allocation2 + $0x139] sm:$0xff]  ;;  %764 = vst.msk [vmem:[#allocation2 + $0x16a] sm:$0xff] %vm675_vm3, %v669_v4  ;;  %v625_v24 = vadd.f32 %v17111_v54, %v624_v58  ;;  %13836 = vmatprep.mubr.msk.f32.mxu0 %vm675_vm3, %v1990_v33  ;;  %v17299_v63 = vld [vmem:[#allocation2 + $0x141] sm:$0xff] }
 0x12b   : > { %14380 = vmatprep.mubr.msk.f32.mxu1 %vm675_vm3, %v17292_v42  ;;  %v672_v60 = vmax.f32 %v630_v25, 0.0  ;;  %13837 = vmatmul.mubr.msk.f32.gmra.mrb[58].mxu0 %vm675_vm3, %v1991_v36  ;;  %v2739_v25 = vld [vmem:[#allocation2 + $0x1a] sm:$0xff]  ;;  %v2740_v36 = vld [vmem:[#allocation2 + $0x22] sm:$0xff] }
 0x12c   : > { %14381 = vmatmul.mubr.msk.f32.gmra.mrb[22].mxu1 %vm675_vm3, %v17299_v63  ;;  %v671_v38 = vmax.f32 %v625_v24, 0.0  ;;  %v13694_v10 = vpop.f32.mrb[30].mxu0  ;;  %v17502_v39 = vld [vmem:[#allocation2 + $0x15a] sm:$0xff] }
 0x12d   : > { %767 = vst.msk [vmem:[#allocation2 + $0x18a] sm:$0xff] %vm675_vm3, %v672_v60  ;;  %v640_v32 = vadd.f32 %v13694_v10, %v17111_v54  ;;  %v634_v50 = vpop.f32.mrb[31].mxu0  ;;  %v1992_v62 = vld [vmem:[#allocation2 + $0x150] sm:$0xff]  ;;  %v1993_v40 = vld [vmem:[#allocation2 + $0x158] sm:$0xff] }
 0x12e   : > { %v17306_v13 = vld [vmem:[#allocation2 + $0x151] sm:$0xff]  ;;  %766 = vst.msk [vmem:[#allocation2 + $0x182] sm:$0xff] %vm675_vm3, %v671_v38  ;;  %v635_v44 = vadd.f32 %v17111_v54, %v634_v50  ;;  %13839 = vmatprep.mubr.msk.f32.mxu0 %vm675_vm3, %v1992_v62  ;;  %v17313_v12 = vld [vmem:[#allocation2 + $0x159] sm:$0xff]  ;;  %v17566_v50 = vld [vmem:[#allocation2 + $0x63] sm:$0xff] }
 0x12f   : > { %14383 = vmatprep.mubr.msk.f32.mxu1 %vm675_vm3, %v17306_v13  ;;  %v674_v17 = vmax.f32 %v640_v32, 0.0  ;;  %13840 = vmatmul.mubr.msk.f32.gmra.mrb[60].mxu0 %vm675_vm3, %v1993_v40  ;;  %v17541_v60 = vld [vmem:[#allocation2 + $0x3b] sm:$0xff]  ;;  %v17555_v10 = vld [vmem:[#allocation2 + $0x4b] sm:$0xff]  ;;  %v17560_v32 = vld [vmem:[#allocation2 + $0x53] sm:$0xff] }
 0x130   : > { %14384 = vmatmul.mubr.msk.f32.gmra.mrb[24].mxu1 %vm675_vm3, %v17313_v12  ;;  %v673_v3 = vmax.f32 %v635_v44, 0.0  ;;  %v17514_v47 = vld [vmem:[#allocation2 + $0x172] sm:$0xff]  ;;  %v17584_v40 = vld [vmem:[#allocation2 + $0x83] sm:$0xff] }
 0x131   : > { %769 = vst.msk [vmem:[#allocation2 + $0x1a2] sm:$0xff] %vm675_vm3, %v674_v17  ;;  %v1994_v6 = vld [vmem:[#allocation2 + $0x168] sm:$0xff]  ;;  %v1995_v54 = vld [vmem:[#allocation2 + $0x170] sm:$0xff]  ;;  %v17546_v38 = vld [vmem:[%s19536_s5 + $0x78] sm:$0xff] }
 0x132   : > { %v17319_v2 = vld [vmem:[#allocation2 + $0x169] sm:$0xff]  ;;  %768 = vst.msk [vmem:[#allocation2 + $0x19a] sm:$0xff] %vm675_vm3, %v673_v3  ;;  %13842 = vmatprep.mubr.msk.f32.mxu0 %vm675_vm3, %v1994_v6  ;;  %v17325_v7 = vld [vmem:[#allocation2 + $0x171] sm:$0xff] }
 0x133   : > { %14386 = vmatprep.mubr.msk.f32.mxu1 %vm675_vm3, %v17319_v2  ;;  %13843 = vmatmul.mubr.msk.f32.gmra.mrb[62].mxu0 %vm675_vm3, %v1995_v54  ;;  %v17508_v56 = vld [vmem:[#allocation2 + $0x16a] sm:$0xff]  ;;  %v17590_v44 = vld [vmem:[#allocation2 + $0x93] sm:$0xff] }
 0x134   : > { %14387 = vmatmul.mubr.msk.f32.gmra.mrb[26].mxu1 %vm675_vm3, %v17325_v7  ;;  %13847 = vmatprep.mubr.msk.f32.mxu0 %vm675_vm3, %v2350_v18  ;;  %v6637_v58 = vld [vmem:[#allocation2 + $0x18a] sm:$0xff]  ;;  %v17608_v3 = vld [vmem:[#allocation2 + $0xb3] sm:$0xff] }
 0x135   : > { %v6249_v61 = vld [vmem:[#allocation2 + $0x181] sm:$0xff]  ;;  %v6250_v57 = vld [vmem:[#allocation2 + $0x189] sm:$0xff] }
 0x136   : > { %14389 = vmatprep.mubr.msk.f32.mxu1 %vm675_vm3, %v6249_v61  ;;  %v6636_v4 = vld [vmem:[#allocation2 + $0x182] sm:$0xff]  ;;  %v17572_v62 = vld [vmem:[#allocation2 + $0x6b] sm:$0xff] }
 0x137   : > { %13848 = vmatmul.mubr.msk.f32.vlgmr.msra.gmra.mrb[32].mxu0 %vm675_vm3, %v2351_v43  ;;  %v17602_v17 = vld [vmem:[#allocation2 + $0xab] sm:$0xff]  ;;  %v17614_v18 = vld [vmem:[#allocation2 + $0xc3] sm:$0xff]  ;;  %v17644_v43 = vld [vmem:[#allocation2 + $0xfb] sm:$0xff] }
 0x138   : > { %14390 = vmatmul.mubr.msk.f32.gmra.mrb[28].mxu1 %vm675_vm3, %v6250_v57  ;;  %13850 = vmatprep.mubr.msk.f32.mxu0 %vm675_vm3, %v2352_v27  ;;  %v6639_v24 = vld [vmem:[#allocation2 + $0x1a2] sm:$0xff]  ;;  %v17620_v6 = vld [vmem:[#allocation2 + $0xcb] sm:$0xff]  ;;  %v17656_v57 = vld [vmem:[#allocation2 + $0x113] sm:$0xff] }
 0x139   : > { %13896 = vmatpush3.msra.mxu0 %v17118_v16  ;;  %v6251_v49 = vld [vmem:[#allocation2 + $0x199] sm:$0xff]  ;;  %v6252_v28 = vld [vmem:[#allocation2 + $0x1a1] sm:$0xff]  ;;  %v17356_v16 = vld [vmem:[%s19536_s5 + $0x70] sm:$0xff] }
 0x13a   : > { %13945 = vmatprep.subr.mxu0 %v17335_v51  ;;  %14392 = vmatprep.mubr.msk.f32.mxu1 %vm675_vm3, %v6251_v49  ;;  %v6638_v33 = vld [vmem:[#allocation2 + $0x19a] sm:$0xff]  ;;  %v17632_v54 = vld [vmem:[#allocation2 + $0xe3] sm:$0xff]  ;;  %v17650_v61 = vld [vmem:[#allocation2 + $0x10b] sm:$0xff] }
 0x13b   : > { %13851 = vmatmul.mubr.msk.f32.gmra.mrb[34].mxu0 %vm675_vm3, %v2353_v1  ;;  %v17662_v27 = vld [vmem:[#allocation2 + $0x123] sm:$0xff]  ;;  %v17674_v1 = vld [vmem:[#allocation2 + $0x13b] sm:$0xff] }
 0x13c   : > { %14393 = vmatmul.mubr.msk.f32.gmra.mrb[30].mxu1 %vm675_vm3, %v6252_v28  ;;  %13853 = vmatprep.mubr.msk.f32.mxu0 %vm675_vm3, %v17131_v30  ;;  %v17365_v30 = vld [vmem:[#allocation2 + $0x4a] sm:$0xff]  ;;  %v17686_v28 = vld [vmem:[#allocation2 + $0x153] sm:$0xff] }
 0x13d   : > { %14397 = vmatprep.mubr.msk.f32.mxu1 %vm675_vm3, %v17345_v37  ;;  %v17680_v49 = vld [vmem:[#allocation2 + $0x143] sm:$0xff] }
 0x13f   : > { %13854 = vmatmul.mubr.msk.f32.gmra.mrb[36].mxu0 %vm675_vm3, %v17138_v21  ;;  %v17376_v21 = vld [vmem:[#allocation2 + $0x62] sm:$0xff] }
 0x140   : > { %14398 = vmatmul.mubr.msk.f32.vlgmr.msra.gmra.mrb[0].mxu1 %vm675_vm3, %v17351_v19  ;;  %13856 = vmatprep.mubr.msk.f32.mxu0 %vm675_vm3, %v17151_v8  ;;  %v17388_v8 = vld [vmem:[#allocation2 + $0x7a] sm:$0xff] }
 0x141   : > { %14446 = vmatpush3.msra.mxu1 %v17143_v31  ;;  %14400 = vmatprep.mubr.msk.f32.mxu1 %vm675_vm3, %v17365_v30  ;;  %v17382_v31 = vld [vmem:[#allocation2 + $0x6a] sm:$0xff] }
 0x142   : > { %14495 = vmatprep.subr.mxu1 %v17356_v16 }
 0x143   : > { %13857 = vmatmul.mubr.msk.f32.gmra.mrb[38].mxu0 %vm675_vm3, %v17159_v55  ;;  %v17394_v55 = vld [vmem:[#allocation2 + $0x82] sm:$0xff] }
 0x144   : > { %14401 = vmatmul.mubr.msk.f32.gmra.mrb[2].mxu1 %vm675_vm3, %v17370_v59  ;;  %13859 = vmatprep.mubr.msk.f32.mxu0 %vm675_vm3, %v17166_v5  ;;  %v17400_v5 = vld [vmem:[#allocation2 + $0x92] sm:$0xff] }
 0x145   : > { %14403 = vmatprep.mubr.msk.f32.mxu1 %vm675_vm3, %v17376_v21 }
 0x147   : > { %13860 = vmatmul.mubr.msk.f32.gmra.mrb[40].mxu0 %vm675_vm3, %v17173_v15  ;;  %v17406_v15 = vld [vmem:[#allocation2 + $0x9a] sm:$0xff] }
 0x148   : > { %14404 = vmatmul.mubr.msk.f32.gmra.mrb[4].mxu1 %vm675_vm3, %v17382_v31  ;;  %13862 = vmatprep.mubr.msk.f32.mxu0 %vm675_vm3, %v17180_v22  ;;  %v17412_v22 = vld [vmem:[#allocation2 + $0xaa] sm:$0xff] }
 0x149   : > { %14406 = vmatprep.mubr.msk.f32.mxu1 %vm675_vm3, %v17388_v8 }
 0x14b   : > { %13863 = vmatmul.mubr.msk.f32.gmra.mrb[42].mxu0 %vm675_vm3, %v17187_v46  ;;  %v17418_v46 = vld [vmem:[#allocation2 + $0xb2] sm:$0xff] }
 0x14c   : > { %14407 = vmatmul.mubr.msk.f32.gmra.mrb[6].mxu1 %vm675_vm3, %v17394_v55  ;;  %13865 = vmatprep.mubr.msk.f32.mxu0 %vm675_vm3, %v17194_v20  ;;  %v17424_v20 = vld [vmem:[#allocation2 + $0xc2] sm:$0xff] }
 0x14d   : > { %14409 = vmatprep.mubr.msk.f32.mxu1 %vm675_vm3, %v17400_v5 }
 0x14f   : > { %13866 = vmatmul.mubr.msk.f32.gmra.mrb[44].mxu0 %vm675_vm3, %v17201_v0  ;;  %v17430_v0 = vld [vmem:[#allocation2 + $0xca] sm:$0xff] }
 0x150   : > { %14410 = vmatmul.mubr.msk.f32.gmra.mrb[8].mxu1 %vm675_vm3, %v17406_v15  ;;  %13868 = vmatprep.mubr.msk.f32.mxu0 %vm675_vm3, %v17208_v23  ;;  %v17436_v23 = vld [vmem:[#allocation2 + $0xda] sm:$0xff] }
 0x151   : > { %14412 = vmatprep.mubr.msk.f32.mxu1 %vm675_vm3, %v17412_v22 }
 0x153   : > { %13869 = vmatmul.mubr.msk.f32.gmra.mrb[46].mxu0 %vm675_vm3, %v17215_v53  ;;  %v17442_v53 = vld [vmem:[#allocation2 + $0xe2] sm:$0xff] }
 0x154   : > { %14413 = vmatmul.mubr.msk.f32.gmra.mrb[10].mxu1 %vm675_vm3, %v17418_v46  ;;  %13871 = vmatprep.mubr.msk.f32.mxu0 %vm675_vm3, %v17222_v14  ;;  %v17448_v14 = vld [vmem:[#allocation2 + $0xf2] sm:$0xff] }
 0x155   : > { %14415 = vmatprep.mubr.msk.f32.mxu1 %vm675_vm3, %v17424_v20 }
 0x157   : > { %13872 = vmatmul.mubr.msk.f32.gmra.mrb[48].mxu0 %vm675_vm3, %v17229_v34  ;;  %v17454_v34 = vld [vmem:[#allocation2 + $0xfa] sm:$0xff] }
 0x158   : > { %14416 = vmatmul.mubr.msk.f32.gmra.mrb[12].mxu1 %vm675_vm3, %v17430_v0  ;;  %13874 = vmatprep.mubr.msk.f32.mxu0 %vm675_vm3, %v17236_v52  ;;  %v17460_v52 = vld [vmem:[#allocation2 + $0x10a] sm:$0xff] }
 0x159   : > { %14418 = vmatprep.mubr.msk.f32.mxu1 %vm675_vm3, %v17436_v23 }
 0x15b   : > { %13875 = vmatmul.mubr.msk.f32.gmra.mrb[50].mxu0 %vm675_vm3, %v17243_v26  ;;  %v17466_v26 = vld [vmem:[#allocation2 + $0x112] sm:$0xff] }
 0x15c   : > { %14419 = vmatmul.mubr.msk.f32.gmra.mrb[14].mxu1 %vm675_vm3, %v17442_v53  ;;  %13877 = vmatprep.mubr.msk.f32.mxu0 %vm675_vm3, %v17250_v41  ;;  %v17472_v41 = vld [vmem:[#allocation2 + $0x122] sm:$0xff] }
 0x15d   : > { %14421 = vmatprep.mubr.msk.f32.mxu1 %vm675_vm3, %v17448_v14 }
 0x15f   : > { %13878 = vmatmul.mubr.msk.f32.gmra.mrb[52].mxu0 %vm675_vm3, %v17257_v48  ;;  %v17478_v48 = vld [vmem:[#allocation2 + $0x12a] sm:$0xff] }
 0x160   : > { %14422 = vmatmul.mubr.msk.f32.gmra.mrb[16].mxu1 %vm675_vm3, %v17454_v34  ;;  %13880 = vmatprep.mubr.msk.f32.mxu0 %vm675_vm3, %v17264_v29  ;;  %v17484_v29 = vld [vmem:[#allocation2 + $0x13a] sm:$0xff] }
 0x161   : > { %14424 = vmatprep.mubr.msk.f32.mxu1 %vm675_vm3, %v17460_v52 }
 0x163   : > { %13881 = vmatmul.mubr.msk.f32.gmra.mrb[54].mxu0 %vm675_vm3, %v17271_v35  ;;  %v17490_v35 = vld [vmem:[#allocation2 + $0x142] sm:$0xff] }
 0x164   : > { %14425 = vmatmul.mubr.msk.f32.gmra.mrb[18].mxu1 %vm675_vm3, %v17466_v26  ;;  %13883 = vmatprep.mubr.msk.f32.mxu0 %vm675_vm3, %v17278_v9  ;;  %v17496_v9 = vld [vmem:[#allocation2 + $0x152] sm:$0xff] }
 0x165   : > { %14427 = vmatprep.mubr.msk.f32.mxu1 %vm675_vm3, %v17472_v41 }
 0x167   : > { %13884 = vmatmul.mubr.msk.f32.gmra.mrb[56].mxu0 %vm675_vm3, %v17285_v45  ;;  %v2737_v45 = vld [vmem:[#allocation2 + $0x2] sm:$0xff] }
 0x168   : > { %14428 = vmatmul.mubr.msk.f32.gmra.mrb[20].mxu1 %vm675_vm3, %v17478_v48  ;;  %13886 = vmatprep.mubr.msk.f32.mxu0 %vm675_vm3, %v17292_v42  ;;  %v17527_v42 = vld [vmem:[%s19536_s5 + $0x20] sm:$0xff] }
 0x169   : > { %14430 = vmatprep.mubr.msk.f32.mxu1 %vm675_vm3, %v17484_v29 }
 0x16b   : > { %13887 = vmatmul.mubr.msk.f32.gmra.mrb[58].mxu0 %vm675_vm3, %v17299_v63  ;;  %v17535_v63 = vld [vmem:[#allocation2 + $0x33] sm:$0xff] }
 0x16c   : > { %14431 = vmatmul.mubr.msk.f32.gmra.mrb[22].mxu1 %vm675_vm3, %v17490_v35  ;;  %13889 = vmatprep.mubr.msk.f32.mxu0 %vm675_vm3, %v17306_v13  ;;  %v17578_v13 = vld [vmem:[#allocation2 + $0x7b] sm:$0xff] }
 0x16d   : > { %14433 = vmatprep.mubr.msk.f32.mxu1 %vm675_vm3, %v17496_v9 }
 0x16f   : > { %13890 = vmatmul.mubr.msk.f32.gmra.mrb[60].mxu0 %vm675_vm3, %v17313_v12  ;;  %v17596_v12 = vld [vmem:[#allocation2 + $0x9b] sm:$0xff] }
 0x170   : > { %14434 = vmatmul.mubr.msk.f32.gmra.mrb[24].mxu1 %vm675_vm3, %v17502_v39  ;;  %13892 = vmatprep.mubr.msk.f32.mxu0 %vm675_vm3, %v17319_v2  ;;  %v17626_v2 = vld [vmem:[#allocation2 + $0xdb] sm:$0xff] }
 0x171   : > { %14436 = vmatprep.mubr.msk.f32.mxu1 %vm675_vm3, %v17508_v56 }
 0x173   : > { %13893 = vmatmul.mubr.msk.f32.gmra.mrb[62].mxu0 %vm675_vm3, %v17325_v7  ;;  %v17638_v7 = vld [vmem:[#allocation2 + $0xf3] sm:$0xff] }
 0x174   : > { %14437 = vmatmul.mubr.msk.f32.gmra.mrb[26].mxu1 %vm675_vm3, %v17514_v47  ;;  %13897 = vmatprep.mubr.msk.f32.mxu0 %vm675_vm3, %v2737_v45  ;;  %v17822_v45 = vld [vmem:[#allocation2 + $0xe4] sm:$0xff] }
 0x175   : > { %14439 = vmatprep.mubr.msk.f32.mxu1 %vm675_vm3, %v6636_v4  ;;  %v17834_v4 = vld [vmem:[#allocation2 + $0xfc] sm:$0xff] }
 0x177   : > { %13898 = vmatmul.mubr.msk.f32.vlgmr.msra.gmra.mrb[32].mxu0 %vm675_vm3, %v2738_v11  ;;  %v17840_v11 = vld [vmem:[#allocation2 + $0x10c] sm:$0xff] }
 0x178   : > { %14440 = vmatmul.mubr.msk.f32.gmra.mrb[28].mxu1 %vm675_vm3, %v6637_v58  ;;  %13900 = vmatprep.mubr.msk.f32.mxu0 %vm675_vm3, %v2739_v25  ;;  %v17846_v25 = vld [vmem:[#allocation2 + $0x114] sm:$0xff]  ;;  %v17852_v58 = vld [vmem:[#allocation2 + $0x124] sm:$0xff] }
 0x179   : > { %14442 = vmatprep.mubr.msk.f32.mxu1 %vm675_vm3, %v6638_v33  ;;  %13946 = vmatpush3.msra.mxu0 %v17335_v51  ;;  %v17668_v51 = vld [vmem:[#allocation2 + $0x12b] sm:$0xff] }
 0x17a   : > { %13995 = vmatprep.subr.mxu0 %v17527_v42  ;;  %v17858_v33 = vld [vmem:[#allocation2 + $0x12c] sm:$0xff] }
 0x17b   : > { %13901 = vmatmul.mubr.msk.f32.gmra.mrb[34].mxu0 %vm675_vm3, %v2740_v36  ;;  %v17870_v36 = vld [vmem:[#allocation2 + $0x144] sm:$0xff] }
 0x17c   : > { %14443 = vmatmul.mubr.msk.f32.gmra.mrb[30].mxu1 %vm675_vm3, %v6639_v24  ;;  %13903 = vmatprep.mubr.msk.f32.mxu0 %vm675_vm3, %v17345_v37  ;;  %v17692_v37 = vld [vmem:[#allocation2 + $0x15b] sm:$0xff] }
 0x17d   : > { %14447 = vmatprep.mubr.msk.f32.mxu1 %vm675_vm3, %v17535_v63  ;;  %v17876_v24 = vld [vmem:[#allocation2 + $0x154] sm:$0xff] }
 0x17f   : > { %13904 = vmatmul.mubr.msk.f32.gmra.mrb[36].mxu0 %vm675_vm3, %v17351_v19  ;;  %v17698_v19 = vld [vmem:[#allocation2 + $0x16b] sm:$0xff] }
 0x180   : > { %14448 = vmatmul.mubr.msk.f32.vlgmr.msra.gmra.mrb[0].mxu1 %vm675_vm3, %v17541_v60  ;;  %13906 = vmatprep.mubr.msk.f32.mxu0 %vm675_vm3, %v17365_v30  ;;  %v17704_v30 = vld [vmem:[#allocation2 + $0x173] sm:$0xff] }
 0x181   : > { %14496 = vmatpush3.msra.mxu1 %v17356_v16  ;;  %14450 = vmatprep.mubr.msk.f32.mxu1 %vm675_vm3, %v17555_v10  ;;  %v3124_v16 = vld [vmem:[#allocation2 + $0x3] sm:$0xff] }
 0x182   : > { %14545 = vmatprep.subr.mxu1 %v17546_v38 }
 0x183   : > { %13907 = vmatmul.mubr.msk.f32.gmra.mrb[38].mxu0 %vm675_vm3, %v17370_v59  ;;  %v7023_v59 = vld [vmem:[#allocation2 + $0x183] sm:$0xff] }
 0x184   : > { %14451 = vmatmul.mubr.msk.f32.gmra.mrb[2].mxu1 %vm675_vm3, %v17560_v32  ;;  %13909 = vmatprep.mubr.msk.f32.mxu0 %vm675_vm3, %v17376_v21  ;;  %v3125_v21 = vld [vmem:[#allocation2 + $0xb] sm:$0xff] }
 0x185   : > { %14453 = vmatprep.mubr.msk.f32.mxu1 %vm675_vm3, %v17566_v50 }
 0x187   : > { %13910 = vmatmul.mubr.msk.f32.gmra.mrb[40].mxu0 %vm675_vm3, %v17382_v31  ;;  %v3126_v31 = vld [vmem:[#allocation2 + $0x1b] sm:$0xff] }
 0x188   : > { %14454 = vmatmul.mubr.msk.f32.gmra.mrb[4].mxu1 %vm675_vm3, %v17572_v62  ;;  %13912 = vmatprep.mubr.msk.f32.mxu0 %vm675_vm3, %v17388_v8  ;;  %v7024_v8 = vld [vmem:[#allocation2 + $0x18b] sm:$0xff] }
 0x189   : > { %14456 = vmatprep.mubr.msk.f32.mxu1 %vm675_vm3, %v17578_v13 }
 0x18b   : > { %13913 = vmatmul.mubr.msk.f32.gmra.mrb[42].mxu0 %vm675_vm3, %v17394_v55  ;;  %v7025_v55 = vld [vmem:[#allocation2 + $0x19b] sm:$0xff] }
 0x18c   : > { %14457 = vmatmul.mubr.msk.f32.gmra.mrb[6].mxu1 %vm675_vm3, %v17584_v40  ;;  %13915 = vmatprep.mubr.msk.f32.mxu0 %vm675_vm3, %v17400_v5  ;;  %v17717_v5 = vld [vmem:[%s19536_s5 + $0x28] sm:$0xff] }
 0x18d   : > { %14459 = vmatprep.mubr.msk.f32.mxu1 %vm675_vm3, %v17590_v44 }
 0x18f   : > { %13916 = vmatmul.mubr.msk.f32.gmra.mrb[44].mxu0 %vm675_vm3, %v17406_v15  ;;  %v3127_v15 = vld [vmem:[#allocation2 + $0x23] sm:$0xff] }
 0x190   : > { %14460 = vmatmul.mubr.msk.f32.gmra.mrb[8].mxu1 %vm675_vm3, %v17596_v12  ;;  %13918 = vmatprep.mubr.msk.f32.mxu0 %vm675_vm3, %v17412_v22  ;;  %v7026_v22 = vld [vmem:[#allocation2 + $0x1a3] sm:$0xff] }
 0x191   : > { %14462 = vmatprep.mubr.msk.f32.mxu1 %vm675_vm3, %v17602_v17 }
 0x193   : > { %13919 = vmatmul.mubr.msk.f32.gmra.mrb[46].mxu0 %vm675_vm3, %v17418_v46  ;;  %v17725_v46 = vld [vmem:[#allocation2 + $0x34] sm:$0xff] }
 0x194   : > { %14463 = vmatmul.mubr.msk.f32.gmra.mrb[10].mxu1 %vm675_vm3, %v17608_v3  ;;  %13921 = vmatprep.mubr.msk.f32.mxu0 %vm675_vm3, %v17424_v20  ;;  %v17731_v20 = vld [vmem:[#allocation2 + $0x3c] sm:$0xff] }
 0x195   : > { %14465 = vmatprep.mubr.msk.f32.mxu1 %vm675_vm3, %v17614_v18 }
 0x197   : > { %13922 = vmatmul.mubr.msk.f32.gmra.mrb[48].mxu0 %vm675_vm3, %v17430_v0  ;;  %v17736_v0 = vld [vmem:[%s19536_s5 + $0x80] sm:$0xff] }
 0x198   : > { %14466 = vmatmul.mubr.msk.f32.gmra.mrb[12].mxu1 %vm675_vm3, %v17620_v6  ;;  %13924 = vmatprep.mubr.msk.f32.mxu0 %vm675_vm3, %v17436_v23  ;;  %v17745_v23 = vld [vmem:[#allocation2 + $0x4c] sm:$0xff] }
 0x199   : > { %14468 = vmatprep.mubr.msk.f32.mxu1 %vm675_vm3, %v17626_v2 }
 0x19b   : > { %13925 = vmatmul.mubr.msk.f32.gmra.mrb[50].mxu0 %vm675_vm3, %v17442_v53  ;;  %v17750_v53 = vld [vmem:[#allocation2 + $0x54] sm:$0xff] }
 0x19c   : > { %14469 = vmatmul.mubr.msk.f32.gmra.mrb[14].mxu1 %vm675_vm3, %v17632_v54  ;;  %13927 = vmatprep.mubr.msk.f32.mxu0 %vm675_vm3, %v17448_v14  ;;  %v17756_v14 = vld [vmem:[#allocation2 + $0x64] sm:$0xff] }
 0x19d   : > { %14471 = vmatprep.mubr.msk.f32.mxu1 %vm675_vm3, %v17638_v7 }
 0x19f   : > { %13928 = vmatmul.mubr.msk.f32.gmra.mrb[52].mxu0 %vm675_vm3, %v17454_v34  ;;  %v17762_v34 = vld [vmem:[#allocation2 + $0x6c] sm:$0xff] }
 0x1a0   : > { %14472 = vmatmul.mubr.msk.f32.gmra.mrb[16].mxu1 %vm675_vm3, %v17644_v43  ;;  %13930 = vmatprep.mubr.msk.f32.mxu0 %vm675_vm3, %v17460_v52  ;;  %v17768_v52 = vld [vmem:[#allocation2 + $0x7c] sm:$0xff] }
 0x1a1   : > { %14474 = vmatprep.mubr.msk.f32.mxu1 %vm675_vm3, %v17650_v61 }
 0x1a3   : > { %13931 = vmatmul.mubr.msk.f32.gmra.mrb[54].mxu0 %vm675_vm3, %v17466_v26  ;;  %v17774_v26 = vld [vmem:[#allocation2 + $0x84] sm:$0xff] }
 0x1a4   : > { %14475 = vmatmul.mubr.msk.f32.gmra.mrb[18].mxu1 %vm675_vm3, %v17656_v57  ;;  %13933 = vmatprep.mubr.msk.f32.mxu0 %vm675_vm3, %v17472_v41  ;;  %v17780_v41 = vld [vmem:[#allocation2 + $0x94] sm:$0xff] }
 0x1a5   : > { %14477 = vmatprep.mubr.msk.f32.mxu1 %vm675_vm3, %v17662_v27 }
 0x1a7   : > { %13934 = vmatmul.mubr.msk.f32.gmra.mrb[56].mxu0 %vm675_vm3, %v17478_v48  ;;  %v17786_v48 = vld [vmem:[#allocation2 + $0x9c] sm:$0xff] }
 0x1a8   : > { %14478 = vmatmul.mubr.msk.f32.gmra.mrb[20].mxu1 %vm675_vm3, %v17668_v51  ;;  %13936 = vmatprep.mubr.msk.f32.mxu0 %vm675_vm3, %v17484_v29  ;;  %v17792_v29 = vld [vmem:[#allocation2 + $0xac] sm:$0xff] }
 0x1a9   : > { %14480 = vmatprep.mubr.msk.f32.mxu1 %vm675_vm3, %v17674_v1 }
 0x1ab   : > { %13937 = vmatmul.mubr.msk.f32.gmra.mrb[58].mxu0 %vm675_vm3, %v17490_v35  ;;  %v17798_v35 = vld [vmem:[#allocation2 + $0xb4] sm:$0xff] }
 0x1ac   : > { %14481 = vmatmul.mubr.msk.f32.gmra.mrb[22].mxu1 %vm675_vm3, %v17680_v49  ;;  %13939 = vmatprep.mubr.msk.f32.mxu0 %vm675_vm3, %v17496_v9  ;;  %v17804_v9 = vld [vmem:[#allocation2 + $0xc4] sm:$0xff] }
 0x1ad   : > { %14483 = vmatprep.mubr.msk.f32.mxu1 %vm675_vm3, %v17686_v28 }
 0x1af   : > { %13940 = vmatmul.mubr.msk.f32.gmra.mrb[60].mxu0 %vm675_vm3, %v17502_v39  ;;  %v17810_v39 = vld [vmem:[#allocation2 + $0xcc] sm:$0xff] }
 0x1b0   : > { %14484 = vmatmul.mubr.msk.f32.gmra.mrb[24].mxu1 %vm675_vm3, %v17692_v37  ;;  %13942 = vmatprep.mubr.msk.f32.mxu0 %vm675_vm3, %v17508_v56  ;;  %v17816_v56 = vld [vmem:[#allocation2 + $0xdc] sm:$0xff] }
 0x1b1   : > { %14486 = vmatprep.mubr.msk.f32.mxu1 %vm675_vm3, %v17698_v19 }
 0x1b3   : > { %13943 = vmatmul.mubr.msk.f32.gmra.mrb[62].mxu0 %vm675_vm3, %v17514_v47  ;;  %v17828_v47 = vld [vmem:[#allocation2 + $0xf4] sm:$0xff] }
 0x1b4   : > { %14487 = vmatmul.mubr.msk.f32.gmra.mrb[26].mxu1 %vm675_vm3, %v17704_v30  ;;  %13947 = vmatprep.mubr.msk.f32.mxu0 %vm675_vm3, %v3124_v16  ;;  %v18012_v16 = vld [vmem:[#allocation2 + $0xf8] sm:$0xff] }
 0x1b5   : > { %14489 = vmatprep.mubr.msk.f32.mxu1 %vm675_vm3, %v7023_v59  ;;  %v18024_v59 = vld [vmem:[#allocation2 + $0x110] sm:$0xff] }
 0x1b7   : > { %13948 = vmatmul.mubr.msk.f32.vlgmr.msra.gmra.mrb[32].mxu0 %vm675_vm3, %v3125_v21  ;;  %v18030_v21 = vld [vmem:[#allocation2 + $0x120] sm:$0xff] }
 0x1b8   : > { %14490 = vmatmul.mubr.msk.f32.gmra.mrb[28].mxu1 %vm675_vm3, %v7024_v8  ;;  %13950 = vmatprep.mubr.msk.f32.mxu0 %vm675_vm3, %v3126_v31  ;;  %v18036_v31 = vld [vmem:[#allocation2 + $0x128] sm:$0xff]  ;;  %v18042_v8 = vld [vmem:[#allocation2 + $0x138] sm:$0xff] }
 0x1b9   : > { %14492 = vmatprep.mubr.msk.f32.mxu1 %vm675_vm3, %v7025_v55  ;;  %13996 = vmatpush3.msra.mxu0 %v17527_v42  ;;  %v17864_v42 = vld [vmem:[#allocation2 + $0x13c] sm:$0xff] }
 0x1ba   : > { %14045 = vmatprep.subr.mxu0 %v17717_v5  ;;  %v18048_v55 = vld [vmem:[#allocation2 + $0x140] sm:$0xff] }
 0x1bb   : > { %13951 = vmatmul.mubr.msk.f32.gmra.mrb[34].mxu0 %vm675_vm3, %v3127_v15  ;;  %v18060_v15 = vld [vmem:[#allocation2 + $0x158] sm:$0xff] }
 0x1bc   : > { %14493 = vmatmul.mubr.msk.f32.gmra.mrb[30].mxu1 %vm675_vm3, %v7026_v22  ;;  %13953 = vmatprep.mubr.msk.f32.mxu0 %vm675_vm3, %v17535_v63  ;;  %v17882_v63 = vld [vmem:[#allocation2 + $0x15c] sm:$0xff]  ;;  %v18066_v22 = vld [vmem:[#allocation2 + $0x168] sm:$0xff] }
 0x1bd   : > { %14497 = vmatprep.mubr.msk.f32.mxu1 %vm675_vm3, %v17725_v46 }
 0x1bf   : > { %13954 = vmatmul.mubr.msk.f32.gmra.mrb[36].mxu0 %vm675_vm3, %v17541_v60  ;;  %v17888_v60 = vld [vmem:[#allocation2 + $0x16c] sm:$0xff] }
 0x1c0   : > { %14498 = vmatmul.mubr.msk.f32.vlgmr.msra.gmra.mrb[0].mxu1 %vm675_vm3, %v17731_v20  ;;  %13956 = vmatprep.mubr.msk.f32.mxu0 %vm675_vm3, %v17555_v10  ;;  %v17894_v10 = vld [vmem:[#allocation2 + $0x174] sm:$0xff] }
 0x1c1   : > { %14546 = vmatpush3.msra.mxu1 %v17546_v38  ;;  %14500 = vmatprep.mubr.msk.f32.mxu1 %vm675_vm3, %v17745_v23  ;;  %v3511_v38 = vld [vmem:[#allocation2 + $0x4] sm:$0xff] }
 0x1c2   : > { %14595 = vmatprep.subr.mxu1 %v17736_v0 }
 0x1c3   : > { %13957 = vmatmul.mubr.msk.f32.gmra.mrb[38].mxu0 %vm675_vm3, %v17560_v32  ;;  %v7410_v32 = vld [vmem:[#allocation2 + $0x184] sm:$0xff] }
 0x1c4   : > { %14501 = vmatmul.mubr.msk.f32.gmra.mrb[2].mxu1 %vm675_vm3, %v17750_v53  ;;  %13959 = vmatprep.mubr.msk.f32.mxu0 %vm675_vm3, %v17566_v50  ;;  %v3512_v50 = vld [vmem:[#allocation2 + $0xc] sm:$0xff] }
 0x1c5   : > { %14503 = vmatprep.mubr.msk.f32.mxu1 %vm675_vm3, %v17756_v14 }
 0x1c7   : > { %13960 = vmatmul.mubr.msk.f32.gmra.mrb[40].mxu0 %vm675_vm3, %v17572_v62  ;;  %v3513_v62 = vld [vmem:[#allocation2 + $0x1c] sm:$0xff] }
 0x1c8   : > { %14504 = vmatmul.mubr.msk.f32.gmra.mrb[4].mxu1 %vm675_vm3, %v17762_v34  ;;  %13962 = vmatprep.mubr.msk.f32.mxu0 %vm675_vm3, %v17578_v13  ;;  %v7411_v13 = vld [vmem:[#allocation2 + $0x18c] sm:$0xff] }
 0x1c9   : > { %14506 = vmatprep.mubr.msk.f32.mxu1 %vm675_vm3, %v17768_v52 }
 0x1cb   : > { %13963 = vmatmul.mubr.msk.f32.gmra.mrb[42].mxu0 %vm675_vm3, %v17584_v40  ;;  %v7412_v40 = vld [vmem:[#allocation2 + $0x19c] sm:$0xff] }
 0x1cc   : > { %14507 = vmatmul.mubr.msk.f32.gmra.mrb[6].mxu1 %vm675_vm3, %v17774_v26  ;;  %13965 = vmatprep.mubr.msk.f32.mxu0 %vm675_vm3, %v17590_v44  ;;  %v17907_v44 = vld [vmem:[%s19536_s5 + $0x30] sm:$0xff] }
 0x1cd   : > { %14509 = vmatprep.mubr.msk.f32.mxu1 %vm675_vm3, %v17780_v41 }
 0x1cf   : > { %13966 = vmatmul.mubr.msk.f32.gmra.mrb[44].mxu0 %vm675_vm3, %v17596_v12  ;;  %v3514_v12 = vld [vmem:[#allocation2 + $0x24] sm:$0xff] }
 0x1d0   : > { %14510 = vmatmul.mubr.msk.f32.gmra.mrb[8].mxu1 %vm675_vm3, %v17786_v48  ;;  %13968 = vmatprep.mubr.msk.f32.mxu0 %vm675_vm3, %v17602_v17  ;;  %v7413_v17 = vld [vmem:[#allocation2 + $0x1a4] sm:$0xff] }
 0x1d1   : > { %14512 = vmatprep.mubr.msk.f32.mxu1 %vm675_vm3, %v17792_v29 }
 0x1d3   : > { %13969 = vmatmul.mubr.msk.f32.gmra.mrb[46].mxu0 %vm675_vm3, %v17608_v3  ;;  %v17915_v3 = vld [vmem:[#allocation2 + $0x48] sm:$0xff] }
 0x1d4   : > { %14513 = vmatmul.mubr.msk.f32.gmra.mrb[10].mxu1 %vm675_vm3, %v17798_v35  ;;  %13971 = vmatprep.mubr.msk.f32.mxu0 %vm675_vm3, %v17614_v18  ;;  %v17921_v18 = vld [vmem:[#allocation2 + $0x50] sm:$0xff] }
 0x1d5   : > { %14515 = vmatprep.mubr.msk.f32.mxu1 %vm675_vm3, %v17804_v9 }
 0x1d7   : > { %13972 = vmatmul.mubr.msk.f32.gmra.mrb[48].mxu0 %vm675_vm3, %v17620_v6  ;;  %v17926_v6 = vld [vmem:[%s19536_s5 + $0x88] sm:$0xff] }
 0x1d8   : > { %14516 = vmatmul.mubr.msk.f32.gmra.mrb[12].mxu1 %vm675_vm3, %v17810_v39  ;;  %13974 = vmatprep.mubr.msk.f32.mxu0 %vm675_vm3, %v17626_v2  ;;  %v17935_v2 = vld [vmem:[#allocation2 + $0x60] sm:$0xff] }
 0x1d9   : > { %14518 = vmatprep.mubr.msk.f32.mxu1 %vm675_vm3, %v17816_v56 }
 0x1db   : > { %13975 = vmatmul.mubr.msk.f32.gmra.mrb[50].mxu0 %vm675_vm3, %v17632_v54  ;;  %v17940_v54 = vld [vmem:[#allocation2 + $0x68] sm:$0xff] }
 0x1dc   : > { %14519 = vmatmul.mubr.msk.f32.gmra.mrb[14].mxu1 %vm675_vm3, %v17822_v45  ;;  %13977 = vmatprep.mubr.msk.f32.mxu0 %vm675_vm3, %v17638_v7  ;;  %v17946_v7 = vld [vmem:[#allocation2 + $0x78] sm:$0xff] }
 0x1dd   : > { %14521 = vmatprep.mubr.msk.f32.mxu1 %vm675_vm3, %v17828_v47 }
 0x1df   : > { %13978 = vmatmul.mubr.msk.f32.gmra.mrb[52].mxu0 %vm675_vm3, %v17644_v43  ;;  %v17952_v43 = vld [vmem:[#allocation2 + $0x80] sm:$0xff] }
 0x1e0   : > { %14522 = vmatmul.mubr.msk.f32.gmra.mrb[16].mxu1 %vm675_vm3, %v17834_v4  ;;  %13980 = vmatprep.mubr.msk.f32.mxu0 %vm675_vm3, %v17650_v61  ;;  %v17958_v61 = vld [vmem:[#allocation2 + $0x90] sm:$0xff] }
 0x1e1   : > { %14524 = vmatprep.mubr.msk.f32.mxu1 %vm675_vm3, %v17840_v11 }
 0x1e3   : > { %13981 = vmatmul.mubr.msk.f32.gmra.mrb[54].mxu0 %vm675_vm3, %v17656_v57  ;;  %v17964_v57 = vld [vmem:[#allocation2 + $0x98] sm:$0xff] }
 0x1e4   : > { %14525 = vmatmul.mubr.msk.f32.gmra.mrb[18].mxu1 %vm675_vm3, %v17846_v25  ;;  %13983 = vmatprep.mubr.msk.f32.mxu0 %vm675_vm3, %v17662_v27  ;;  %v17970_v27 = vld [vmem:[#allocation2 + $0xa8] sm:$0xff] }
 0x1e5   : > { %14527 = vmatprep.mubr.msk.f32.mxu1 %vm675_vm3, %v17852_v58 }
 0x1e7   : > { %13984 = vmatmul.mubr.msk.f32.gmra.mrb[56].mxu0 %vm675_vm3, %v17668_v51  ;;  %v17976_v51 = vld [vmem:[#allocation2 + $0xb0] sm:$0xff] }
 0x1e8   : > { %14528 = vmatmul.mubr.msk.f32.gmra.mrb[20].mxu1 %vm675_vm3, %v17858_v33  ;;  %13986 = vmatprep.mubr.msk.f32.mxu0 %vm675_vm3, %v17674_v1  ;;  %v17982_v1 = vld [vmem:[#allocation2 + $0xc0] sm:$0xff] }
 0x1e9   : > { %14530 = vmatprep.mubr.msk.f32.mxu1 %vm675_vm3, %v17864_v42 }
 0x1eb   : > { %13987 = vmatmul.mubr.msk.f32.gmra.mrb[58].mxu0 %vm675_vm3, %v17680_v49  ;;  %v17988_v49 = vld [vmem:[#allocation2 + $0xc8] sm:$0xff] }
 0x1ec   : > { %14531 = vmatmul.mubr.msk.f32.gmra.mrb[22].mxu1 %vm675_vm3, %v17870_v36  ;;  %13989 = vmatprep.mubr.msk.f32.mxu0 %vm675_vm3, %v17686_v28  ;;  %v17994_v28 = vld [vmem:[#allocation2 + $0xd8] sm:$0xff] }
 0x1ed   : > { %14533 = vmatprep.mubr.msk.f32.mxu1 %vm675_vm3, %v17876_v24 }
 0x1ef   : > { %13990 = vmatmul.mubr.msk.f32.gmra.mrb[60].mxu0 %vm675_vm3, %v17692_v37  ;;  %v18000_v37 = vld [vmem:[#allocation2 + $0xe0] sm:$0xff] }
 0x1f0   : > { %14534 = vmatmul.mubr.msk.f32.gmra.mrb[24].mxu1 %vm675_vm3, %v17882_v63  ;;  %13992 = vmatprep.mubr.msk.f32.mxu0 %vm675_vm3, %v17698_v19  ;;  %v18006_v19 = vld [vmem:[#allocation2 + $0xf0] sm:$0xff] }
 0x1f1   : > { %14536 = vmatprep.mubr.msk.f32.mxu1 %vm675_vm3, %v17888_v60 }
 0x1f3   : > { %13993 = vmatmul.mubr.msk.f32.gmra.mrb[62].mxu0 %vm675_vm3, %v17704_v30  ;;  %v18018_v30 = vld [vmem:[#allocation2 + $0x108] sm:$0xff] }
 0x1f4   : > { %14537 = vmatmul.mubr.msk.f32.gmra.mrb[26].mxu1 %vm675_vm3, %v17894_v10  ;;  %13997 = vmatprep.mubr.msk.f32.mxu0 %vm675_vm3, %v3511_v38  ;;  %v18202_v38 = vld [vmem:[#allocation2 + $0xf9] sm:$0xff] }
 0x1f5   : > { %14539 = vmatprep.mubr.msk.f32.mxu1 %vm675_vm3, %v7410_v32  ;;  %v18214_v32 = vld [vmem:[#allocation2 + $0x111] sm:$0xff] }
 0x1f7   : > { %13998 = vmatmul.mubr.msk.f32.vlgmr.msra.gmra.mrb[32].mxu0 %vm675_vm3, %v3512_v50  ;;  %v18220_v50 = vld [vmem:[#allocation2 + $0x121] sm:$0xff] }
 0x1f8   : > { %14540 = vmatmul.mubr.msk.f32.gmra.mrb[28].mxu1 %vm675_vm3, %v7411_v13  ;;  %14000 = vmatprep.mubr.msk.f32.mxu0 %vm675_vm3, %v3513_v62  ;;  %v18226_v62 = vld [vmem:[#allocation2 + $0x129] sm:$0xff]  ;;  %v18232_v13 = vld [vmem:[#allocation2 + $0x139] sm:$0xff] }
 0x1f9   : > { %14542 = vmatprep.mubr.msk.f32.mxu1 %vm675_vm3, %v7412_v40  ;;  %14046 = vmatpush3.msra.mxu0 %v17717_v5  ;;  %v18054_v5 = vld [vmem:[#allocation2 + $0x150] sm:$0xff]  ;;  %v18238_v40 = vld [vmem:[#allocation2 + $0x141] sm:$0xff] }
 0x1fa   : > { %14095 = vmatprep.subr.mxu0 %v17907_v44 }
 0x1fb   : > { %14001 = vmatmul.mubr.msk.f32.gmra.mrb[34].mxu0 %vm675_vm3, %v3514_v12  ;;  %v18250_v12 = vld [vmem:[#allocation2 + $0x159] sm:$0xff] }
 0x1fc   : > { %14543 = vmatmul.mubr.msk.f32.gmra.mrb[30].mxu1 %vm675_vm3, %v7413_v17  ;;  %14003 = vmatprep.mubr.msk.f32.mxu0 %vm675_vm3, %v17725_v46  ;;  %v18072_v46 = vld [vmem:[#allocation2 + $0x170] sm:$0xff] }
 0x1fd   : > { %14547 = vmatprep.mubr.msk.f32.mxu1 %vm675_vm3, %v17915_v3  ;;  %v18256_v17 = vld [vmem:[#allocation2 + $0x169] sm:$0xff] }
 0x1ff   : > { %14004 = vmatmul.mubr.msk.f32.gmra.mrb[36].mxu0 %vm675_vm3, %v17731_v20  ;;  %v18078_v20 = vld [vmem:[#allocation2 + $0x180] sm:$0xff] }
 0x200   : > { %14548 = vmatmul.mubr.msk.f32.vlgmr.msra.gmra.mrb[0].mxu1 %vm675_vm3, %v17921_v18  ;;  %14006 = vmatprep.mubr.msk.f32.mxu0 %vm675_vm3, %v17745_v23  ;;  %v18084_v23 = vld [vmem:[#allocation2 + $0x188] sm:$0xff] }
 0x201   : > { %14596 = vmatpush3.msra.mxu1 %v17736_v0  ;;  %14550 = vmatprep.mubr.msk.f32.mxu1 %vm675_vm3, %v17935_v2  ;;  %v3899_v0 = vld [vmem:[#allocation2 + $0x18] sm:$0xff] }
 0x202   : > { %14645 = vmatprep.subr.mxu1 %v17926_v6 }
 0x203   : > { %14007 = vmatmul.mubr.msk.f32.gmra.mrb[38].mxu0 %vm675_vm3, %v17750_v53  ;;  %v7798_v53 = vld [vmem:[#allocation2 + $0x198] sm:$0xff] }
 0x204   : > { %14551 = vmatmul.mubr.msk.f32.gmra.mrb[2].mxu1 %vm675_vm3, %v17940_v54  ;;  %14009 = vmatprep.mubr.msk.f32.mxu0 %vm675_vm3, %v17756_v14  ;;  %v3900_v14 = vld [vmem:[#allocation2 + $0x20] sm:$0xff] }
 0x205   : > { %14553 = vmatprep.mubr.msk.f32.mxu1 %vm675_vm3, %v17946_v7 }
 0x207   : > { %14010 = vmatmul.mubr.msk.f32.gmra.mrb[40].mxu0 %vm675_vm3, %v17762_v34  ;;  %v7800_v34 = vld [vmem:[#allocation2 + $0x1b0] sm:$0xff] }
 0x208   : > { %14554 = vmatmul.mubr.msk.f32.gmra.mrb[4].mxu1 %vm675_vm3, %v17952_v43  ;;  %14012 = vmatprep.mubr.msk.f32.mxu0 %vm675_vm3, %v17768_v52  ;;  %v7799_v52 = vld [vmem:[#allocation2 + $0x1a0] sm:$0xff] }
 0x209   : > { %14556 = vmatprep.mubr.msk.f32.mxu1 %vm675_vm3, %v17958_v61 }
 0x20b   : > { %14013 = vmatmul.mubr.msk.f32.gmra.mrb[42].mxu0 %vm675_vm3, %v17774_v26  ;;  %v3901_v26 = vld [vmem:[#allocation2 + $0x30] sm:$0xff] }
 0x20c   : > { %14557 = vmatmul.mubr.msk.f32.gmra.mrb[6].mxu1 %vm675_vm3, %v17964_v57  ;;  %14015 = vmatprep.mubr.msk.f32.mxu0 %vm675_vm3, %v17780_v41  ;;  %v18097_v41 = vld [vmem:[%s19536_s5 + $0x38] sm:$0xff] }
 0x20d   : > { %14559 = vmatprep.mubr.msk.f32.mxu1 %vm675_vm3, %v17970_v27 }
 0x20f   : > { %14016 = vmatmul.mubr.msk.f32.gmra.mrb[44].mxu0 %vm675_vm3, %v17786_v48  ;;  %v7801_v48 = vld [vmem:[#allocation2 + $0x1b8] sm:$0xff] }
 0x210   : > { %14560 = vmatmul.mubr.msk.f32.gmra.mrb[8].mxu1 %vm675_vm3, %v17976_v51  ;;  %14018 = vmatprep.mubr.msk.f32.mxu0 %vm675_vm3, %v17792_v29  ;;  %v3902_v29 = vld [vmem:[#allocation2 + $0x38] sm:$0xff] }
 0x211   : > { %14562 = vmatprep.mubr.msk.f32.mxu1 %vm675_vm3, %v17982_v1 }
 0x213   : > { %14019 = vmatmul.mubr.msk.f32.gmra.mrb[46].mxu0 %vm675_vm3, %v17798_v35  ;;  %v18105_v35 = vld [vmem:[#allocation2 + $0x49] sm:$0xff] }
 0x214   : > { %14563 = vmatmul.mubr.msk.f32.gmra.mrb[10].mxu1 %vm675_vm3, %v17988_v49  ;;  %14021 = vmatprep.mubr.msk.f32.mxu0 %vm675_vm3, %v17804_v9  ;;  %v18111_v9 = vld [vmem:[#allocation2 + $0x51] sm:$0xff] }
 0x215   : > { %14565 = vmatprep.mubr.msk.f32.mxu1 %vm675_vm3, %v17994_v28 }
 0x217   : > { %14022 = vmatmul.mubr.msk.f32.gmra.mrb[48].mxu0 %vm675_vm3, %v17810_v39  ;;  %v18116_v39 = vld [vmem:[%s19536_s5 + $0x90] sm:$0xff] }
 0x218   : > { %14566 = vmatmul.mubr.msk.f32.gmra.mrb[12].mxu1 %vm675_vm3, %v18000_v37  ;;  %14024 = vmatprep.mubr.msk.f32.mxu0 %vm675_vm3, %v17816_v56  ;;  %v18125_v56 = vld [vmem:[#allocation2 + $0x61] sm:$0xff] }
 0x219   : > { %14568 = vmatprep.mubr.msk.f32.mxu1 %vm675_vm3, %v18006_v19 }
 0x21b   : > { %14025 = vmatmul.mubr.msk.f32.gmra.mrb[50].mxu0 %vm675_vm3, %v17822_v45  ;;  %v18130_v45 = vld [vmem:[#allocation2 + $0x69] sm:$0xff] }
 0x21c   : > { %14569 = vmatmul.mubr.msk.f32.gmra.mrb[14].mxu1 %vm675_vm3, %v18012_v16  ;;  %14027 = vmatprep.mubr.msk.f32.mxu0 %vm675_vm3, %v17828_v47  ;;  %v18136_v47 = vld [vmem:[#allocation2 + $0x79] sm:$0xff] }
 0x21d   : > { %14571 = vmatprep.mubr.msk.f32.mxu1 %vm675_vm3, %v18018_v30 }
 0x21f   : > { %14028 = vmatmul.mubr.msk.f32.gmra.mrb[52].mxu0 %vm675_vm3, %v17834_v4  ;;  %v18142_v4 = vld [vmem:[#allocation2 + $0x81] sm:$0xff] }
 0x220   : > { %14572 = vmatmul.mubr.msk.f32.gmra.mrb[16].mxu1 %vm675_vm3, %v18024_v59  ;;  %14030 = vmatprep.mubr.msk.f32.mxu0 %vm675_vm3, %v17840_v11  ;;  %v18148_v11 = vld [vmem:[#allocation2 + $0x91] sm:$0xff] }
 0x221   : > { %14574 = vmatprep.mubr.msk.f32.mxu1 %vm675_vm3, %v18030_v21 }
 0x223   : > { %14031 = vmatmul.mubr.msk.f32.gmra.mrb[54].mxu0 %vm675_vm3, %v17846_v25  ;;  %v18154_v25 = vld [vmem:[#allocation2 + $0x99] sm:$0xff] }
 0x224   : > { %14575 = vmatmul.mubr.msk.f32.gmra.mrb[18].mxu1 %vm675_vm3, %v18036_v31  ;;  %14033 = vmatprep.mubr.msk.f32.mxu0 %vm675_vm3, %v17852_v58  ;;  %v18160_v58 = vld [vmem:[#allocation2 + $0xa9] sm:$0xff] }
 0x225   : > { %14577 = vmatprep.mubr.msk.f32.mxu1 %vm675_vm3, %v18042_v8 }
 0x227   : > { %14034 = vmatmul.mubr.msk.f32.gmra.mrb[56].mxu0 %vm675_vm3, %v17858_v33  ;;  %v18166_v33 = vld [vmem:[#allocation2 + $0xb1] sm:$0xff] }
 0x228   : > { %14578 = vmatmul.mubr.msk.f32.gmra.mrb[20].mxu1 %vm675_vm3, %v18048_v55  ;;  %14036 = vmatprep.mubr.msk.f32.mxu0 %vm675_vm3, %v17864_v42  ;;  %v18172_v42 = vld [vmem:[#allocation2 + $0xc1] sm:$0xff] }
 0x229   : > { %14580 = vmatprep.mubr.msk.f32.mxu1 %vm675_vm3, %v18054_v5 }
 0x22b   : > { %14037 = vmatmul.mubr.msk.f32.gmra.mrb[58].mxu0 %vm675_vm3, %v17870_v36  ;;  %v18178_v36 = vld [vmem:[#allocation2 + $0xc9] sm:$0xff] }
 0x22c   : > { %14581 = vmatmul.mubr.msk.f32.gmra.mrb[22].mxu1 %vm675_vm3, %v18060_v15  ;;  %14039 = vmatprep.mubr.msk.f32.mxu0 %vm675_vm3, %v17876_v24  ;;  %v18184_v24 = vld [vmem:[#allocation2 + $0xd9] sm:$0xff] }
 0x22d   : > { %14583 = vmatprep.mubr.msk.f32.mxu1 %vm675_vm3, %v18066_v22 }
 0x22f   : > { %14040 = vmatmul.mubr.msk.f32.gmra.mrb[60].mxu0 %vm675_vm3, %v17882_v63  ;;  %v18190_v63 = vld [vmem:[#allocation2 + $0xe1] sm:$0xff] }
 0x230   : > { %14584 = vmatmul.mubr.msk.f32.gmra.mrb[24].mxu1 %vm675_vm3, %v18072_v46  ;;  %14042 = vmatprep.mubr.msk.f32.mxu0 %vm675_vm3, %v17888_v60  ;;  %v18196_v60 = vld [vmem:[#allocation2 + $0xf1] sm:$0xff] }
 0x231   : > { %14586 = vmatprep.mubr.msk.f32.mxu1 %vm675_vm3, %v18078_v20 }
 0x233   : > { %14043 = vmatmul.mubr.msk.f32.gmra.mrb[62].mxu0 %vm675_vm3, %v17894_v10  ;;  %v18208_v10 = vld [vmem:[#allocation2 + $0x109] sm:$0xff] }
 0x234   : > { %14587 = vmatmul.mubr.msk.f32.gmra.mrb[26].mxu1 %vm675_vm3, %v18084_v23  ;;  %14047 = vmatprep.mubr.msk.f32.mxu0 %vm675_vm3, %v3899_v0  ;;  %v18392_v0 = vld [vmem:[#allocation2 + $0xfa] sm:$0xff] }
 0x235   : > { %14589 = vmatprep.mubr.msk.f32.mxu1 %vm675_vm3, %v7798_v53  ;;  %v18404_v53 = vld [vmem:[#allocation2 + $0x112] sm:$0xff] }
 0x237   : > { %14048 = vmatmul.mubr.msk.f32.vlgmr.msra.gmra.mrb[32].mxu0 %vm675_vm3, %v3900_v14  ;;  %v18410_v14 = vld [vmem:[#allocation2 + $0x122] sm:$0xff] }
 0x238   : > { %14590 = vmatmul.mubr.msk.f32.gmra.mrb[28].mxu1 %vm675_vm3, %v7799_v52  ;;  %14050 = vmatprep.mubr.msk.f32.mxu0 %vm675_vm3, %v3901_v26  ;;  %v18422_v52 = vld [vmem:[#allocation2 + $0x13a] sm:$0xff]  ;;  %v18428_v26 = vld [vmem:[#allocation2 + $0x142] sm:$0xff] }
 0x239   : > { %14592 = vmatprep.mubr.msk.f32.mxu1 %vm675_vm3, %v7800_v34  ;;  %14096 = vmatpush3.msra.mxu0 %v17907_v44  ;;  %v18244_v44 = vld [vmem:[#allocation2 + $0x151] sm:$0xff] }
 0x23a   : > { %14145 = vmatprep.subr.mxu0 %v18097_v41  ;;  %v18416_v34 = vld [vmem:[#allocation2 + $0x12a] sm:$0xff] }
 0x23b   : > { %14051 = vmatmul.mubr.msk.f32.gmra.mrb[34].mxu0 %vm675_vm3, %v3902_v29  ;;  %v18446_v29 = vld [vmem:[#allocation2 + $0x16a] sm:$0xff] }
 0x23c   : > { %14593 = vmatmul.mubr.msk.f32.gmra.mrb[30].mxu1 %vm675_vm3, %v7801_v48  ;;  %14053 = vmatprep.mubr.msk.f32.mxu0 %vm675_vm3, %v17915_v3  ;;  %v18262_v3 = vld [vmem:[#allocation2 + $0x171] sm:$0xff]  ;;  %v18440_v48 = vld [vmem:[#allocation2 + $0x15a] sm:$0xff] }
 0x23d   : > { %14597 = vmatprep.mubr.msk.f32.mxu1 %vm675_vm3, %v18105_v35 }
 0x23f   : > { %14054 = vmatmul.mubr.msk.f32.gmra.mrb[36].mxu0 %vm675_vm3, %v17921_v18  ;;  %v18268_v18 = vld [vmem:[#allocation2 + $0x181] sm:$0xff] }
 0x240   : > { %14598 = vmatmul.mubr.msk.f32.vlgmr.msra.gmra.mrb[0].mxu1 %vm675_vm3, %v18111_v9  ;;  %14056 = vmatprep.mubr.msk.f32.mxu0 %vm675_vm3, %v17935_v2  ;;  %v18274_v2 = vld [vmem:[#allocation2 + $0x189] sm:$0xff] }
 0x241   : > { %14646 = vmatpush3.msra.mxu1 %v17926_v6  ;;  %14600 = vmatprep.mubr.msk.f32.mxu1 %vm675_vm3, %v18125_v56  ;;  %v4286_v6 = vld [vmem:[#allocation2 + $0x19] sm:$0xff] }
 0x242   : > { %14695 = vmatprep.subr.mxu1 %v18116_v39 }
 0x243   : > { %14057 = vmatmul.mubr.msk.f32.gmra.mrb[38].mxu0 %vm675_vm3, %v17940_v54  ;;  %v8185_v54 = vld [vmem:[#allocation2 + $0x199] sm:$0xff] }
 0x244   : > { %14601 = vmatmul.mubr.msk.f32.gmra.mrb[2].mxu1 %vm675_vm3, %v18130_v45  ;;  %14059 = vmatprep.mubr.msk.f32.mxu0 %vm675_vm3, %v17946_v7  ;;  %v4287_v7 = vld [vmem:[#allocation2 + $0x21] sm:$0xff] }
 0x245   : > { %14603 = vmatprep.mubr.msk.f32.mxu1 %vm675_vm3, %v18136_v47 }
 0x247   : > { %14060 = vmatmul.mubr.msk.f32.gmra.mrb[40].mxu0 %vm675_vm3, %v17952_v43  ;;  %v8187_v43 = vld [vmem:[#allocation2 + $0x1b1] sm:$0xff] }
 0x248   : > { %14604 = vmatmul.mubr.msk.f32.gmra.mrb[4].mxu1 %vm675_vm3, %v18142_v4  ;;  %14062 = vmatprep.mubr.msk.f32.mxu0 %vm675_vm3, %v17958_v61  ;;  %v8186_v61 = vld [vmem:[#allocation2 + $0x1a1] sm:$0xff] }
 0x249   : > { %14606 = vmatprep.mubr.msk.f32.mxu1 %vm675_vm3, %v18148_v11 }
 0x24b   : > { %14063 = vmatmul.mubr.msk.f32.gmra.mrb[42].mxu0 %vm675_vm3, %v17964_v57  ;;  %v4288_v57 = vld [vmem:[#allocation2 + $0x31] sm:$0xff] }
 0x24c   : > { %14607 = vmatmul.mubr.msk.f32.gmra.mrb[6].mxu1 %vm675_vm3, %v18154_v25  ;;  %14065 = vmatprep.mubr.msk.f32.mxu0 %vm675_vm3, %v17970_v27  ;;  %v18287_v27 = vld [vmem:[%s19536_s5 + $0x40] sm:$0xff] }
 0x24d   : > { %14609 = vmatprep.mubr.msk.f32.mxu1 %vm675_vm3, %v18160_v58 }
 0x24f   : > { %14066 = vmatmul.mubr.msk.f32.gmra.mrb[44].mxu0 %vm675_vm3, %v17976_v51  ;;  %v8188_v51 = vld [vmem:[#allocation2 + $0x1b9] sm:$0xff] }
 0x250   : > { %14610 = vmatmul.mubr.msk.f32.gmra.mrb[8].mxu1 %vm675_vm3, %v18166_v33  ;;  %14068 = vmatprep.mubr.msk.f32.mxu0 %vm675_vm3, %v17982_v1  ;;  %v4289_v1 = vld [vmem:[#allocation2 + $0x39] sm:$0xff] }
 0x251   : > { %14612 = vmatprep.mubr.msk.f32.mxu1 %vm675_vm3, %v18172_v42 }
 0x253   : > { %14069 = vmatmul.mubr.msk.f32.gmra.mrb[46].mxu0 %vm675_vm3, %v17988_v49  ;;  %v18295_v49 = vld [vmem:[#allocation2 + $0x4a] sm:$0xff] }
 0x254   : > { %14613 = vmatmul.mubr.msk.f32.gmra.mrb[10].mxu1 %vm675_vm3, %v18178_v36  ;;  %14071 = vmatprep.mubr.msk.f32.mxu0 %vm675_vm3, %v17994_v28  ;;  %v18301_v28 = vld [vmem:[#allocation2 + $0x52] sm:$0xff] }
 0x255   : > { %14615 = vmatprep.mubr.msk.f32.mxu1 %vm675_vm3, %v18184_v24 }
 0x257   : > { %14072 = vmatmul.mubr.msk.f32.gmra.mrb[48].mxu0 %vm675_vm3, %v18000_v37  ;;  %v18306_v37 = vld [vmem:[%s19536_s5 + $0x98] sm:$0xff] }
 0x258   : > { %14616 = vmatmul.mubr.msk.f32.gmra.mrb[12].mxu1 %vm675_vm3, %v18190_v63  ;;  %14074 = vmatprep.mubr.msk.f32.mxu0 %vm675_vm3, %v18006_v19  ;;  %v18315_v19 = vld [vmem:[#allocation2 + $0x62] sm:$0xff] }
 0x259   : > { %14618 = vmatprep.mubr.msk.f32.mxu1 %vm675_vm3, %v18196_v60 }
 0x25b   : > { %14075 = vmatmul.mubr.msk.f32.gmra.mrb[50].mxu0 %vm675_vm3, %v18012_v16  ;;  %v18320_v16 = vld [vmem:[#allocation2 + $0x6a] sm:$0xff] }
 0x25c   : > { %14619 = vmatmul.mubr.msk.f32.gmra.mrb[14].mxu1 %vm675_vm3, %v18202_v38  ;;  %14077 = vmatprep.mubr.msk.f32.mxu0 %vm675_vm3, %v18018_v30  ;;  %v18326_v30 = vld [vmem:[#allocation2 + $0x7a] sm:$0xff] }
 0x25d   : > { %14621 = vmatprep.mubr.msk.f32.mxu1 %vm675_vm3, %v18208_v10 }
 0x25f   : > { %14078 = vmatmul.mubr.msk.f32.gmra.mrb[52].mxu0 %vm675_vm3, %v18024_v59  ;;  %v18332_v59 = vld [vmem:[#allocation2 + $0x82] sm:$0xff] }
 0x260   : > { %14622 = vmatmul.mubr.msk.f32.gmra.mrb[16].mxu1 %vm675_vm3, %v18214_v32  ;;  %14080 = vmatprep.mubr.msk.f32.mxu0 %vm675_vm3, %v18030_v21  ;;  %v18338_v21 = vld [vmem:[#allocation2 + $0x92] sm:$0xff] }
 0x261   : > { %14624 = vmatprep.mubr.msk.f32.mxu1 %vm675_vm3, %v18220_v50 }
 0x263   : > { %14081 = vmatmul.mubr.msk.f32.gmra.mrb[54].mxu0 %vm675_vm3, %v18036_v31  ;;  %v18344_v31 = vld [vmem:[#allocation2 + $0x9a] sm:$0xff] }
 0x264   : > { %14625 = vmatmul.mubr.msk.f32.gmra.mrb[18].mxu1 %vm675_vm3, %v18226_v62  ;;  %14083 = vmatprep.mubr.msk.f32.mxu0 %vm675_vm3, %v18042_v8  ;;  %v18350_v8 = vld [vmem:[#allocation2 + $0xaa] sm:$0xff] }
 0x265   : > { %14627 = vmatprep.mubr.msk.f32.mxu1 %vm675_vm3, %v18232_v13 }
 0x267   : > { %14084 = vmatmul.mubr.msk.f32.gmra.mrb[56].mxu0 %vm675_vm3, %v18048_v55  ;;  %v18356_v55 = vld [vmem:[#allocation2 + $0xb2] sm:$0xff] }
 0x268   : > { %14628 = vmatmul.mubr.msk.f32.gmra.mrb[20].mxu1 %vm675_vm3, %v18238_v40  ;;  %14086 = vmatprep.mubr.msk.f32.mxu0 %vm675_vm3, %v18054_v5  ;;  %v18362_v5 = vld [vmem:[#allocation2 + $0xc2] sm:$0xff] }
 0x269   : > { %14630 = vmatprep.mubr.msk.f32.mxu1 %vm675_vm3, %v18244_v44 }
 0x26b   : > { %14087 = vmatmul.mubr.msk.f32.gmra.mrb[58].mxu0 %vm675_vm3, %v18060_v15  ;;  %v18368_v15 = vld [vmem:[#allocation2 + $0xca] sm:$0xff] }
 0x26c   : > { %14631 = vmatmul.mubr.msk.f32.gmra.mrb[22].mxu1 %vm675_vm3, %v18250_v12  ;;  %14089 = vmatprep.mubr.msk.f32.mxu0 %vm675_vm3, %v18066_v22  ;;  %v18374_v22 = vld [vmem:[#allocation2 + $0xda] sm:$0xff] }
 0x26d   : > { %14633 = vmatprep.mubr.msk.f32.mxu1 %vm675_vm3, %v18256_v17 }
 0x26f   : > { %14090 = vmatmul.mubr.msk.f32.gmra.mrb[60].mxu0 %vm675_vm3, %v18072_v46  ;;  %v18380_v46 = vld [vmem:[#allocation2 + $0xe2] sm:$0xff] }
 0x270   : > { %14634 = vmatmul.mubr.msk.f32.gmra.mrb[24].mxu1 %vm675_vm3, %v18262_v3  ;;  %14092 = vmatprep.mubr.msk.f32.mxu0 %vm675_vm3, %v18078_v20  ;;  %v18386_v20 = vld [vmem:[#allocation2 + $0xf2] sm:$0xff] }
 0x271   : > { %14636 = vmatprep.mubr.msk.f32.mxu1 %vm675_vm3, %v18268_v18 }
 0x273   : > { %14093 = vmatmul.mubr.msk.f32.gmra.mrb[62].mxu0 %vm675_vm3, %v18084_v23  ;;  %v18398_v23 = vld [vmem:[#allocation2 + $0x10a] sm:$0xff] }
 0x274   : > { %14637 = vmatmul.mubr.msk.f32.gmra.mrb[26].mxu1 %vm675_vm3, %v18274_v2  ;;  %14097 = vmatprep.mubr.msk.f32.mxu0 %vm675_vm3, %v4286_v6  ;;  %v18582_v6 = vld [vmem:[#allocation2 + $0xfb] sm:$0xff] }
 0x275   : > { %14639 = vmatprep.mubr.msk.f32.mxu1 %vm675_vm3, %v8185_v54  ;;  %v18594_v54 = vld [vmem:[#allocation2 + $0x113] sm:$0xff] }
 0x277   : > { %14098 = vmatmul.mubr.msk.f32.vlgmr.msra.gmra.mrb[32].mxu0 %vm675_vm3, %v4287_v7  ;;  %v18600_v7 = vld [vmem:[#allocation2 + $0x123] sm:$0xff] }
 0x278   : > { %14640 = vmatmul.mubr.msk.f32.gmra.mrb[28].mxu1 %vm675_vm3, %v8186_v61  ;;  %14100 = vmatprep.mubr.msk.f32.mxu0 %vm675_vm3, %v4288_v57  ;;  %v18612_v61 = vld [vmem:[#allocation2 + $0x13b] sm:$0xff]  ;;  %v18618_v57 = vld [vmem:[#allocation2 + $0x143] sm:$0xff] }
 0x279   : > { %14642 = vmatprep.mubr.msk.f32.mxu1 %vm675_vm3, %v8187_v43  ;;  %14146 = vmatpush3.msra.mxu0 %v18097_v41  ;;  %v18434_v41 = vld [vmem:[#allocation2 + $0x152] sm:$0xff] }
 0x27a   : > { %14195 = vmatprep.subr.mxu0 %v18287_v27  ;;  %v18606_v43 = vld [vmem:[#allocation2 + $0x12b] sm:$0xff] }
 0x27b   : > { %14101 = vmatmul.mubr.msk.f32.gmra.mrb[34].mxu0 %vm675_vm3, %v4289_v1  ;;  %v18636_v1 = vld [vmem:[#allocation2 + $0x16b] sm:$0xff] }
 0x27c   : > { %14643 = vmatmul.mubr.msk.f32.gmra.mrb[30].mxu1 %vm675_vm3, %v8188_v51  ;;  %14103 = vmatprep.mubr.msk.f32.mxu0 %vm675_vm3, %v18105_v35  ;;  %v18452_v35 = vld [vmem:[#allocation2 + $0x172] sm:$0xff]  ;;  %v18630_v51 = vld [vmem:[#allocation2 + $0x15b] sm:$0xff] }
 0x27d   : > { %14647 = vmatprep.mubr.msk.f32.mxu1 %vm675_vm3, %v18295_v49 }
 0x27f   : > { %14104 = vmatmul.mubr.msk.f32.gmra.mrb[36].mxu0 %vm675_vm3, %v18111_v9  ;;  %v18458_v9 = vld [vmem:[#allocation2 + $0x182] sm:$0xff] }
 0x280   : > { %14648 = vmatmul.mubr.msk.f32.vlgmr.msra.gmra.mrb[0].mxu1 %vm675_vm3, %v18301_v28  ;;  %14106 = vmatprep.mubr.msk.f32.mxu0 %vm675_vm3, %v18125_v56  ;;  %v18464_v56 = vld [vmem:[#allocation2 + $0x18a] sm:$0xff] }
 0x281   : > { %14696 = vmatpush3.msra.mxu1 %v18116_v39  ;;  %14650 = vmatprep.mubr.msk.f32.mxu1 %vm675_vm3, %v18315_v19  ;;  %v4673_v39 = vld [vmem:[#allocation2 + $0x1a] sm:$0xff] }
 0x282   : > { %14745 = vmatprep.subr.mxu1 %v18306_v37 }
 0x283   : > { %14107 = vmatmul.mubr.msk.f32.gmra.mrb[38].mxu0 %vm675_vm3, %v18130_v45  ;;  %v8572_v45 = vld [vmem:[#allocation2 + $0x19a] sm:$0xff] }
 0x284   : > { %14651 = vmatmul.mubr.msk.f32.gmra.mrb[2].mxu1 %vm675_vm3, %v18320_v16  ;;  %14109 = vmatprep.mubr.msk.f32.mxu0 %vm675_vm3, %v18136_v47  ;;  %v4674_v47 = vld [vmem:[#allocation2 + $0x22] sm:$0xff] }
 0x285   : > { %14653 = vmatprep.mubr.msk.f32.mxu1 %vm675_vm3, %v18326_v30 }
 0x287   : > { %14110 = vmatmul.mubr.msk.f32.gmra.mrb[40].mxu0 %vm675_vm3, %v18142_v4  ;;  %v8574_v4 = vld [vmem:[#allocation2 + $0x1b2] sm:$0xff] }
 0x288   : > { %14654 = vmatmul.mubr.msk.f32.gmra.mrb[4].mxu1 %vm675_vm3, %v18332_v59  ;;  %14112 = vmatprep.mubr.msk.f32.mxu0 %vm675_vm3, %v18148_v11  ;;  %v8573_v11 = vld [vmem:[#allocation2 + $0x1a2] sm:$0xff] }
 0x289   : > { %14656 = vmatprep.mubr.msk.f32.mxu1 %vm675_vm3, %v18338_v21 }
 0x28b   : > { %14113 = vmatmul.mubr.msk.f32.gmra.mrb[42].mxu0 %vm675_vm3, %v18154_v25  ;;  %v4675_v25 = vld [vmem:[#allocation2 + $0x32] sm:$0xff] }
 0x28c   : > { %14657 = vmatmul.mubr.msk.f32.gmra.mrb[6].mxu1 %vm675_vm3, %v18344_v31  ;;  %14115 = vmatprep.mubr.msk.f32.mxu0 %vm675_vm3, %v18160_v58  ;;  %v18477_v58 = vld [vmem:[%s19536_s5 + $0x48] sm:$0xff] }
 0x28d   : > { %14659 = vmatprep.mubr.msk.f32.mxu1 %vm675_vm3, %v18350_v8 }
 0x28f   : > { %14116 = vmatmul.mubr.msk.f32.gmra.mrb[44].mxu0 %vm675_vm3, %v18166_v33  ;;  %v8575_v33 = vld [vmem:[#allocation2 + $0x1ba] sm:$0xff] }
 0x290   : > { %14660 = vmatmul.mubr.msk.f32.gmra.mrb[8].mxu1 %vm675_vm3, %v18356_v55  ;;  %14118 = vmatprep.mubr.msk.f32.mxu0 %vm675_vm3, %v18172_v42  ;;  %v4676_v42 = vld [vmem:[#allocation2 + $0x3a] sm:$0xff] }
 0x291   : > { %14662 = vmatprep.mubr.msk.f32.mxu1 %vm675_vm3, %v18362_v5 }
 0x293   : > { %14119 = vmatmul.mubr.msk.f32.gmra.mrb[46].mxu0 %vm675_vm3, %v18178_v36  ;;  %v18485_v36 = vld [vmem:[#allocation2 + $0x4b] sm:$0xff] }
 0x294   : > { %14663 = vmatmul.mubr.msk.f32.gmra.mrb[10].mxu1 %vm675_vm3, %v18368_v15  ;;  %14121 = vmatprep.mubr.msk.f32.mxu0 %vm675_vm3, %v18184_v24  ;;  %v18491_v24 = vld [vmem:[#allocation2 + $0x53] sm:$0xff] }
 0x295   : > { %14665 = vmatprep.mubr.msk.f32.mxu1 %vm675_vm3, %v18374_v22 }
 0x297   : > { %14122 = vmatmul.mubr.msk.f32.gmra.mrb[48].mxu0 %vm675_vm3, %v18190_v63  ;;  %v18496_v63 = vld [vmem:[%s19536_s5 + $0xa0] sm:$0xff] }
 0x298   : > { %14666 = vmatmul.mubr.msk.f32.gmra.mrb[12].mxu1 %vm675_vm3, %v18380_v46  ;;  %14124 = vmatprep.mubr.msk.f32.mxu0 %vm675_vm3, %v18196_v60  ;;  %v18505_v60 = vld [vmem:[#allocation2 + $0x63] sm:$0xff] }
 0x299   : > { %14668 = vmatprep.mubr.msk.f32.mxu1 %vm675_vm3, %v18386_v20 }
 0x29b   : > { %14125 = vmatmul.mubr.msk.f32.gmra.mrb[50].mxu0 %vm675_vm3, %v18202_v38  ;;  %v18510_v38 = vld [vmem:[#allocation2 + $0x6b] sm:$0xff] }
 0x29c   : > { %14669 = vmatmul.mubr.msk.f32.gmra.mrb[14].mxu1 %vm675_vm3, %v18392_v0  ;;  %14127 = vmatprep.mubr.msk.f32.mxu0 %vm675_vm3, %v18208_v10  ;;  %v18516_v10 = vld [vmem:[#allocation2 + $0x7b] sm:$0xff] }
 0x29d   : > { %14671 = vmatprep.mubr.msk.f32.mxu1 %vm675_vm3, %v18398_v23 }
 0x29f   : > { %14128 = vmatmul.mubr.msk.f32.gmra.mrb[52].mxu0 %vm675_vm3, %v18214_v32  ;;  %v18522_v32 = vld [vmem:[#allocation2 + $0x83] sm:$0xff] }
 0x2a0   : > { %14672 = vmatmul.mubr.msk.f32.gmra.mrb[16].mxu1 %vm675_vm3, %v18404_v53  ;;  %14130 = vmatprep.mubr.msk.f32.mxu0 %vm675_vm3, %v18220_v50  ;;  %v18528_v50 = vld [vmem:[#allocation2 + $0x93] sm:$0xff] }
 0x2a1   : > { %14674 = vmatprep.mubr.msk.f32.mxu1 %vm675_vm3, %v18410_v14 }
 0x2a3   : > { %14131 = vmatmul.mubr.msk.f32.gmra.mrb[54].mxu0 %vm675_vm3, %v18226_v62  ;;  %v18534_v62 = vld [vmem:[#allocation2 + $0x9b] sm:$0xff] }
 0x2a4   : > { %14675 = vmatmul.mubr.msk.f32.gmra.mrb[18].mxu1 %vm675_vm3, %v18416_v34  ;;  %14133 = vmatprep.mubr.msk.f32.mxu0 %vm675_vm3, %v18232_v13  ;;  %v18540_v13 = vld [vmem:[#allocation2 + $0xab] sm:$0xff] }
 0x2a5   : > { %14677 = vmatprep.mubr.msk.f32.mxu1 %vm675_vm3, %v18422_v52 }
 0x2a7   : > { %14134 = vmatmul.mubr.msk.f32.gmra.mrb[56].mxu0 %vm675_vm3, %v18238_v40  ;;  %v18546_v40 = vld [vmem:[#allocation2 + $0xb3] sm:$0xff] }
 0x2a8   : > { %14678 = vmatmul.mubr.msk.f32.gmra.mrb[20].mxu1 %vm675_vm3, %v18428_v26  ;;  %14136 = vmatprep.mubr.msk.f32.mxu0 %vm675_vm3, %v18244_v44  ;;  %v18552_v44 = vld [vmem:[#allocation2 + $0xc3] sm:$0xff] }
 0x2a9   : > { %14680 = vmatprep.mubr.msk.f32.mxu1 %vm675_vm3, %v18434_v41 }
 0x2ab   : > { %14137 = vmatmul.mubr.msk.f32.gmra.mrb[58].mxu0 %vm675_vm3, %v18250_v12  ;;  %v18558_v12 = vld [vmem:[#allocation2 + $0xcb] sm:$0xff] }
 0x2ac   : > { %14681 = vmatmul.mubr.msk.f32.gmra.mrb[22].mxu1 %vm675_vm3, %v18440_v48  ;;  %14139 = vmatprep.mubr.msk.f32.mxu0 %vm675_vm3, %v18256_v17  ;;  %v18564_v17 = vld [vmem:[#allocation2 + $0xdb] sm:$0xff] }
 0x2ad   : > { %14683 = vmatprep.mubr.msk.f32.mxu1 %vm675_vm3, %v18446_v29 }
 0x2af   : > { %14140 = vmatmul.mubr.msk.f32.gmra.mrb[60].mxu0 %vm675_vm3, %v18262_v3  ;;  %v18570_v3 = vld [vmem:[#allocation2 + $0xe3] sm:$0xff] }
 0x2b0   : > { %14684 = vmatmul.mubr.msk.f32.gmra.mrb[24].mxu1 %vm675_vm3, %v18452_v35  ;;  %14142 = vmatprep.mubr.msk.f32.mxu0 %vm675_vm3, %v18268_v18  ;;  %v18576_v18 = vld [vmem:[#allocation2 + $0xf3] sm:$0xff] }
 0x2b1   : > { %14686 = vmatprep.mubr.msk.f32.mxu1 %vm675_vm3, %v18458_v9 }
 0x2b3   : > { %14143 = vmatmul.mubr.msk.f32.gmra.mrb[62].mxu0 %vm675_vm3, %v18274_v2  ;;  %v18588_v2 = vld [vmem:[#allocation2 + $0x10b] sm:$0xff] }
 0x2b4   : > { %14687 = vmatmul.mubr.msk.f32.gmra.mrb[26].mxu1 %vm675_vm3, %v18464_v56  ;;  %14147 = vmatprep.mubr.msk.f32.mxu0 %vm675_vm3, %v4673_v39  ;;  %v18772_v39 = vld [vmem:[#allocation2 + $0xfc] sm:$0xff] }
 0x2b5   : > { %14689 = vmatprep.mubr.msk.f32.mxu1 %vm675_vm3, %v8572_v45  ;;  %v18784_v45 = vld [vmem:[#allocation2 + $0x114] sm:$0xff] }
 0x2b7   : > { %14148 = vmatmul.mubr.msk.f32.vlgmr.msra.gmra.mrb[32].mxu0 %vm675_vm3, %v4674_v47  ;;  %v18790_v47 = vld [vmem:[#allocation2 + $0x124] sm:$0xff] }
 0x2b8   : > { %14690 = vmatmul.mubr.msk.f32.gmra.mrb[28].mxu1 %vm675_vm3, %v8573_v11  ;;  %14150 = vmatprep.mubr.msk.f32.mxu0 %vm675_vm3, %v4675_v25  ;;  %v18802_v11 = vld [vmem:[#allocation2 + $0x13c] sm:$0xff]  ;;  %v18808_v25 = vld [vmem:[#allocation2 + $0x144] sm:$0xff] }
 0x2b9   : > { %14692 = vmatprep.mubr.msk.f32.mxu1 %vm675_vm3, %v8574_v4  ;;  %14196 = vmatpush3.msra.mxu0 %v18287_v27  ;;  %v18624_v27 = vld [vmem:[#allocation2 + $0x153] sm:$0xff] }
 0x2ba   : > { %14245 = vmatprep.subr.mxu0 %v18477_v58  ;;  %v18796_v4 = vld [vmem:[#allocation2 + $0x12c] sm:$0xff] }
 0x2bb   : > { %14151 = vmatmul.mubr.msk.f32.gmra.mrb[34].mxu0 %vm675_vm3, %v4676_v42  ;;  %v18826_v42 = vld [vmem:[#allocation2 + $0x16c] sm:$0xff] }
 0x2bc   : > { %14693 = vmatmul.mubr.msk.f32.gmra.mrb[30].mxu1 %vm675_vm3, %v8575_v33  ;;  %14153 = vmatprep.mubr.msk.f32.mxu0 %vm675_vm3, %v18295_v49  ;;  %v18642_v49 = vld [vmem:[#allocation2 + $0x173] sm:$0xff]  ;;  %v18820_v33 = vld [vmem:[#allocation2 + $0x15c] sm:$0xff] }
 0x2bd   : > { %14697 = vmatprep.mubr.msk.f32.mxu1 %vm675_vm3, %v18485_v36 }
 0x2bf   : > { %14154 = vmatmul.mubr.msk.f32.gmra.mrb[36].mxu0 %vm675_vm3, %v18301_v28  ;;  %v18648_v28 = vld [vmem:[#allocation2 + $0x183] sm:$0xff] }
 0x2c0   : > { %14698 = vmatmul.mubr.msk.f32.vlgmr.msra.gmra.mrb[0].mxu1 %vm675_vm3, %v18491_v24  ;;  %14156 = vmatprep.mubr.msk.f32.mxu0 %vm675_vm3, %v18315_v19  ;;  %v18654_v19 = vld [vmem:[#allocation2 + $0x18b] sm:$0xff] }
 0x2c1   : > { %14746 = vmatpush3.msra.mxu1 %v18306_v37  ;;  %14700 = vmatprep.mubr.msk.f32.mxu1 %vm675_vm3, %v18505_v60  ;;  %v5060_v37 = vld [vmem:[#allocation2 + $0x1b] sm:$0xff] }
 0x2c2   : > { %14795 = vmatprep.subr.mxu1 %v18496_v63 }
 0x2c3   : > { %14157 = vmatmul.mubr.msk.f32.gmra.mrb[38].mxu0 %vm675_vm3, %v18320_v16  ;;  %v8959_v16 = vld [vmem:[#allocation2 + $0x19b] sm:$0xff] }
 0x2c4   : > { %14701 = vmatmul.mubr.msk.f32.gmra.mrb[2].mxu1 %vm675_vm3, %v18510_v38  ;;  %14159 = vmatprep.mubr.msk.f32.mxu0 %vm675_vm3, %v18326_v30  ;;  %v5061_v30 = vld [vmem:[#allocation2 + $0x23] sm:$0xff] }
 0x2c5   : > { %14703 = vmatprep.mubr.msk.f32.mxu1 %vm675_vm3, %v18516_v10 }
 0x2c7   : > { %14160 = vmatmul.mubr.msk.f32.gmra.mrb[40].mxu0 %vm675_vm3, %v18332_v59  ;;  %v8961_v59 = vld [vmem:[#allocation2 + $0x1b3] sm:$0xff] }
 0x2c8   : > { %14704 = vmatmul.mubr.msk.f32.gmra.mrb[4].mxu1 %vm675_vm3, %v18522_v32  ;;  %14162 = vmatprep.mubr.msk.f32.mxu0 %vm675_vm3, %v18338_v21  ;;  %v8960_v21 = vld [vmem:[#allocation2 + $0x1a3] sm:$0xff] }
 0x2c9   : > { %14706 = vmatprep.mubr.msk.f32.mxu1 %vm675_vm3, %v18528_v50 }
 0x2cb   : > { %14163 = vmatmul.mubr.msk.f32.gmra.mrb[42].mxu0 %vm675_vm3, %v18344_v31  ;;  %v5062_v31 = vld [vmem:[#allocation2 + $0x33] sm:$0xff] }
 0x2cc   : > { %14707 = vmatmul.mubr.msk.f32.gmra.mrb[6].mxu1 %vm675_vm3, %v18534_v62  ;;  %14165 = vmatprep.mubr.msk.f32.mxu0 %vm675_vm3, %v18350_v8  ;;  %v18667_v8 = vld [vmem:[%s19536_s5 + $0x50] sm:$0xff] }
 0x2cd   : > { %14709 = vmatprep.mubr.msk.f32.mxu1 %vm675_vm3, %v18540_v13 }
 0x2cf   : > { %14166 = vmatmul.mubr.msk.f32.gmra.mrb[44].mxu0 %vm675_vm3, %v18356_v55  ;;  %v8962_v55 = vld [vmem:[#allocation2 + $0x1bb] sm:$0xff] }
 0x2d0   : > { %14710 = vmatmul.mubr.msk.f32.gmra.mrb[8].mxu1 %vm675_vm3, %v18546_v40  ;;  %14168 = vmatprep.mubr.msk.f32.mxu0 %vm675_vm3, %v18362_v5  ;;  %v5063_v5 = vld [vmem:[#allocation2 + $0x3b] sm:$0xff] }
 0x2d1   : > { %14712 = vmatprep.mubr.msk.f32.mxu1 %vm675_vm3, %v18552_v44 }
 0x2d3   : > { %14169 = vmatmul.mubr.msk.f32.gmra.mrb[46].mxu0 %vm675_vm3, %v18368_v15  ;;  %v18675_v15 = vld [vmem:[#allocation2 + $0x4c] sm:$0xff] }
 0x2d4   : > { %14713 = vmatmul.mubr.msk.f32.gmra.mrb[10].mxu1 %vm675_vm3, %v18558_v12  ;;  %14171 = vmatprep.mubr.msk.f32.mxu0 %vm675_vm3, %v18374_v22  ;;  %v18681_v22 = vld [vmem:[#allocation2 + $0x54] sm:$0xff] }
 0x2d5   : > { %14715 = vmatprep.mubr.msk.f32.mxu1 %vm675_vm3, %v18564_v17 }
 0x2d7   : > { %14172 = vmatmul.mubr.msk.f32.gmra.mrb[48].mxu0 %vm675_vm3, %v18380_v46  ;;  %v18686_v46 = vld [vmem:[%s19536_s5 + $0xa8] sm:$0xff] }
 0x2d8   : > { %14716 = vmatmul.mubr.msk.f32.gmra.mrb[12].mxu1 %vm675_vm3, %v18570_v3  ;;  %14174 = vmatprep.mubr.msk.f32.mxu0 %vm675_vm3, %v18386_v20  ;;  %v18695_v20 = vld [vmem:[#allocation2 + $0x64] sm:$0xff] }
 0x2d9   : > { %14718 = vmatprep.mubr.msk.f32.mxu1 %vm675_vm3, %v18576_v18 }
 0x2db   : > { %14175 = vmatmul.mubr.msk.f32.gmra.mrb[50].mxu0 %vm675_vm3, %v18392_v0  ;;  %v18700_v0 = vld [vmem:[#allocation2 + $0x6c] sm:$0xff] }
 0x2dc   : > { %14719 = vmatmul.mubr.msk.f32.gmra.mrb[14].mxu1 %vm675_vm3, %v18582_v6  ;;  %14177 = vmatprep.mubr.msk.f32.mxu0 %vm675_vm3, %v18398_v23  ;;  %v18706_v23 = vld [vmem:[#allocation2 + $0x7c] sm:$0xff] }
 0x2dd   : > { %14721 = vmatprep.mubr.msk.f32.mxu1 %vm675_vm3, %v18588_v2 }
 0x2df   : > { %14178 = vmatmul.mubr.msk.f32.gmra.mrb[52].mxu0 %vm675_vm3, %v18404_v53  ;;  %v18712_v53 = vld [vmem:[#allocation2 + $0x84] sm:$0xff] }
 0x2e0   : > { %14722 = vmatmul.mubr.msk.f32.gmra.mrb[16].mxu1 %vm675_vm3, %v18594_v54  ;;  %14180 = vmatprep.mubr.msk.f32.mxu0 %vm675_vm3, %v18410_v14  ;;  %v18718_v14 = vld [vmem:[#allocation2 + $0x94] sm:$0xff] }
 0x2e1   : > { %14724 = vmatprep.mubr.msk.f32.mxu1 %vm675_vm3, %v18600_v7 }
 0x2e3   : > { %14181 = vmatmul.mubr.msk.f32.gmra.mrb[54].mxu0 %vm675_vm3, %v18416_v34  ;;  %v18724_v34 = vld [vmem:[#allocation2 + $0x9c] sm:$0xff] }
 0x2e4   : > { %14725 = vmatmul.mubr.msk.f32.gmra.mrb[18].mxu1 %vm675_vm3, %v18606_v43  ;;  %14183 = vmatprep.mubr.msk.f32.mxu0 %vm675_vm3, %v18422_v52  ;;  %v18730_v52 = vld [vmem:[#allocation2 + $0xac] sm:$0xff] }
 0x2e5   : > { %14727 = vmatprep.mubr.msk.f32.mxu1 %vm675_vm3, %v18612_v61 }
 0x2e7   : > { %14184 = vmatmul.mubr.msk.f32.gmra.mrb[56].mxu0 %vm675_vm3, %v18428_v26  ;;  %v18736_v26 = vld [vmem:[#allocation2 + $0xb4] sm:$0xff] }
 0x2e8   : > { %14728 = vmatmul.mubr.msk.f32.gmra.mrb[20].mxu1 %vm675_vm3, %v18618_v57  ;;  %14186 = vmatprep.mubr.msk.f32.mxu0 %vm675_vm3, %v18434_v41  ;;  %v18742_v41 = vld [vmem:[#allocation2 + $0xc4] sm:$0xff] }
 0x2e9   : > { %14730 = vmatprep.mubr.msk.f32.mxu1 %vm675_vm3, %v18624_v27 }
 0x2eb   : > { %14187 = vmatmul.mubr.msk.f32.gmra.mrb[58].mxu0 %vm675_vm3, %v18440_v48  ;;  %v18748_v48 = vld [vmem:[#allocation2 + $0xcc] sm:$0xff] }
 0x2ec   : > { %14731 = vmatmul.mubr.msk.f32.gmra.mrb[22].mxu1 %vm675_vm3, %v18630_v51  ;;  %14189 = vmatprep.mubr.msk.f32.mxu0 %vm675_vm3, %v18446_v29  ;;  %v18754_v29 = vld [vmem:[#allocation2 + $0xdc] sm:$0xff] }
 0x2ed   : > { %14733 = vmatprep.mubr.msk.f32.mxu1 %vm675_vm3, %v18636_v1 }
 0x2ef   : > { %14190 = vmatmul.mubr.msk.f32.gmra.mrb[60].mxu0 %vm675_vm3, %v18452_v35  ;;  %v18760_v35 = vld [vmem:[#allocation2 + $0xe4] sm:$0xff] }
 0x2f0   : > { %14734 = vmatmul.mubr.msk.f32.gmra.mrb[24].mxu1 %vm675_vm3, %v18642_v49  ;;  %14192 = vmatprep.mubr.msk.f32.mxu0 %vm675_vm3, %v18458_v9  ;;  %v18766_v9 = vld [vmem:[#allocation2 + $0xf4] sm:$0xff] }
 0x2f1   : > { %14736 = vmatprep.mubr.msk.f32.mxu1 %vm675_vm3, %v18648_v28 }
 0x2f3   : > { %14193 = vmatmul.mubr.msk.f32.gmra.mrb[62].mxu0 %vm675_vm3, %v18464_v56  ;;  %v18778_v56 = vld [vmem:[#allocation2 + $0x10c] sm:$0xff] }
 0x2f4   : > { %14737 = vmatmul.mubr.msk.f32.gmra.mrb[26].mxu1 %vm675_vm3, %v18654_v19  ;;  %14197 = vmatprep.mubr.msk.f32.mxu0 %vm675_vm3, %v5060_v37  ;;  %v18974_v37 = vld [vmem:[#allocation2 + $0x120] sm:$0xff] }
 0x2f5   : > { %14739 = vmatprep.mubr.msk.f32.mxu1 %vm675_vm3, %v8959_v16  ;;  %v18986_v16 = vld [vmem:[#allocation2 + $0x138] sm:$0xff] }
 0x2f7   : > { %14198 = vmatmul.mubr.msk.f32.vlgmr.msra.gmra.mrb[32].mxu0 %vm675_vm3, %v5061_v30  ;;  %v18992_v30 = vld [vmem:[#allocation2 + $0x140] sm:$0xff] }
 0x2f8   : > { %14740 = vmatmul.mubr.msk.f32.gmra.mrb[28].mxu1 %vm675_vm3, %v8960_v21  ;;  %14200 = vmatprep.mubr.msk.f32.mxu0 %vm675_vm3, %v5062_v31  ;;  %v19004_v21 = vld [vmem:[#allocation2 + $0x158] sm:$0xff]  ;;  %v19010_v31 = vld [vmem:[#allocation2 + $0x168] sm:$0xff] }
 0x2f9   : > { %14742 = vmatprep.mubr.msk.f32.mxu1 %vm675_vm3, %v8961_v59  ;;  %14246 = vmatpush3.msra.mxu0 %v18477_v58  ;;  %v18814_v58 = vld [vmem:[#allocation2 + $0x154] sm:$0xff] }
 0x2fa   : > { %14295 = vmatprep.subr.mxu0 %v18667_v8  ;;  %v18998_v59 = vld [vmem:[#allocation2 + $0x150] sm:$0xff] }
 0x2fb   : > { %14201 = vmatmul.mubr.msk.f32.gmra.mrb[34].mxu0 %vm675_vm3, %v5063_v5  ;;  %v19028_v5 = vld [vmem:[#allocation2 + $0x188] sm:$0xff] }
 0x2fc   : > { %14743 = vmatmul.mubr.msk.f32.gmra.mrb[30].mxu1 %vm675_vm3, %v8962_v55  ;;  %14203 = vmatprep.mubr.msk.f32.mxu0 %vm675_vm3, %v18485_v36  ;;  %v18832_v36 = vld [vmem:[#allocation2 + $0x174] sm:$0xff]  ;;  %v19022_v55 = vld [vmem:[#allocation2 + $0x180] sm:$0xff] }
 0x2fd   : > { %14747 = vmatprep.mubr.msk.f32.mxu1 %vm675_vm3, %v18675_v15 }
 0x2ff   : > { %14204 = vmatmul.mubr.msk.f32.gmra.mrb[36].mxu0 %vm675_vm3, %v18491_v24  ;;  %v18838_v24 = vld [vmem:[#allocation2 + $0x184] sm:$0xff] }
 0x300   : > { %14748 = vmatmul.mubr.msk.f32.vlgmr.msra.gmra.mrb[0].mxu1 %vm675_vm3, %v18681_v22  ;;  %14206 = vmatprep.mubr.msk.f32.mxu0 %vm675_vm3, %v18505_v60  ;;  %v18844_v60 = vld [vmem:[#allocation2 + $0x18c] sm:$0xff] }
 0x301   : > { %14796 = vmatpush3.msra.mxu1 %v18496_v63  ;;  %14750 = vmatprep.mubr.msk.f32.mxu1 %vm675_vm3, %v18695_v20  ;;  %v5447_v63 = vld [vmem:[#allocation2 + $0x1c] sm:$0xff] }
 0x302   : > { %14845 = vmatprep.subr.mxu1 %v18686_v46 }
 0x303   : > { %14207 = vmatmul.mubr.msk.f32.gmra.mrb[38].mxu0 %vm675_vm3, %v18510_v38  ;;  %v18850_v38 = vld [vmem:[#allocation2 + $0x19c] sm:$0xff] }
 0x304   : > { %14751 = vmatmul.mubr.msk.f32.gmra.mrb[2].mxu1 %vm675_vm3, %v18700_v0  ;;  %14209 = vmatprep.mubr.msk.f32.mxu0 %vm675_vm3, %v18516_v10  ;;  %v5448_v10 = vld [vmem:[#allocation2 + $0x24] sm:$0xff] }
 0x305   : > { %14753 = vmatprep.mubr.msk.f32.mxu1 %vm675_vm3, %v18706_v23 }
 0x307   : > { %14210 = vmatmul.mubr.msk.f32.gmra.mrb[40].mxu0 %vm675_vm3, %v18522_v32  ;;  %v18855_v32 = vld [vmem:[#allocation2 + $0x1b4] sm:$0xff] }
 0x308   : > { %14754 = vmatmul.mubr.msk.f32.gmra.mrb[4].mxu1 %vm675_vm3, %v18712_v53  ;;  %14212 = vmatprep.mubr.msk.f32.mxu0 %vm675_vm3, %v18528_v50  ;;  %19568 = vst [vmem:[#allocation7_spill] sm:$0xff] %v18855_v32  ;;  %v18857_v50 = vld [vmem:[#allocation2 + $0x1a4] sm:$0xff] }
 0x309   : > { %14756 = vmatprep.mubr.msk.f32.mxu1 %vm675_vm3, %v18718_v14  ;;  %19569 = vst [vmem:[#allocation8_spill] sm:$0xff] %v18857_v50 }
 0x30b   : > { %14213 = vmatmul.mubr.msk.f32.gmra.mrb[42].mxu0 %vm675_vm3, %v18534_v62  ;;  %v5449_v62 = vld [vmem:[#allocation2 + $0x34] sm:$0xff] }
 0x30c   : > { %14757 = vmatmul.mubr.msk.f32.gmra.mrb[6].mxu1 %vm675_vm3, %v18724_v34  ;;  %14215 = vmatprep.mubr.msk.f32.mxu0 %vm675_vm3, %v18540_v13  ;;  %v18865_v13 = vld [vmem:[#allocation2 + $0x1bc] sm:$0xff] }
 0x30d   : > { %14759 = vmatprep.mubr.msk.f32.mxu1 %vm675_vm3, %v18730_v52  ;;  %19570 = vst [vmem:[#allocation9_spill] sm:$0xff] %v18865_v13 }
 0x30f   : > { %14216 = vmatmul.mubr.msk.f32.gmra.mrb[44].mxu0 %vm675_vm3, %v18546_v40  ;;  %v5450_v40 = vld [vmem:[#allocation2 + $0x3c] sm:$0xff] }
 0x310   : > { %14760 = vmatmul.mubr.msk.f32.gmra.mrb[8].mxu1 %vm675_vm3, %v18736_v26  ;;  %14218 = vmatprep.mubr.msk.f32.mxu0 %vm675_vm3, %v18552_v44  ;;  %v18871_v44 = vld [vmem:[#allocation2 + $0x60] sm:$0xff] }
 0x311   : > { %14762 = vmatprep.mubr.msk.f32.mxu1 %vm675_vm3, %v18742_v41 }
 0x313   : > { %14219 = vmatmul.mubr.msk.f32.gmra.mrb[46].mxu0 %vm675_vm3, %v18558_v12  ;;  %v18877_v12 = vld [vmem:[#allocation2 + $0x68] sm:$0xff] }
 0x314   : > { %14763 = vmatmul.mubr.msk.f32.gmra.mrb[10].mxu1 %vm675_vm3, %v18748_v48  ;;  %14221 = vmatprep.mubr.msk.f32.mxu0 %vm675_vm3, %v18564_v17  ;;  %v18882_v17 = vld [vmem:[%s19536_s5 + $0xb0] sm:$0xff] }
 0x315   : > { %14765 = vmatprep.mubr.msk.f32.mxu1 %vm675_vm3, %v18754_v29 }
 0x317   : > { %14222 = vmatmul.mubr.msk.f32.gmra.mrb[48].mxu0 %vm675_vm3, %v18570_v3  ;;  %v18891_v3 = vld [vmem:[#allocation2 + $0x78] sm:$0xff] }
 0x318   : > { %14766 = vmatmul.mubr.msk.f32.gmra.mrb[12].mxu1 %vm675_vm3, %v18760_v35  ;;  %14224 = vmatprep.mubr.msk.f32.mxu0 %vm675_vm3, %v18576_v18  ;;  %v18896_v18 = vld [vmem:[#allocation2 + $0x80] sm:$0xff] }
 0x319   : > { %14768 = vmatprep.mubr.msk.f32.mxu1 %vm675_vm3, %v18766_v9 }
 0x31b   : > { %14225 = vmatmul.mubr.msk.f32.gmra.mrb[50].mxu0 %vm675_vm3, %v18582_v6  ;;  %v18902_v6 = vld [vmem:[#allocation2 + $0x90] sm:$0xff] }
 0x31c   : > { %14769 = vmatmul.mubr.msk.f32.gmra.mrb[14].mxu1 %vm675_vm3, %v18772_v39  ;;  %14227 = vmatprep.mubr.msk.f32.mxu0 %vm675_vm3, %v18588_v2  ;;  %v18908_v2 = vld [vmem:[#allocation2 + $0x98] sm:$0xff] }
 0x31d   : > { %14771 = vmatprep.mubr.msk.f32.mxu1 %vm675_vm3, %v18778_v56 }
 0x31f   : > { %14228 = vmatmul.mubr.msk.f32.gmra.mrb[52].mxu0 %vm675_vm3, %v18594_v54  ;;  %v18914_v54 = vld [vmem:[#allocation2 + $0xa8] sm:$0xff] }
 0x320   : > { %14772 = vmatmul.mubr.msk.f32.gmra.mrb[16].mxu1 %vm675_vm3, %v18784_v45  ;;  %14230 = vmatprep.mubr.msk.f32.mxu0 %vm675_vm3, %v18600_v7  ;;  %v18920_v7 = vld [vmem:[#allocation2 + $0xb0] sm:$0xff] }
 0x321   : > { %14774 = vmatprep.mubr.msk.f32.mxu1 %vm675_vm3, %v18790_v47 }
 0x323   : > { %14231 = vmatmul.mubr.msk.f32.gmra.mrb[54].mxu0 %vm675_vm3, %v18606_v43  ;;  %v18926_v43 = vld [vmem:[#allocation2 + $0xc0] sm:$0xff] }
 0x324   : > { %14775 = vmatmul.mubr.msk.f32.gmra.mrb[18].mxu1 %vm675_vm3, %v18796_v4  ;;  %14233 = vmatprep.mubr.msk.f32.mxu0 %vm675_vm3, %v18612_v61  ;;  %v18932_v61 = vld [vmem:[#allocation2 + $0xc8] sm:$0xff] }
 0x325   : > { %14777 = vmatprep.mubr.msk.f32.mxu1 %vm675_vm3, %v18802_v11 }
 0x327   : > { %14234 = vmatmul.mubr.msk.f32.gmra.mrb[56].mxu0 %vm675_vm3, %v18618_v57  ;;  %v18938_v57 = vld [vmem:[#allocation2 + $0xd8] sm:$0xff] }
 0x328   : > { %14778 = vmatmul.mubr.msk.f32.gmra.mrb[20].mxu1 %vm675_vm3, %v18808_v25  ;;  %14236 = vmatprep.mubr.msk.f32.mxu0 %vm675_vm3, %v18624_v27  ;;  %v18944_v27 = vld [vmem:[#allocation2 + $0xe0] sm:$0xff] }
 0x329   : > { %14780 = vmatprep.mubr.msk.f32.mxu1 %vm675_vm3, %v18814_v58 }
 0x32b   : > { %14237 = vmatmul.mubr.msk.f32.gmra.mrb[58].mxu0 %vm675_vm3, %v18630_v51  ;;  %v18950_v51 = vld [vmem:[#allocation2 + $0xf0] sm:$0xff] }
 0x32c   : > { %14781 = vmatmul.mubr.msk.f32.gmra.mrb[22].mxu1 %vm675_vm3, %v18820_v33  ;;  %14239 = vmatprep.mubr.msk.f32.mxu0 %vm675_vm3, %v18636_v1  ;;  %v18956_v1 = vld [vmem:[#allocation2 + $0xf8] sm:$0xff] }
 0x32d   : > { %14783 = vmatprep.mubr.msk.f32.mxu1 %vm675_vm3, %v18826_v42 }
 0x32f   : > { %14240 = vmatmul.mubr.msk.f32.gmra.mrb[60].mxu0 %vm675_vm3, %v18642_v49  ;;  %v18962_v49 = vld [vmem:[#allocation2 + $0x108] sm:$0xff] }
 0x330   : > { %14784 = vmatmul.mubr.msk.f32.gmra.mrb[24].mxu1 %vm675_vm3, %v18832_v36  ;;  %14242 = vmatprep.mubr.msk.f32.mxu0 %vm675_vm3, %v18648_v28  ;;  %v18968_v28 = vld [vmem:[#allocation2 + $0x110] sm:$0xff] }
 0x331   : > { %14786 = vmatprep.mubr.msk.f32.mxu1 %vm675_vm3, %v18838_v24 }
 0x333   : > { %14243 = vmatmul.mubr.msk.f32.gmra.mrb[62].mxu0 %vm675_vm3, %v18654_v19  ;;  %v18980_v19 = vld [vmem:[#allocation2 + $0x128] sm:$0xff] }
 0x334   : > { %14787 = vmatmul.mubr.msk.f32.gmra.mrb[26].mxu1 %vm675_vm3, %v18844_v60  ;;  %14247 = vmatprep.mubr.msk.f32.mxu0 %vm675_vm3, %v5447_v63  ;;  %v5834_v63 = vld [vmem:[#allocation2 + $0x30] sm:$0xff] }
 0x335   : > { %14789 = vmatprep.mubr.msk.f32.mxu1 %vm675_vm3, %v18850_v38 }
 0x337   : > { %14248 = vmatmul.mubr.msk.f32.vlgmr.msra.gmra.mrb[32].mxu0 %vm675_vm3, %v5448_v10  ;;  %v9735_v10 = vld [vmem:[#allocation2 + $0x1b8] sm:$0xff] }
 0x338   : > { %14790 = vmatmul.mubr.msk.f32.gmra.mrb[28].mxu1 %vm675_vm3, %v18857_v50  ;;  %14250 = vmatprep.mubr.msk.f32.mxu0 %vm675_vm3, %v5449_v62  ;;  %v9736_v62 = vld [vmem:[#allocation2 + $0x1c8] sm:$0xff]  ;;  %v5837_v50 = vld [vmem:[#allocation2 + $0x50] sm:$0xff] }
 0x339   : > { %14792 = vmatprep.mubr.msk.f32.mxu1 %vm675_vm3, %v18855_v32  ;;  %14296 = vmatpush3.msra.mxu0 %v18667_v8  ;;  %v19016_v8 = vld [vmem:[#allocation2 + $0x170] sm:$0xff] }
 0x33a   : > { %v9737_v32 = vld [vmem:[#allocation2 + $0x1d0] sm:$0xff] }
 0x33b   : > { %14251 = vmatmul.mubr.msk.f32.gmra.mrb[34].mxu0 %vm675_vm3, %v5450_v40  ;;  %v5835_v40 = vld [vmem:[#allocation2 + $0x38] sm:$0xff] }
 0x33c   : > { %14793 = vmatmul.mubr.msk.f32.gmra.mrb[30].mxu1 %vm675_vm3, %v18865_v13  ;;  %14253 = vmatprep.mubr.msk.f32.mxu0 %vm675_vm3, %v18675_v15  ;;  %v19034_v15 = vld [vmem:[#allocation2 + $0x198] sm:$0xff]  ;;  %v5836_v13 = vld [vmem:[#allocation2 + $0x48] sm:$0xff] }
 0x33d   : > { %14797 = vmatprep.mubr.msk.f32.mxu1 %vm675_vm3, %v18871_v44 }
 0x33f   : > { %14254 = vmatmul.mubr.msk.f32.gmra.mrb[36].mxu0 %vm675_vm3, %v18681_v22  ;;  %v9734_v22 = vld [vmem:[#allocation2 + $0x1b0] sm:$0xff] }
 0x340   : > { %14798 = vmatmul.mubr.msk.f32.vlgmr.msra.gmra.mrb[0].mxu1 %vm675_vm3, %v18877_v12  ;;  %14256 = vmatprep.mubr.msk.f32.mxu0 %vm675_vm3, %v18695_v20 }
 0x341   : > { %14846 = vmatpush3.msra.mxu1 %v18686_v46  ;;  %14800 = vmatprep.mubr.msk.f32.mxu1 %vm675_vm3, %v18891_v3  ;;  %v19040_v46 = vld [vmem:[#allocation2 + $0x1a0] sm:$0xff] }
 0x342   : > { %14895 = vmatprep.subr.mxu1 %v18882_v17 }
 0x343   : > { %14257 = vmatmul.mubr.msk.f32.gmra.mrb[38].mxu0 %vm675_vm3, %v18700_v0 }
 0x344   : > { %14801 = vmatmul.mubr.msk.f32.gmra.mrb[2].mxu1 %vm675_vm3, %v18896_v18  ;;  %14259 = vmatprep.mubr.msk.f32.mxu0 %vm675_vm3, %v18706_v23 }
 0x345   : > { %14803 = vmatprep.mubr.msk.f32.mxu1 %vm675_vm3, %v18902_v6 }
 0x347   : > { %14260 = vmatmul.mubr.msk.f32.gmra.mrb[40].mxu0 %vm675_vm3, %v18712_v53 }
 0x348   : > { %14804 = vmatmul.mubr.msk.f32.gmra.mrb[4].mxu1 %vm675_vm3, %v18908_v2  ;;  %14262 = vmatprep.mubr.msk.f32.mxu0 %vm675_vm3, %v18718_v14 }
 0x349   : > { %14806 = vmatprep.mubr.msk.f32.mxu1 %vm675_vm3, %v18914_v54 }
 0x34b   : > { %14263 = vmatmul.mubr.msk.f32.gmra.mrb[42].mxu0 %vm675_vm3, %v18724_v34 }
 0x34c   : > { %14807 = vmatmul.mubr.msk.f32.gmra.mrb[6].mxu1 %vm675_vm3, %v18920_v7  ;;  %14265 = vmatprep.mubr.msk.f32.mxu0 %vm675_vm3, %v18730_v52 }
 0x34d   : > { %14809 = vmatprep.mubr.msk.f32.mxu1 %vm675_vm3, %v18926_v43 }
 0x34f   : > { %14266 = vmatmul.mubr.msk.f32.gmra.mrb[44].mxu0 %vm675_vm3, %v18736_v26 }
 0x350   : > { %14810 = vmatmul.mubr.msk.f32.gmra.mrb[8].mxu1 %vm675_vm3, %v18932_v61  ;;  %14268 = vmatprep.mubr.msk.f32.mxu0 %vm675_vm3, %v18742_v41 }
 0x351   : > { %14812 = vmatprep.mubr.msk.f32.mxu1 %vm675_vm3, %v18938_v57 }
 0x353   : > { %14269 = vmatmul.mubr.msk.f32.gmra.mrb[46].mxu0 %vm675_vm3, %v18748_v48 }
 0x354   : > { %14813 = vmatmul.mubr.msk.f32.gmra.mrb[10].mxu1 %vm675_vm3, %v18944_v27  ;;  %14271 = vmatprep.mubr.msk.f32.mxu0 %vm675_vm3, %v18754_v29 }
 0x355   : > { %14815 = vmatprep.mubr.msk.f32.mxu1 %vm675_vm3, %v18950_v51 }
 0x357   : > { %14272 = vmatmul.mubr.msk.f32.gmra.mrb[48].mxu0 %vm675_vm3, %v18760_v35 }
 0x358   : > { %14816 = vmatmul.mubr.msk.f32.gmra.mrb[12].mxu1 %vm675_vm3, %v18956_v1  ;;  %14274 = vmatprep.mubr.msk.f32.mxu0 %vm675_vm3, %v18766_v9 }
 0x359   : > { %14818 = vmatprep.mubr.msk.f32.mxu1 %vm675_vm3, %v18962_v49 }
 0x35b   : > { %14275 = vmatmul.mubr.msk.f32.gmra.mrb[50].mxu0 %vm675_vm3, %v18772_v39 }
 0x35c   : > { %14819 = vmatmul.mubr.msk.f32.gmra.mrb[14].mxu1 %vm675_vm3, %v18968_v28  ;;  %14277 = vmatprep.mubr.msk.f32.mxu0 %vm675_vm3, %v18778_v56 }
 0x35d   : > { %14821 = vmatprep.mubr.msk.f32.mxu1 %vm675_vm3, %v18974_v37 }
 0x35f   : > { %14278 = vmatmul.mubr.msk.f32.gmra.mrb[52].mxu0 %vm675_vm3, %v18784_v45 }
 0x360   : > { %14822 = vmatmul.mubr.msk.f32.gmra.mrb[16].mxu1 %vm675_vm3, %v18980_v19  ;;  %14280 = vmatprep.mubr.msk.f32.mxu0 %vm675_vm3, %v18790_v47 }
 0x361   : > { %14824 = vmatprep.mubr.msk.f32.mxu1 %vm675_vm3, %v18986_v16 }
 0x363   : > { %14281 = vmatmul.mubr.msk.f32.gmra.mrb[54].mxu0 %vm675_vm3, %v18796_v4 }
 0x364   : > { %14825 = vmatmul.mubr.msk.f32.gmra.mrb[18].mxu1 %vm675_vm3, %v18992_v30  ;;  %14283 = vmatprep.mubr.msk.f32.mxu0 %vm675_vm3, %v18802_v11 }
 0x365   : > { %14827 = vmatprep.mubr.msk.f32.mxu1 %vm675_vm3, %v18998_v59 }
 0x367   : > { %14284 = vmatmul.mubr.msk.f32.gmra.mrb[56].mxu0 %vm675_vm3, %v18808_v25 }
 0x368   : > { %14828 = vmatmul.mubr.msk.f32.gmra.mrb[20].mxu1 %vm675_vm3, %v19004_v21  ;;  %14286 = vmatprep.mubr.msk.f32.mxu0 %vm675_vm3, %v18814_v58 }
 0x369   : > { %14830 = vmatprep.mubr.msk.f32.mxu1 %vm675_vm3, %v19010_v31 }
 0x36b   : > { %14287 = vmatmul.mubr.msk.f32.gmra.mrb[58].mxu0 %vm675_vm3, %v18820_v33 }
 0x36c   : > { %14831 = vmatmul.mubr.msk.f32.gmra.mrb[22].mxu1 %vm675_vm3, %v19016_v8  ;;  %14289 = vmatprep.mubr.msk.f32.mxu0 %vm675_vm3, %v18826_v42 }
 0x36d   : > { %14833 = vmatprep.mubr.msk.f32.mxu1 %vm675_vm3, %v19022_v55 }
 0x36f   : > { %14290 = vmatmul.mubr.msk.f32.gmra.mrb[60].mxu0 %vm675_vm3, %v18832_v36 }
 0x370   : > { %14834 = vmatmul.mubr.msk.f32.gmra.mrb[24].mxu1 %vm675_vm3, %v19028_v5  ;;  %14292 = vmatprep.mubr.msk.f32.mxu0 %vm675_vm3, %v18838_v24 }
 0x371   : > { %14836 = vmatprep.mubr.msk.f32.mxu1 %vm675_vm3, %v19034_v15 }
 0x373   : > { %14293 = vmatmul.mubr.msk.f32.gmra.mrb[62].mxu0 %vm675_vm3, %v18844_v60 }
 0x374   : > { %14837 = vmatmul.mubr.msk.f32.gmra.mrb[26].mxu1 %vm675_vm3, %v19040_v46  ;;  %14297 = vmatprep.mubr.msk.f32.mxu0 %vm675_vm3, %v5834_v63  ;;  %v10093_v63 = vld [vmem:[#allocation2 + $0x61] sm:$0xff] }
 0x375   : > { %14839 = vmatprep.mubr.msk.f32.mxu1 %vm675_vm3, %v9734_v22  ;;  %v10094_v22 = vld [vmem:[#allocation2 + $0x69] sm:$0xff] }
 0x377   : > { %14298 = vmatmul.mubr.msk.f32.vlgmr.msra.gmra.mrb[32].mxu0 %vm675_vm3, %v5835_v40  ;;  %v10482_v40 = vld [vmem:[#allocation2 + $0x7a] sm:$0xff] }
 0x378   : > { %14840 = vmatmul.mubr.msk.f32.gmra.mrb[28].mxu1 %vm675_vm3, %v9735_v10  ;;  %14300 = vmatprep.mubr.msk.f32.mxu0 %vm675_vm3, %v5836_v13  ;;  %v19060_v10 = vld [vmem:[%s19536_s5 + $0xb8] sm:$0xff] }
 0x379   : > { %14842 = vmatprep.mubr.msk.f32.mxu1 %vm675_vm3, %v9736_v62  ;;  %v10097_v13 = vld [vmem:[#allocation2 + $0x91] sm:$0xff] }
 0x37a   : > { %v10481_v62 = vld [vmem:[#allocation2 + $0x6a] sm:$0xff] }
 0x37b   : > { %14301 = vmatmul.mubr.msk.f32.gmra.mrb[34].mxu0 %vm675_vm3, %v5837_v50  ;;  %v10096_v50 = vld [vmem:[#allocation2 + $0x81] sm:$0xff] }
 0x37c   : > { %14843 = vmatmul.mubr.msk.f32.gmra.mrb[30].mxu1 %vm675_vm3, %v9737_v32  ;;  %14303 = vmatprep.mubr.msk.f32.mxu0 %vm675_vm3, %v18871_v44  ;;  %v10095_v32 = vld [vmem:[#allocation2 + $0x79] sm:$0xff] }
 0x37d   : > { %14847 = vmatprep.mubr.msk.f32.mxu1 %vm675_vm3, %v10093_v63  ;;  %v10098_v44 = vld [vmem:[#allocation2 + $0x99] sm:$0xff]  ;;  %v10483_v63 = vld [vmem:[#allocation2 + $0x82] sm:$0xff] }
 0x37f   : > { %14304 = vmatmul.mubr.msk.f32.gmra.mrb[36].mxu0 %vm675_vm3, %v18877_v12  ;;  %v10099_v12 = vld [vmem:[#allocation2 + $0xa9] sm:$0xff] }
 0x380   : > { %14848 = vmatmul.mubr.msk.f32.vlgmr.msra.gmra.mrb[0].mxu1 %vm675_vm3, %v10094_v22  ;;  %14306 = vmatprep.mubr.msk.f32.mxu0 %vm675_vm3, %v18891_v3  ;;  %v10101_v3 = vld [vmem:[#allocation2 + $0xc1] sm:$0xff]  ;;  %v10484_v22 = vld [vmem:[#allocation2 + $0x92] sm:$0xff] }
 0x381   : > { %14896 = vmatpush3.msra.mxu1 %v18882_v17  ;;  %14850 = vmatprep.mubr.msk.f32.mxu1 %vm675_vm3, %v10095_v32  ;;  %v10100_v17 = vld [vmem:[#allocation2 + $0xb1] sm:$0xff]  ;;  %v10485_v32 = vld [vmem:[#allocation2 + $0x9a] sm:$0xff] }
 0x382   : > { %14945 = vmatprep.subr.mxu1 %v19060_v10 }
 0x383   : > { %14307 = vmatmul.mubr.msk.f32.gmra.mrb[38].mxu0 %vm675_vm3, %v18896_v18  ;;  %v10102_v18 = vld [vmem:[#allocation2 + $0xc9] sm:$0xff] }
 0x384   : > { %14851 = vmatmul.mubr.msk.f32.gmra.mrb[2].mxu1 %vm675_vm3, %v10096_v50  ;;  %14309 = vmatprep.mubr.msk.f32.mxu0 %vm675_vm3, %v18902_v6  ;;  %v10103_v6 = vld [vmem:[#allocation2 + $0xd9] sm:$0xff]  ;;  %v10486_v50 = vld [vmem:[#allocation2 + $0xaa] sm:$0xff] }
 0x385   : > { %14853 = vmatprep.mubr.msk.f32.mxu1 %vm675_vm3, %v10097_v13  ;;  %v10487_v13 = vld [vmem:[#allocation2 + $0xb2] sm:$0xff] }
 0x387   : > { %14310 = vmatmul.mubr.msk.f32.gmra.mrb[40].mxu0 %vm675_vm3, %v18908_v2  ;;  %v10104_v2 = vld [vmem:[#allocation2 + $0xe1] sm:$0xff] }
 0x388   : > { %14854 = vmatmul.mubr.msk.f32.gmra.mrb[4].mxu1 %vm675_vm3, %v10098_v44  ;;  %14312 = vmatprep.mubr.msk.f32.mxu0 %vm675_vm3, %v18914_v54  ;;  %v10105_v54 = vld [vmem:[#allocation2 + $0xf1] sm:$0xff] }
 0x389   : > { %14856 = vmatprep.mubr.msk.f32.mxu1 %vm675_vm3, %v10099_v12  ;;  %v10489_v44 = vld [vmem:[#allocation2 + $0xca] sm:$0xff]  ;;  %v10490_v12 = vld [vmem:[#allocation2 + $0xda] sm:$0xff] }
 0x38b   : > { %14313 = vmatmul.mubr.msk.f32.gmra.mrb[42].mxu0 %vm675_vm3, %v18920_v7  ;;  %v10106_v7 = vld [vmem:[#allocation2 + $0xf9] sm:$0xff] }
 0x38c   : > { %14857 = vmatmul.mubr.msk.f32.gmra.mrb[6].mxu1 %vm675_vm3, %v10100_v17  ;;  %14315 = vmatprep.mubr.msk.f32.mxu0 %vm675_vm3, %v18926_v43  ;;  %v10107_v43 = vld [vmem:[#allocation2 + $0x109] sm:$0xff] }
 0x38d   : > { %14859 = vmatprep.mubr.msk.f32.mxu1 %vm675_vm3, %v10101_v3  ;;  %v10491_v17 = vld [vmem:[#allocation2 + $0xe2] sm:$0xff]  ;;  %v10492_v3 = vld [vmem:[#allocation2 + $0xf2] sm:$0xff] }
 0x38f   : > { %14316 = vmatmul.mubr.msk.f32.gmra.mrb[44].mxu0 %vm675_vm3, %v18932_v61  ;;  %v10108_v61 = vld [vmem:[#allocation2 + $0x111] sm:$0xff] }
 0x390   : > { %14860 = vmatmul.mubr.msk.f32.gmra.mrb[8].mxu1 %vm675_vm3, %v10102_v18  ;;  %14318 = vmatprep.mubr.msk.f32.mxu0 %vm675_vm3, %v18938_v57  ;;  %v10109_v57 = vld [vmem:[#allocation2 + $0x121] sm:$0xff] }
 0x391   : > { %14862 = vmatprep.mubr.msk.f32.mxu1 %vm675_vm3, %v10103_v6  ;;  %v10493_v18 = vld [vmem:[#allocation2 + $0xfa] sm:$0xff]  ;;  %v10494_v6 = vld [vmem:[#allocation2 + $0x10a] sm:$0xff] }
 0x393   : > { %14319 = vmatmul.mubr.msk.f32.gmra.mrb[46].mxu0 %vm675_vm3, %v18944_v27  ;;  %v10110_v27 = vld [vmem:[#allocation2 + $0x129] sm:$0xff] }
 0x394   : > { %14863 = vmatmul.mubr.msk.f32.gmra.mrb[10].mxu1 %vm675_vm3, %v10104_v2  ;;  %14321 = vmatprep.mubr.msk.f32.mxu0 %vm675_vm3, %v18950_v51  ;;  %v10111_v51 = vld [vmem:[#allocation2 + $0x139] sm:$0xff] }
 0x395   : > { %14865 = vmatprep.mubr.msk.f32.mxu1 %vm675_vm3, %v10105_v54  ;;  %v10495_v2 = vld [vmem:[#allocation2 + $0x112] sm:$0xff]  ;;  %v10496_v54 = vld [vmem:[#allocation2 + $0x122] sm:$0xff] }
 0x397   : > { %14322 = vmatmul.mubr.msk.f32.gmra.mrb[48].mxu0 %vm675_vm3, %v18956_v1  ;;  %v10112_v1 = vld [vmem:[#allocation2 + $0x141] sm:$0xff] }
 0x398   : > { %14866 = vmatmul.mubr.msk.f32.gmra.mrb[12].mxu1 %vm675_vm3, %v10106_v7  ;;  %14324 = vmatprep.mubr.msk.f32.mxu0 %vm675_vm3, %v18962_v49  ;;  %v10113_v49 = vld [vmem:[#allocation2 + $0x151] sm:$0xff] }
 0x399   : > { %14868 = vmatprep.mubr.msk.f32.mxu1 %vm675_vm3, %v10107_v43  ;;  %v10497_v7 = vld [vmem:[#allocation2 + $0x12a] sm:$0xff]  ;;  %v10498_v43 = vld [vmem:[#allocation2 + $0x13a] sm:$0xff] }
 0x39b   : > { %14325 = vmatmul.mubr.msk.f32.gmra.mrb[50].mxu0 %vm675_vm3, %v18968_v28  ;;  %v10114_v28 = vld [vmem:[#allocation2 + $0x159] sm:$0xff] }
 0x39c   : > { %14869 = vmatmul.mubr.msk.f32.gmra.mrb[14].mxu1 %vm675_vm3, %v10108_v61  ;;  %14327 = vmatprep.mubr.msk.f32.mxu0 %vm675_vm3, %v18974_v37  ;;  %v10115_v37 = vld [vmem:[#allocation2 + $0x169] sm:$0xff] }
 0x39d   : > { %14871 = vmatprep.mubr.msk.f32.mxu1 %vm675_vm3, %v10109_v57  ;;  %v10499_v61 = vld [vmem:[#allocation2 + $0x142] sm:$0xff]  ;;  %v10500_v57 = vld [vmem:[#allocation2 + $0x152] sm:$0xff] }
 0x39f   : > { %14328 = vmatmul.mubr.msk.f32.gmra.mrb[52].mxu0 %vm675_vm3, %v18980_v19  ;;  %v10116_v19 = vld [vmem:[#allocation2 + $0x171] sm:$0xff] }
 0x3a0   : > { %14872 = vmatmul.mubr.msk.f32.gmra.mrb[16].mxu1 %vm675_vm3, %v10110_v27  ;;  %14330 = vmatprep.mubr.msk.f32.mxu0 %vm675_vm3, %v18986_v16  ;;  %v10117_v16 = vld [vmem:[#allocation2 + $0x181] sm:$0xff] }
 0x3a1   : > { %14874 = vmatprep.mubr.msk.f32.mxu1 %vm675_vm3, %v10111_v51  ;;  %v10501_v27 = vld [vmem:[#allocation2 + $0x15a] sm:$0xff]  ;;  %v10502_v51 = vld [vmem:[#allocation2 + $0x16a] sm:$0xff] }
 0x3a3   : > { %14331 = vmatmul.mubr.msk.f32.gmra.mrb[54].mxu0 %vm675_vm3, %v18992_v30  ;;  %v10118_v30 = vld [vmem:[#allocation2 + $0x189] sm:$0xff] }
 0x3a4   : > { %14875 = vmatmul.mubr.msk.f32.gmra.mrb[18].mxu1 %vm675_vm3, %v10112_v1  ;;  %14333 = vmatprep.mubr.msk.f32.mxu0 %vm675_vm3, %v18998_v59  ;;  %v10119_v59 = vld [vmem:[#allocation2 + $0x199] sm:$0xff] }
 0x3a5   : > { %14877 = vmatprep.mubr.msk.f32.mxu1 %vm675_vm3, %v10113_v49  ;;  %v10503_v1 = vld [vmem:[#allocation2 + $0x172] sm:$0xff]  ;;  %v10504_v49 = vld [vmem:[#allocation2 + $0x182] sm:$0xff] }
 0x3a7   : > { %14334 = vmatmul.mubr.msk.f32.gmra.mrb[56].mxu0 %vm675_vm3, %v19004_v21  ;;  %v10121_v21 = vld [vmem:[#allocation2 + $0x1b1] sm:$0xff] }
 0x3a8   : > { %14878 = vmatmul.mubr.msk.f32.gmra.mrb[20].mxu1 %vm675_vm3, %v10114_v28  ;;  %14336 = vmatprep.mubr.msk.f32.mxu0 %vm675_vm3, %v19010_v31  ;;  %v10120_v31 = vld [vmem:[#allocation2 + $0x1a1] sm:$0xff]  ;;  %v10505_v28 = vld [vmem:[#allocation2 + $0x18a] sm:$0xff] }
 0x3a9   : > { %14880 = vmatprep.mubr.msk.f32.mxu1 %vm675_vm3, %v10115_v37  ;;  %v10506_v37 = vld [vmem:[#allocation2 + $0x19a] sm:$0xff] }
 0x3ab   : > { %14337 = vmatmul.mubr.msk.f32.gmra.mrb[58].mxu0 %vm675_vm3, %v19016_v8  ;;  %v10122_v8 = vld [vmem:[#allocation2 + $0x1b9] sm:$0xff] }
 0x3ac   : > { %14881 = vmatmul.mubr.msk.f32.gmra.mrb[22].mxu1 %vm675_vm3, %v10116_v19  ;;  %14339 = vmatprep.mubr.msk.f32.mxu0 %vm675_vm3, %v19022_v55  ;;  %v10123_v55 = vld [vmem:[#allocation2 + $0x1c9] sm:$0xff]  ;;  %v10508_v19 = vld [vmem:[#allocation2 + $0x1b2] sm:$0xff] }
 0x3ad   : > { %14883 = vmatprep.mubr.msk.f32.mxu1 %vm675_vm3, %v10117_v16  ;;  %v10507_v16 = vld [vmem:[#allocation2 + $0x1a2] sm:$0xff] }
 0x3af   : > { %14340 = vmatmul.mubr.msk.f32.gmra.mrb[60].mxu0 %vm675_vm3, %v19028_v5  ;;  %v10124_v5 = vld [vmem:[#allocation2 + $0x1d1] sm:$0xff] }
 0x3b0   : > { %14884 = vmatmul.mubr.msk.f32.gmra.mrb[24].mxu1 %vm675_vm3, %v10118_v30  ;;  %14342 = vmatprep.mubr.msk.f32.mxu0 %vm675_vm3, %v19034_v15  ;;  %v10480_v15 = vld [vmem:[#allocation2 + $0x62] sm:$0xff]  ;;  %v10509_v30 = vld [vmem:[#allocation2 + $0x1ba] sm:$0xff] }
 0x3b1   : > { %14886 = vmatprep.mubr.msk.f32.mxu1 %vm675_vm3, %v10119_v59  ;;  %v10510_v59 = vld [vmem:[#allocation2 + $0x1ca] sm:$0xff] }
 0x3b3   : > { %14343 = vmatmul.mubr.msk.f32.gmra.mrb[62].mxu0 %vm675_vm3, %v19040_v46  ;;  %v19153_v46 = vld [vmem:[%s19536_s5 + $0xc0] sm:$0xff] }
 0x3b4   : > { %14887 = vmatmul.mubr.msk.f32.gmra.mrb[26].mxu1 %vm675_vm3, %v10120_v31  ;;  %v10867_v31 = vld [vmem:[#allocation2 + $0x63] sm:$0xff] }
 0x3b5   : > { %14889 = vmatprep.mubr.msk.f32.mxu1 %vm675_vm3, %v10121_v21  ;;  %v10511_v21 = vld [vmem:[#allocation2 + $0x1d2] sm:$0xff] }
 0x3b8   : > { %14890 = vmatmul.mubr.msk.f32.gmra.mrb[28].mxu1 %vm675_vm3, %v10122_v8  ;;  %v10868_v8 = vld [vmem:[#allocation2 + $0x6b] sm:$0xff] }
 0x3b9   : > { %14892 = vmatprep.mubr.msk.f32.mxu1 %vm675_vm3, %v10123_v55  ;;  %v10869_v55 = vld [vmem:[#allocation2 + $0x7b] sm:$0xff] }
 0x3bc   : > { %14893 = vmatmul.mubr.msk.f32.gmra.mrb[30].mxu1 %vm675_vm3, %v10124_v5  ;;  %v10870_v5 = vld [vmem:[#allocation2 + $0x83] sm:$0xff] }
 0x3bd   : > { %14897 = vmatprep.mubr.msk.f32.mxu1 %vm675_vm3, %v10480_v15  ;;  %v10871_v15 = vld [vmem:[#allocation2 + $0x93] sm:$0xff] }
 0x3c0   : > { %14898 = vmatmul.mubr.msk.f32.vlgmr.msra.gmra.mrb[0].mxu1 %vm675_vm3, %v10481_v62  ;;  %v10872_v62 = vld [vmem:[#allocation2 + $0x9b] sm:$0xff] }
 0x3c1   : > { %14946 = vmatpush3.msra.mxu1 %v19060_v10  ;;  %14900 = vmatprep.mubr.msk.f32.mxu1 %vm675_vm3, %v10482_v40  ;;  %v10488_v10 = vld [vmem:[#allocation2 + $0xc2] sm:$0xff]  ;;  %v10873_v40 = vld [vmem:[#allocation2 + $0xab] sm:$0xff] }
 0x3c2   : > { %14995 = vmatprep.subr.mxu1 %v19153_v46 }
 0x3c4   : > { %14901 = vmatmul.mubr.msk.f32.gmra.mrb[2].mxu1 %vm675_vm3, %v10483_v63  ;;  %v10874_v63 = vld [vmem:[#allocation2 + $0xb3] sm:$0xff] }
 0x3c5   : > { %14903 = vmatprep.mubr.msk.f32.mxu1 %vm675_vm3, %v10484_v22  ;;  %v10875_v22 = vld [vmem:[#allocation2 + $0xc3] sm:$0xff] }
 0x3c8   : > { %14904 = vmatmul.mubr.msk.f32.gmra.mrb[4].mxu1 %vm675_vm3, %v10485_v32  ;;  %v10877_v32 = vld [vmem:[#allocation2 + $0xdb] sm:$0xff] }
 0x3c9   : > { %14906 = vmatprep.mubr.msk.f32.mxu1 %vm675_vm3, %v10486_v50  ;;  %v10878_v50 = vld [vmem:[#allocation2 + $0xe3] sm:$0xff] }
 0x3cc   : > { %14907 = vmatmul.mubr.msk.f32.gmra.mrb[6].mxu1 %vm675_vm3, %v10487_v13  ;;  %v10879_v13 = vld [vmem:[#allocation2 + $0xf3] sm:$0xff] }
 0x3cd   : > { %14909 = vmatprep.mubr.msk.f32.mxu1 %vm675_vm3, %v10488_v10  ;;  %v10880_v10 = vld [vmem:[#allocation2 + $0xfb] sm:$0xff] }
 0x3d0   : > { %14910 = vmatmul.mubr.msk.f32.gmra.mrb[8].mxu1 %vm675_vm3, %v10489_v44  ;;  %v10881_v44 = vld [vmem:[#allocation2 + $0x10b] sm:$0xff] }
 0x3d1   : > { %14912 = vmatprep.mubr.msk.f32.mxu1 %vm675_vm3, %v10490_v12  ;;  %v10882_v12 = vld [vmem:[#allocation2 + $0x113] sm:$0xff] }
 0x3d4   : > { %14913 = vmatmul.mubr.msk.f32.gmra.mrb[10].mxu1 %vm675_vm3, %v10491_v17  ;;  %v10883_v17 = vld [vmem:[#allocation2 + $0x123] sm:$0xff] }
 0x3d5   : > { %14915 = vmatprep.mubr.msk.f32.mxu1 %vm675_vm3, %v10492_v3  ;;  %v10884_v3 = vld [vmem:[#allocation2 + $0x12b] sm:$0xff] }
 0x3d8   : > { %14916 = vmatmul.mubr.msk.f32.gmra.mrb[12].mxu1 %vm675_vm3, %v10493_v18  ;;  %v10885_v18 = vld [vmem:[#allocation2 + $0x13b] sm:$0xff] }
 0x3d9   : > { %14918 = vmatprep.mubr.msk.f32.mxu1 %vm675_vm3, %v10494_v6  ;;  %v10886_v6 = vld [vmem:[#allocation2 + $0x143] sm:$0xff] }
 0x3dc   : > { %14919 = vmatmul.mubr.msk.f32.gmra.mrb[14].mxu1 %vm675_vm3, %v10495_v2  ;;  %v10887_v2 = vld [vmem:[#allocation2 + $0x153] sm:$0xff] }
 0x3dd   : > { %14921 = vmatprep.mubr.msk.f32.mxu1 %vm675_vm3, %v10496_v54  ;;  %v10888_v54 = vld [vmem:[#allocation2 + $0x15b] sm:$0xff] }
 0x3e0   : > { %14922 = vmatmul.mubr.msk.f32.gmra.mrb[16].mxu1 %vm675_vm3, %v10497_v7  ;;  %v10889_v7 = vld [vmem:[#allocation2 + $0x16b] sm:$0xff] }
 0x3e1   : > { %14924 = vmatprep.mubr.msk.f32.mxu1 %vm675_vm3, %v10498_v43  ;;  %v10890_v43 = vld [vmem:[#allocation2 + $0x173] sm:$0xff] }
 0x3e4   : > { %14925 = vmatmul.mubr.msk.f32.gmra.mrb[18].mxu1 %vm675_vm3, %v10499_v61  ;;  %v10891_v61 = vld [vmem:[#allocation2 + $0x183] sm:$0xff] }
 0x3e5   : > { %14927 = vmatprep.mubr.msk.f32.mxu1 %vm675_vm3, %v10500_v57  ;;  %v10892_v57 = vld [vmem:[#allocation2 + $0x18b] sm:$0xff] }
 0x3e8   : > { %14928 = vmatmul.mubr.msk.f32.gmra.mrb[20].mxu1 %vm675_vm3, %v10501_v27  ;;  %v10893_v27 = vld [vmem:[#allocation2 + $0x19b] sm:$0xff] }
 0x3e9   : > { %14930 = vmatprep.mubr.msk.f32.mxu1 %vm675_vm3, %v10502_v51  ;;  %v10895_v51 = vld [vmem:[#allocation2 + $0x1b3] sm:$0xff] }
 0x3ec   : > { %14931 = vmatmul.mubr.msk.f32.gmra.mrb[22].mxu1 %vm675_vm3, %v10503_v1  ;;  %v10894_v1 = vld [vmem:[#allocation2 + $0x1a3] sm:$0xff] }
 0x3ed   : > { %14933 = vmatprep.mubr.msk.f32.mxu1 %vm675_vm3, %v10504_v49  ;;  %v10896_v49 = vld [vmem:[#allocation2 + $0x1bb] sm:$0xff] }
 0x3f0   : > { %14934 = vmatmul.mubr.msk.f32.gmra.mrb[24].mxu1 %vm675_vm3, %v10505_v28  ;;  %v10897_v28 = vld [vmem:[#allocation2 + $0x1cb] sm:$0xff] }
 0x3f1   : > { %14936 = vmatprep.mubr.msk.f32.mxu1 %vm675_vm3, %v10506_v37  ;;  %v10898_v37 = vld [vmem:[#allocation2 + $0x1d3] sm:$0xff] }
 0x3f4   : > { %14937 = vmatmul.mubr.msk.f32.gmra.mrb[26].mxu1 %vm675_vm3, %v10507_v16 }
 0x3f5   : > { %14939 = vmatprep.mubr.msk.f32.mxu1 %vm675_vm3, %v10508_v19 }
 0x3f8   : > { %14940 = vmatmul.mubr.msk.f32.gmra.mrb[28].mxu1 %vm675_vm3, %v10509_v30 }
 0x3f9   : > { %14942 = vmatprep.mubr.msk.f32.mxu1 %vm675_vm3, %v10510_v59 }
 0x3fc   : > { %14943 = vmatmul.mubr.msk.f32.gmra.mrb[30].mxu1 %vm675_vm3, %v10511_v21 }
 0x3fd   : > { %14947 = vmatprep.mubr.msk.f32.mxu1 %vm675_vm3, %v10867_v31 }
 0x400   : > { %14948 = vmatmul.mubr.msk.f32.vlgmr.msra.gmra.mrb[0].mxu1 %vm675_vm3, %v10868_v8 }
 0x401   : > { %14996 = vmatpush3.msra.mxu1 %v19153_v46  ;;  %14950 = vmatprep.mubr.msk.f32.mxu1 %vm675_vm3, %v10869_v55  ;;  %v10876_v46 = vld [vmem:[#allocation2 + $0xcb] sm:$0xff] }
 0x404   : > { %14951 = vmatmul.mubr.msk.f32.gmra.mrb[2].mxu1 %vm675_vm3, %v10870_v5 }
 0x405   : > { %14953 = vmatprep.mubr.msk.f32.mxu1 %vm675_vm3, %v10871_v15 }
 0x408   : > { %14954 = vmatmul.mubr.msk.f32.gmra.mrb[4].mxu1 %vm675_vm3, %v10872_v62  ;;  %v19346_v62 = vld [vmem:[%s19537_s6] ss:$0 sm:$0xff] }
 0x409   : > { %14956 = vmatprep.mubr.msk.f32.mxu1 %vm675_vm3, %v10873_v40 }
 0x40c   : > { %14957 = vmatmul.mubr.msk.f32.gmra.mrb[6].mxu1 %vm675_vm3, %v10874_v63 }
 0x40d   : > { %14959 = vmatprep.mubr.msk.f32.mxu1 %vm675_vm3, %v10875_v22 }
 0x410   : > { %14960 = vmatmul.mubr.msk.f32.gmra.mrb[8].mxu1 %vm675_vm3, %v10876_v46 }
 0x411   : > { %14962 = vmatprep.mubr.msk.f32.mxu1 %vm675_vm3, %v10877_v32 }
 0x414   : > { %14963 = vmatmul.mubr.msk.f32.gmra.mrb[10].mxu1 %vm675_vm3, %v10878_v50 }
 0x415   : > { %14965 = vmatprep.mubr.msk.f32.mxu1 %vm675_vm3, %v10879_v13 }
 0x418   : > { %14966 = vmatmul.mubr.msk.f32.gmra.mrb[12].mxu1 %vm675_vm3, %v10880_v10 }
 0x419   : > { %14968 = vmatprep.mubr.msk.f32.mxu1 %vm675_vm3, %v10881_v44 }
 0x41c   : > { %14969 = vmatmul.mubr.msk.f32.gmra.mrb[14].mxu1 %vm675_vm3, %v10882_v12 }
 0x41d   : > { %14971 = vmatprep.mubr.msk.f32.mxu1 %vm675_vm3, %v10883_v17 }
 0x420   : > { %14972 = vmatmul.mubr.msk.f32.gmra.mrb[16].mxu1 %vm675_vm3, %v10884_v3 }
 0x421   : > { %14974 = vmatprep.mubr.msk.f32.mxu1 %vm675_vm3, %v10885_v18 }
 0x424   : > { %14975 = vmatmul.mubr.msk.f32.gmra.mrb[18].mxu1 %vm675_vm3, %v10886_v6 }
 0x425   : > { %14977 = vmatprep.mubr.msk.f32.mxu1 %vm675_vm3, %v10887_v2 }
 0x428   : > { %14978 = vmatmul.mubr.msk.f32.gmra.mrb[20].mxu1 %vm675_vm3, %v10888_v54 }
 0x429   : > { %14980 = vmatprep.mubr.msk.f32.mxu1 %vm675_vm3, %v10889_v7 }
 0x42c   : > { %14981 = vmatmul.mubr.msk.f32.gmra.mrb[22].mxu1 %vm675_vm3, %v10890_v43 }
 0x42d   : > { %14983 = vmatprep.mubr.msk.f32.mxu1 %vm675_vm3, %v10891_v61 }
 0x430   : > { %14984 = vmatmul.mubr.msk.f32.gmra.mrb[24].mxu1 %vm675_vm3, %v10892_v57 }
 0x431   : > { %14986 = vmatprep.mubr.msk.f32.mxu1 %vm675_vm3, %v10893_v27 }
 0x434   : > { %14987 = vmatmul.mubr.msk.f32.gmra.mrb[26].mxu1 %vm675_vm3, %v10894_v1 }
 0x435   : > { %14989 = vmatprep.mubr.msk.f32.mxu1 %vm675_vm3, %v10895_v51 }
 0x438   : > { %14990 = vmatmul.mubr.msk.f32.gmra.mrb[28].mxu1 %vm675_vm3, %v10896_v49 }
 0x439   : > { %14992 = vmatprep.mubr.msk.f32.mxu1 %vm675_vm3, %v10897_v28 }
 0x43c   : > { %14993 = vmatmul.mubr.msk.f32.gmra.mrb[30].mxu1 %vm675_vm3, %v10898_v37 }
 0x43d   : > { %14997 = vmatprep.mubr.msk.f32.mxu1 %vm675_vm3, %v18695_v20 }
 0x440   : > { %14998 = vmatmul.mubr.msk.f32.vlgmr.msra.gmra.mrb[0].mxu1 %vm675_vm3, %v18700_v0 }
 0x441   : > { %15000 = vmatprep.mubr.msk.f32.mxu1 %vm675_vm3, %v18706_v23 }
 0x444   : > { %15001 = vmatmul.mubr.msk.f32.gmra.mrb[2].mxu1 %vm675_vm3, %v18712_v53 }
 0x445   : > { %15003 = vmatprep.mubr.msk.f32.mxu1 %vm675_vm3, %v18718_v14 }
 0x448   : > { %15004 = vmatmul.mubr.msk.f32.gmra.mrb[4].mxu1 %vm675_vm3, %v18724_v34 }
 0x449   : > { %15006 = vmatprep.mubr.msk.f32.mxu1 %vm675_vm3, %v18730_v52 }
 0x44a   : > { %v14299_v19 = vpop.f32.mrb[32].mxu0 }
 0x44b   : > { %v6030_v20 = vpop.f32.mrb[33].mxu0  ;;  %v15045_v40 = vadd.f32 %v14299_v19, %v19346_v62 }
 0x44c   : > { %15007 = vmatmul.mubr.msk.f32.gmra.mrb[6].mxu1 %vm675_vm3, %v18736_v26  ;;  %v15047_v63 = vadd.f32 %v19346_v62, %v6030_v20 }
 0x44d   : > { %15009 = vmatprep.mubr.msk.f32.mxu1 %vm675_vm3, %v18742_v41 }
 0x44e   : > { %v19239_v0 = vpop.f32.mrb[34].mxu0 }
 0x44f   : > { %v19241_v23 = vpop.f32.mrb[35].mxu0  ;;  %v15049_v13 = vadd.f32 %v19239_v0, %v19346_v62 }
 0x450   : > { %15010 = vmatmul.mubr.msk.f32.gmra.mrb[8].mxu1 %vm675_vm3, %v18748_v48  ;;  %v15051_v44 = vadd.f32 %v19346_v62, %v19241_v23 }
 0x451   : > { %15012 = vmatprep.mubr.msk.f32.mxu1 %vm675_vm3, %v18754_v29 }
 0x452   : > { %v19247_v53 = vpop.f32.mrb[36].mxu0 }
 0x453   : > { %v19249_v14 = vpop.f32.mrb[37].mxu0  ;;  %v15053_v2 = vadd.f32 %v19247_v53, %v19346_v62 }
 0x454   : > { %15013 = vmatmul.mubr.msk.f32.gmra.mrb[10].mxu1 %vm675_vm3, %v18760_v35  ;;  %v15055_v7 = vadd.f32 %v19346_v62, %v19249_v14 }
 0x455   : > { %15015 = vmatprep.mubr.msk.f32.mxu1 %vm675_vm3, %v18766_v9 }
 0x456   : > { %v19255_v34 = vpop.f32.mrb[38].mxu0 }
 0x457   : > { %v19257_v52 = vpop.f32.mrb[39].mxu0  ;;  %v15057_v1 = vadd.f32 %v19255_v34, %v19346_v62 }
 0x458   : > { %15016 = vmatmul.mubr.msk.f32.gmra.mrb[12].mxu1 %vm675_vm3, %v18772_v39  ;;  %v15059_v28 = vadd.f32 %v19346_v62, %v19257_v52 }
 0x459   : > { %15018 = vmatprep.mubr.msk.f32.mxu1 %vm675_vm3, %v18778_v56 }
 0x45a   : > { %v19263_v26 = vpop.f32.mrb[40].mxu0 }
 0x45b   : > { %v19265_v41 = vpop.f32.mrb[41].mxu0  ;;  %v15061_v53 = vadd.f32 %v19263_v26, %v19346_v62 }
 0x45c   : > { %15019 = vmatmul.mubr.msk.f32.gmra.mrb[14].mxu1 %vm675_vm3, %v18784_v45  ;;  %v15063_v34 = vadd.f32 %v19346_v62, %v19265_v41 }
 0x45d   : > { %15021 = vmatprep.mubr.msk.f32.mxu1 %vm675_vm3, %v18790_v47 }
 0x45e   : > { %v19271_v48 = vpop.f32.mrb[42].mxu0 }
 0x45f   : > { %v19273_v29 = vpop.f32.mrb[43].mxu0 }
 0x460   : > { %15022 = vmatmul.mubr.msk.f32.gmra.mrb[16].mxu1 %vm675_vm3, %v18796_v4  ;;  %v15067_v26 = vadd.f32 %v19346_v62, %v19273_v29 }
 0x461   : > { %15024 = vmatprep.mubr.msk.f32.mxu1 %vm675_vm3, %v18802_v11 }
 0x462   : > { %v19279_v35 = vpop.f32.mrb[44].mxu0 }
 0x463   : > { %v19281_v9 = vpop.f32.mrb[45].mxu0 }
 0x464   : > { %15025 = vmatmul.mubr.msk.f32.gmra.mrb[18].mxu1 %vm675_vm3, %v18808_v25 }
 0x465   : > { %15027 = vmatprep.mubr.msk.f32.mxu1 %vm675_vm3, %v18814_v58 }
 0x466   : > { %v19287_v39 = vpop.f32.mrb[46].mxu0 }
 0x467   : > { %v19289_v56 = vpop.f32.mrb[47].mxu0 }
 0x468   : > { %15028 = vmatmul.mubr.msk.f32.gmra.mrb[20].mxu1 %vm675_vm3, %v18820_v33  ;;  %v19571_v33 = vld [vmem:[#allocation8_spill] sm:$0xff] }
 0x469   : > { %15030 = vmatprep.mubr.msk.f32.mxu1 %vm675_vm3, %v18826_v42  ;;  %v19572_v42 = vld [vmem:[#allocation7_spill] sm:$0xff] }
 0x46a   : > { %v19295_v45 = vpop.f32.mrb[48].mxu0 }
 0x46b   : > { %v19297_v47 = vpop.f32.mrb[49].mxu0 }
 0x46c   : > { %15031 = vmatmul.mubr.msk.f32.gmra.mrb[22].mxu1 %vm675_vm3, %v18832_v36  ;;  %v11284_v36 = vld [vmem:[#allocation2 + $0x1cc] sm:$0xff] }
 0x46d   : > { %15033 = vmatprep.mubr.msk.f32.mxu1 %vm675_vm3, %v18838_v24 }
 0x46e   : > { %v19303_v4 = vpop.f32.mrb[50].mxu0 }
 0x46f   : > { %v19305_v11 = vpop.f32.mrb[51].mxu0 }
 0x470   : > { %15034 = vmatmul.mubr.msk.f32.gmra.mrb[24].mxu1 %vm675_vm3, %v18844_v60  ;;  %v19573_v60 = vld [vmem:[#allocation9_spill] sm:$0xff] }
 0x471   : > { %15036 = vmatprep.mubr.msk.f32.mxu1 %vm675_vm3, %v18850_v38  ;;  %v11285_v38 = vld [vmem:[#allocation2 + $0x1d4] sm:$0xff] }
 0x472   : > { %v19311_v25 = vpop.f32.mrb[52].mxu0 }
 0x473   : > { %v19313_v58 = vpop.f32.mrb[53].mxu0 }
 0x474   : > { %15037 = vmatmul.mubr.msk.f32.gmra.mrb[26].mxu1 %vm675_vm3, %v19571_v33 }
 0x475   : > { %15039 = vmatprep.mubr.msk.f32.mxu1 %vm675_vm3, %v19572_v42 }
 0x476   : > { %v19319_v24 = vpop.f32.mrb[54].mxu0 }
 0x477   : > { %v19321_v16 = vpop.f32.mrb[55].mxu0 }
 0x478   : > { %15040 = vmatmul.mubr.msk.f32.gmra.mrb[28].mxu1 %vm675_vm3, %v19573_v60 }
 0x479   : > { %15042 = vmatprep.mubr.msk.f32.mxu1 %vm675_vm3, %v11284_v36 }
 0x47a   : > { %v19326_v30 = vpop.f32.mrb[56].mxu0 }
 0x47b   : > { %v19328_v59 = vpop.f32.mrb[57].mxu0 }
 0x47c   : > { %15043 = vmatmul.mubr.msk.f32.gmra.mrb[30].mxu1 %vm675_vm3, %v11285_v38  ;;  %v15065_v38 = vadd.f32 %v19271_v48, %v19346_v62  ;;  %v15071_v48 = vadd.f32 %v19346_v62, %v19281_v9 }
 0x47e   : > { %v19331_v21 = vpop.f32.mrb[58].mxu0 }
 0x47f   : > { %v19333_v31 = vpop.f32.mrb[59].mxu0 }
 0x482   : > { %v19335_v8 = vpop.f32.mrb[60].mxu0 }
 0x483   : > { %v19337_v55 = vpop.f32.mrb[61].mxu0 }
 0x486   : > { %v19339_v5 = vpop.f32.mrb[62].mxu0 }
 0x487   : > { %v19341_v15 = vpop.f32.mrb[63].mxu0 }
 0x513   : > { %v14999_v22 = vpop.f32.mrb[0].mxu1 }
 0x514   : > { %v15046_v46 = vadd.f32 %v15045_v40, %v14999_v22  ;;  %v11450_v32 = vpop.f32.mrb[1].mxu1 }
 0x515   : > { %v15048_v50 = vadd.f32 %v15047_v63, %v11450_v32 }
 0x516   : > { %v11642_v10 = vmax.f32 %v15046_v46, 0.0 }
 0x517   : > { %v11641_v12 = vmax.f32 %v15048_v50, 0.0  ;;  %v15002_v17 = vpop.f32.mrb[2].mxu1  ;;  %v15069_v50 = vadd.f32 %v19279_v35, %v19346_v62  ;;  %v15075_v35 = vadd.f32 %v19346_v62, %v19289_v56 }
 0x518   : > { %11675 = vst.msk [vmem:[%s19357_s29 + $0x8] sm:$0xff] %vm11673_vm5, %v11642_v10  ;;  %v15050_v3 = vadd.f32 %v15049_v13, %v15002_v17  ;;  %v11460_v18 = vpop.f32.mrb[3].mxu1 }
 0x519   : > { %11674 = vst.msk [vmem:[%s19357_s29] sm:$0xff] %vm11673_vm5, %v11641_v12  ;;  %v15052_v6 = vadd.f32 %v15051_v44, %v11460_v18 }
 0x51a   : > { %v11644_v54 = vmax.f32 %v15050_v3, 0.0  ;;  %v15073_v3 = vadd.f32 %v19287_v39, %v19346_v62  ;;  %v15079_v39 = vadd.f32 %v19346_v62, %v19297_v47 }
 0x51b   : > { %v11643_v43 = vmax.f32 %v15052_v6, 0.0  ;;  %v15005_v61 = vpop.f32.mrb[4].mxu1 }
 0x51c   : > { %11677 = vst.msk [vmem:[%s19357_s29 + $0x18] sm:$0xff] %vm11673_vm5, %v11644_v54  ;;  %v15054_v57 = vadd.f32 %v15053_v2, %v15005_v61  ;;  %v11470_v27 = vpop.f32.mrb[5].mxu1 }
 0x51d   : > { %11676 = vst.msk [vmem:[%s19357_s29 + $0x10] sm:$0xff] %vm11673_vm5, %v11643_v43  ;;  %v15056_v51 = vadd.f32 %v15055_v7, %v11470_v27  ;;  %v15077_v43 = vadd.f32 %v19295_v45, %v19346_v62  ;;  %v15083_v45 = vadd.f32 %v19346_v62, %v19305_v11 }
 0x51e   : > { %v11646_v49 = vmax.f32 %v15054_v57, 0.0 }
 0x51f   : > { %v11645_v37 = vmax.f32 %v15056_v51, 0.0  ;;  %v15008_v19 = vpop.f32.mrb[6].mxu1 }
 0x520   : > { %11679 = vst.msk [vmem:[%s19357_s29 + $0x28] sm:$0xff] %vm11673_vm5, %v11646_v49  ;;  %v15058_v20 = vadd.f32 %v15057_v1, %v15008_v19  ;;  %v11480_v0 = vpop.f32.mrb[7].mxu1  ;;  %v15081_v49 = vadd.f32 %v19303_v4, %v19346_v62  ;;  %v15087_v4 = vadd.f32 %v19346_v62, %v19313_v58 }
 0x521   : > { %11678 = vst.msk [vmem:[%s19357_s29 + $0x20] sm:$0xff] %vm11673_vm5, %v11645_v37  ;;  %v15060_v23 = vadd.f32 %v15059_v28, %v11480_v0 }
 0x522   : > { %v11648_v14 = vmax.f32 %v15058_v20, 0.0 }
 0x523   : > { %v11647_v52 = vmax.f32 %v15060_v23, 0.0  ;;  %v15011_v33 = vpop.f32.mrb[8].mxu1  ;;  %v15085_v23 = vadd.f32 %v19311_v25, %v19346_v62  ;;  %v15091_v25 = vadd.f32 %v19346_v62, %v19321_v16 }
 0x524   : > { %11681 = vst.msk [vmem:[%s19357_s29 + $0x38] sm:$0xff] %vm11673_vm5, %v11648_v14  ;;  %v15062_v42 = vadd.f32 %v15061_v53, %v15011_v33  ;;  %v11490_v36 = vpop.f32.mrb[9].mxu1 }
 0x525   : > { %11680 = vst.msk [vmem:[%s19357_s29 + $0x30] sm:$0xff] %vm11673_vm5, %v11647_v52  ;;  %v15064_v60 = vadd.f32 %v15063_v34, %v11490_v36 }
 0x526   : > { %v11650_v40 = vmax.f32 %v15062_v42, 0.0  ;;  %v15089_v42 = vadd.f32 %v19319_v24, %v19346_v62  ;;  %v15095_v24 = vadd.f32 %v19346_v62, %v19328_v59 }
 0x527   : > { %v11649_v41 = vmax.f32 %v15064_v60, 0.0  ;;  %v15014_v63 = vpop.f32.mrb[10].mxu1 }
 0x528   : > { %11683 = vst.msk [vmem:[%s19357_s29 + $0x48] sm:$0xff] %vm11673_vm5, %v11650_v40  ;;  %v15066_v22 = vadd.f32 %v15065_v38, %v15014_v63  ;;  %v11500_v46 = vpop.f32.mrb[11].mxu1 }
 0x529   : > { %11682 = vst.msk [vmem:[%s19357_s29 + $0x40] sm:$0xff] %vm11673_vm5, %v11649_v41  ;;  %v15068_v32 = vadd.f32 %v15067_v26, %v11500_v46  ;;  %v15093_v41 = vadd.f32 %v19326_v30, %v19346_v62  ;;  %v15099_v30 = vadd.f32 %v19346_v62, %v19333_v31  ;;  %v15103_v31 = vadd.f32 %v19346_v62, %v19337_v55 }
 0x52a   : > { %v11652_v13 = vmax.f32 %v15066_v22, 0.0 }
 0x52b   : > { %v11651_v29 = vmax.f32 %v15068_v32, 0.0  ;;  %v15017_v10 = vpop.f32.mrb[12].mxu1 }
 0x52c   : > { %11685 = vst.msk [vmem:[%s19357_s29 + $0x58] sm:$0xff] %vm11673_vm5, %v11652_v13  ;;  %v15070_v44 = vadd.f32 %v15069_v50, %v15017_v10  ;;  %v11510_v12 = vpop.f32.mrb[13].mxu1  ;;  %v15097_v13 = vadd.f32 %v19331_v21, %v19346_v62 }
 0x52d   : > { %11684 = vst.msk [vmem:[%s19357_s29 + $0x50] sm:$0xff] %vm11673_vm5, %v11651_v29  ;;  %v15072_v17 = vadd.f32 %v15071_v48, %v11510_v12 }
 0x52e   : > { %v11654_v18 = vmax.f32 %v15070_v44, 0.0 }
 0x52f   : > { %v11653_v9 = vmax.f32 %v15072_v17, 0.0  ;;  %v15020_v6 = vpop.f32.mrb[14].mxu1  ;;  %v15101_v17 = vadd.f32 %v19335_v8, %v19346_v62 }
 0x530   : > { %11687 = vst.msk [vmem:[%s19357_s29 + $0x68] sm:$0xff] %vm11673_vm5, %v11654_v18  ;;  %v15074_v2 = vadd.f32 %v15073_v3, %v15020_v6  ;;  %v11520_v54 = vpop.f32.mrb[15].mxu1 }
 0x531   : > { %11686 = vst.msk [vmem:[%s19357_s29 + $0x60] sm:$0xff] %vm11673_vm5, %v11653_v9  ;;  %v15076_v7 = vadd.f32 %v15075_v35, %v11520_v54  ;;  %v15107_v54 = vadd.f32 %v19346_v62, %v19341_v15 }
 0x532   : > { %v11656_v61 = vmax.f32 %v15074_v2, 0.0  ;;  %v15105_v2 = vadd.f32 %v19339_v5, %v19346_v62 }
 0x533   : > { %v11655_v56 = vmax.f32 %v15076_v7, 0.0  ;;  %v15023_v57 = vpop.f32.mrb[16].mxu1 }
 0x534   : > { %11689 = vst.msk [vmem:[%s19357_s29 + $0x78] sm:$0xff] %vm11673_vm5, %v11656_v61  ;;  %v15078_v27 = vadd.f32 %v15077_v43, %v15023_v57  ;;  %v11530_v51 = vpop.f32.mrb[17].mxu1 }
 0x535   : > { %11688 = vst.msk [vmem:[%s19357_s29 + $0x70] sm:$0xff] %vm11673_vm5, %v11655_v56  ;;  %v15080_v1 = vadd.f32 %v15079_v39, %v11530_v51 }
 0x536   : > { %v11658_v28 = vmax.f32 %v15078_v27, 0.0 }
 0x537   : > { %v11657_v47 = vmax.f32 %v15080_v1, 0.0  ;;  %v15026_v37 = vpop.f32.mrb[18].mxu1 }
 0x538   : > { %11691 = vst.msk [vmem:[%s19357_s29 + $0x88] sm:$0xff] %vm11673_vm5, %v11658_v28  ;;  %v15082_v19 = vadd.f32 %v15081_v49, %v15026_v37  ;;  %v11540_v20 = vpop.f32.mrb[19].mxu1 }
 0x539   : > { %11690 = vst.msk [vmem:[%s19357_s29 + $0x80] sm:$0xff] %vm11673_vm5, %v11657_v47  ;;  %v15084_v0 = vadd.f32 %v15083_v45, %v11540_v20 }
 0x53a   : > { %v11660_v53 = vmax.f32 %v15082_v19, 0.0 }
 0x53b   : > { %v11659_v11 = vmax.f32 %v15084_v0, 0.0  ;;  %v15029_v14 = vpop.f32.mrb[20].mxu1 }
 0x53c   : > { %11693 = vst.msk [vmem:[%s19357_s29 + $0x98] sm:$0xff] %vm11673_vm5, %v11660_v53  ;;  %v15086_v34 = vadd.f32 %v15085_v23, %v15029_v14  ;;  %v11550_v52 = vpop.f32.mrb[21].mxu1 }
 0x53d   : > { %11692 = vst.msk [vmem:[%s19357_s29 + $0x90] sm:$0xff] %vm11673_vm5, %v11659_v11  ;;  %v15088_v33 = vadd.f32 %v15087_v4, %v11550_v52 }
 0x53e   : > { %v11662_v36 = vmax.f32 %v15086_v34, 0.0 }
 0x53f   : > { %v11661_v58 = vmax.f32 %v15088_v33, 0.0  ;;  %v15032_v60 = vpop.f32.mrb[22].mxu1 }
 0x540   : > { %11695 = vst.msk [vmem:[%s19357_s29 + $0xa8] sm:$0xff] %vm11673_vm5, %v11662_v36  ;;  %v15090_v38 = vadd.f32 %v15089_v42, %v15032_v60  ;;  %v11560_v40 = vpop.f32.mrb[23].mxu1 }
 0x541   : > { %11694 = vst.msk [vmem:[%s19357_s29 + $0xa0] sm:$0xff] %vm11673_vm5, %v11661_v58  ;;  %v15092_v26 = vadd.f32 %v15091_v25, %v11560_v40 }
 0x542   : > { %v11664_v63 = vmax.f32 %v15090_v38, 0.0 }
 0x543   : > { %v11663_v16 = vmax.f32 %v15092_v26, 0.0  ;;  %v15035_v22 = vpop.f32.mrb[24].mxu1 }
 0x544   : > { %11697 = vst.msk [vmem:[%s19357_s29 + $0xb8] sm:$0xff] %vm11673_vm5, %v11664_v63  ;;  %v15094_v46 = vadd.f32 %v15093_v41, %v15035_v22  ;;  %v11570_v32 = vpop.f32.mrb[25].mxu1 }
 0x545   : > { %11696 = vst.msk [vmem:[%s19357_s29 + $0xb0] sm:$0xff] %vm11673_vm5, %v11663_v16  ;;  %v15096_v50 = vadd.f32 %v15095_v24, %v11570_v32 }
 0x546   : > { %v11666_v48 = vmax.f32 %v15094_v46, 0.0 }
 0x547   : > { %v11665_v59 = vmax.f32 %v15096_v50, 0.0  ;;  %v15038_v29 = vpop.f32.mrb[26].mxu1 }
 0x548   : > { %11699 = vst.msk [vmem:[%s19357_s29 + $0xc8] sm:$0xff] %vm11673_vm5, %v11666_v48  ;;  %v15098_v10 = vadd.f32 %v15097_v13, %v15038_v29  ;;  %v11580_v44 = vpop.f32.mrb[27].mxu1 }
 0x549   : > { %11698 = vst.msk [vmem:[%s19357_s29 + $0xc0] sm:$0xff] %vm11673_vm5, %v11665_v59  ;;  %v15100_v12 = vadd.f32 %v15099_v30, %v11580_v44 }
 0x54a   : > { %v11668_v21 = vmax.f32 %v15098_v10, 0.0 }
 0x54b   : > { %v11667_v3 = vmax.f32 %v15100_v12, 0.0  ;;  %v15041_v18 = vpop.f32.mrb[28].mxu1 }
 0x54c   : > { %11701 = vst.msk [vmem:[%s19357_s29 + $0xd8] sm:$0xff] %vm11673_vm5, %v11668_v21  ;;  %v15102_v35 = vadd.f32 %v15101_v17, %v15041_v18  ;;  %v11590_v9 = vpop.f32.mrb[29].mxu1 }
 0x54d   : > { %11700 = vst.msk [vmem:[%s19357_s29 + $0xd0] sm:$0xff] %vm11673_vm5, %v11667_v3  ;;  %v15104_v6 = vadd.f32 %v15103_v31, %v11590_v9 }
 0x54e   : > { %v11670_v8 = vmax.f32 %v15102_v35, 0.0 }
 0x54f   : > { %v11669_v55 = vmax.f32 %v15104_v6, 0.0  ;;  %v15044_v7 = vpop.f32.mrb[30].mxu1 }
 0x550   : > { %11703 = vst.msk [vmem:[%s19357_s29 + $0xe8] sm:$0xff] %vm11673_vm5, %v11670_v8  ;;  %v15106_v43 = vadd.f32 %v15105_v2, %v15044_v7  ;;  %v11600_v61 = vpop.f32.mrb[31].mxu1 }
 0x551   : > { %11702 = vst.msk [vmem:[%s19357_s29 + $0xe0] sm:$0xff] %vm11673_vm5, %v11669_v55  ;;  %v15108_v39 = vadd.f32 %v15107_v54, %v11600_v61 }
 0x552   : > { %v11672_v5 = vmax.f32 %v15106_v43, 0.0 }
 0x553   : > { %v11671_v15 = vmax.f32 %v15108_v39, 0.0 }
 0x554   : > { %11705 = vst.msk [vmem:[%s19357_s29 + $0xf8] sm:$0xff] %vm11673_vm5, %v11672_v5 }
 0x555   : > { %11704 = vst.msk [vmem:[%s19357_s29 + $0xf0] sm:$0xff] %vm11673_vm5, %v11671_v15 }
 0x556   : > { %15965 = shalt.err (!%p15962_p3)
}
 0x557   : > { %s15966_s20 = scalar_lea.hbm %s19480_s15, 4096  ;;  %s15970_s23 = scalar_lea.hbm %s19538_s7, 8192 }
 0x558   : > { %p15967_p4 = scmp.ne.s32.totalorder %s19480_s15, %s15966_s20  ;;  %p15971_p9 = scmp.lt.u32.totalorder %s19480_s15, %s19538_s7 }
 0x559   : > { %p15972_p10 = scmp.lt.u32.totalorder %s15970_s23, %s15966_s20  ;;  %p15974_p12 = scmp.lt.u32.totalorder %s15966_s20, %s19480_s15 }
 0x55a   : > { %p15968_p7 = pnand %p15967_p4, %p16099_p5 }
 0x55b   : > { %p15973_p11 = por %p15972_p10, %p15971_p9 }
 0x55c   : > { %p15969_p8 = pneg %p15968_p7 }
 0x55d   : > { %p15975_p13 = por %p15974_p12, %p15973_p11 }
 0x55f   : > { %p15976_p0 = pnand %p15975_p13, %p15969_p8 }
 0x561   : > { %15979 = shalt.err (!%p15976_p0)
}
 0x562   : > { %s16019_s13 = smov 128   ;;  %s16020_s14 = smov 8  }
 0x563   : > { %15909 = dma.vmem_to_hbm [thread:$0]  (%p16099_p5), %s19482_s9, 4096, %s19480_s15, %s19490_s28, %s16019_s13, %s16019_s13, %s16020_s14  }
 0x564 PF: > { %p15915_p1 = scmp.ge.s32.totalorder %s16014_s27, 2  ;;  %s11735_s16 = sand.u32 1, %s16002_s24  }
 0x565   : > { %s11736_s17 = scalar_lea.sflag [#allocation5], %s11735_s16 }
 0x566   : > { %p15912_p2 = pnand %p15915_p1, %p16103_p6 }
 0x568   : > { %15997 = dma.done.wait (!%p15912_p2), %s11736_s17, 4096  }
 0x569   : > { %15999 = vsyncadd (!%p15912_p2), %s11736_s17, 4294963200  ;;  %p17_p3 = scmp.ge.s32.totalorder %s16086_s30, 4   ;;  %s19574_s24 = smov %s16006_s25 }
 0x56a   : > { %s19575_s25 = smov %s16010_s26  ;;  %s19576_s26 = smov %s16097_s10 }
 0x56b   : > { %s19577_s27 = smov %s16086_s30  ;;  %19 = sbr.rel (!%p17_p3) target bundleno = 3 (0x3), region = 113 }
 0x572   :  { %11741 = vsyncpa [#allocation5], 1 }
 0x573   :  { %11743 = vsyncpa [#allocation5 + $0x1], 1 }

</bundles_post_ra>
